<compile_context>
chip_gen: v5e
topology: v5e:2x2
jax: 0.10.0
libtpu: 0.0.40
codegen_flags: <defaults>
</compile_context>

<pallas_src>
import numpy as np
import jax
import jax.numpy as jnp
from jax.experimental import pallas as pl
from jax.experimental.pallas import tpu as pltpu

# ----------------------------- config ---------------------------------------
EDGE_FEATURES = 32            # edge_features
NODE_FEATURES = 32            # node_features
NUM_RBF = 16
TOP_K = 30
MAX_REL = 32                  # PositionalEncodings.max_relative_feature
NUM_POS = 2 * MAX_REL + 1     # 65
NUM_POS_PAD = 128             # per-edge one-hot block width (lane group)
D_MIN, D_MAX = 2.0, 22.0
INV_SIGMA = float(NUM_RBF) / (D_MAX - D_MIN)      # 0.8
MU = np.linspace(D_MIN, D_MAX, NUM_RBF)           # 16 RBF centers
LN_EPS = 1e-5                 # torch.nn.LayerNorm default

QUAD = 4                      # edges packed per 128-lane row
PACK_W = 32                   # per-edge packed slot width (25 dist + didx + pad)
DIDX_COL = 25                 # didx slot inside the 32-wide packed block
RBF_K = NUM_RBF * QUAD * PACK_W   # 2048  (rbf slab width)
OH_K = QUAD * NUM_POS_PAD         # 512   (one-hot slab width)

# Atom indices in X[:, :, atom, :]: N=0, CA=1, C=2, CB=3, O=4.
# 24 extra (A_i, B_j) pairs in the exact torch forward order.
_PAIR_A = np.array([0, 2, 4, 3, 1, 1, 1, 1, 0, 0, 0, 3, 3, 4,
                    0, 2, 4, 3, 2, 4, 3, 2, 4, 2], np.int32)
_PAIR_B = np.array([0, 2, 4, 3, 0, 2, 4, 3, 2, 4, 3, 2, 4, 2,
                    1, 1, 1, 1, 0, 0, 0, 3, 3, 4], np.int32)


def _round_up(n, m):
    return ((n + m - 1) // m) * m


# ----------------------------- Pallas kernel ---------------------------------
def _edge_kernel(dq_ref, w_rbf_ref, w_oh_ref, g_ref, b_ref, out_ref):
    """Quad-packed edge featurization.

    dq_ref : [bm, 128] f32, 4 edges per row, each edge a 32-wide packed block
             [d_0..d_24, didx, 0...].
    Pipeline: VPU/EUP RBF expansion (no MXU) -> one-hot block -> two bf16 MXU
    dots against block-diagonal fused weights (f32 accumulate) -> per-edge
    (32-lane) LayerNorm -> lane-dense [bm,128] store.
    """
    bm = dq_ref.shape[0]
    dq = dq_ref[...]                                          # [bm, 128] f32

    # --- RBF slab: 16 centers x (4 edges x 32 packed slots), VPU/EUP only ---
    rbf_parts = []
    for j in range(NUM_RBF):                                  # static unroll
        z = (dq - float(MU[j])) * INV_SIGMA
        rbf_parts.append(jnp.exp(-(z * z)).astype(jnp.bfloat16))
    rbf = jnp.concatenate(rbf_parts, axis=-1)                 # [bm, 2048] bf16

    # --- positional one-hot: one 128-lane block per packed edge (65 used) ---
    cls = jax.lax.broadcasted_iota(jnp.int32, (bm, NUM_POS_PAD), 1)
    oh_parts = []
    for q in range(QUAD):
        c0 = q * PACK_W + DIDX_COL
        di = dq[:, c0:c0 + 1].astype(jnp.int32)               # [bm, 1]
        oh_parts.append(
            (cls == di).astype(jnp.float32).astype(jnp.bfloat16))
    onehot = jnp.concatenate(oh_parts, axis=-1)               # [bm, 512] bf16

    # --- MXU: block-diagonal fused weights (b_pos folded), f32 accumulate ---
    acc = jnp.dot(rbf, w_rbf_ref[...], preferred_element_type=jnp.float32)
    acc = acc + jnp.dot(onehot, w_oh_ref[...],
                        preferred_element_type=jnp.float32)   # [bm, 128] f32

    # --- per-edge LayerNorm on each 32-lane block (f32 stats) ---
    ln_parts = []
    for q in range(QUAD):
        h = acc[:, q * EDGE_FEATURES:(q + 1) * EDGE_FEATURES]
        m = jnp.mean(h, axis=-1, keepdims=True)
        v = jnp.mean((h - m) ** 2, axis=-1, keepdims=True)
        ln_parts.append((h - m) * jax.lax.rsqrt(v + LN_EPS))
    xhat = jnp.concatenate(ln_parts, axis=-1)                 # [bm, 128]
    out_ref[...] = xhat * g_ref[...] + b_ref[...]


def edge_embed_pallas(dpack_q, w_rbf, w_oh, g_pack, b_pack, *,
                      bm_max=256, vmem_limit_bytes=48 * 1024 * 1024):
    """dpack_q: [M4, 128] f32 quad-packed edges -> [M4, 128] f32 embeddings."""
    M4 = dpack_q.shape[0]
    bm = min(bm_max, _round_up(max(M4, 8), 8))
    M4_pad = _round_up(M4, bm)
    if M4_pad != M4:
        dpack_q = jnp.pad(dpack_q, ((0, M4_pad - M4), (0, 0)))

    out = pl.pallas_call(
        _edge_kernel,
        out_shape=jax.ShapeDtypeStruct((M4_pad, QUAD * EDGE_FEATURES),
                                       jnp.float32),
        grid=(M4_pad // bm,),
        in_specs=[
            pl.BlockSpec((bm, QUAD * PACK_W), lambda i: (i, 0)),
            pl.BlockSpec(w_rbf.shape, lambda i: (0, 0)),
            pl.BlockSpec(w_oh.shape, lambda i: (0, 0)),
            pl.BlockSpec(g_pack.shape, lambda i: (0, 0)),
            pl.BlockSpec(b_pack.shape, lambda i: (0, 0)),
        ],
        out_specs=pl.BlockSpec((bm, QUAD * EDGE_FEATURES), lambda i: (i, 0)),
        compiler_params=pltpu.CompilerParams(
            dimension_semantics=("parallel",),
            vmem_limit_bytes=vmem_limit_bytes),
    )(dpack_q, w_rbf, w_oh, g_pack, b_pack)
    return out[:M4]


# ----------------------------- weight packing ---------------------------------
def _pack_edge_weights(W_edge, W_pos, b_pos):
    """Block-diagonal fused bf16 weights for the quad-packed edge kernel.

      w_rbf[j*128 + q*32 + p, q*32 + n] = W_edge[p*16 + j, n]     (p < 25)
      w_oh [q*128 + c,        q*32 + n] = W_pos[c, n] + b_pos[n]  (c < 65)
    """
    eye = jnp.eye(QUAD, dtype=jnp.float32)

    We = W_edge.reshape(25, NUM_RBF, EDGE_FEATURES)                # [p, j, n]
    We = jnp.pad(We, ((0, PACK_W - 25), (0, 0), (0, 0)))           # [32,16,32]
    w_rbf = jnp.einsum('pjn,qr->jqprn', We, eye)
    w_rbf = w_rbf.reshape(RBF_K, QUAD * EDGE_FEATURES)             # [2048,128]

    Wp = W_pos + b_pos                                             # fold bias (exact)
    Wp = jnp.pad(Wp, ((0, NUM_POS_PAD - NUM_POS), (0, 0)))         # [128, 32]
    w_oh = jnp.einsum('cn,qr->qcrn', Wp, eye)
    w_oh = w_oh.reshape(OH_K, QUAD * EDGE_FEATURES)                # [512, 128]

    return w_rbf.astype(jnp.bfloat16), w_oh.astype(jnp.bfloat16)


# ----------------------------- plain-JAX glue --------------------------------
def _normalize(v, axis=-1, eps=1e-12):
    n = jnp.sqrt(jnp.sum(v * v, axis=axis, keepdims=True))
    return v / jnp.maximum(n, eps)


def _dist(Ca, mask, top_k, eps=1e-6):
    """Mirror of ProteinFeatures._dist (top-k nearest CA neighbors)."""
    mask_2D = mask[:, None, :] * mask[:, :, None]
    dX = Ca[:, None, :, :] - Ca[:, :, None, :]
    D = mask_2D * jnp.sqrt(jnp.sum(dX ** 2, axis=-1) + eps)
    D_max = jnp.max(D, axis=-1, keepdims=True)
    D_adjust = D + (1.0 - mask_2D) * D_max
    K = int(np.minimum(top_k, Ca.shape[1]))
    neg_vals, E_idx = jax.lax.top_k(-D_adjust, K)
    D_neighbors = -neg_vals
    mask_neighbors = jnp.take_along_axis(mask_2D, E_idx, axis=2)[..., None]
    return D_neighbors, E_idx, mask_neighbors


def _gather_neighbor_atoms(X, E_idx):
    """X:[B,L,5,3], E_idx:[B,L,K] -> neighbor atom coords [B,L,K,5,3]."""
    B, L = X.shape[0], X.shape[1]
    K = E_idx.shape[-1]
    Xflat = X.reshape(B, L, 15)
    idx = E_idx.reshape(B, L * K, 1)
    g = jnp.take_along_axis(Xflat, idx, axis=1)
    return g.reshape(B, L, K, 5, 3)


def _pair_distances(X, D_neighbors, E_idx):
    """25 per-edge distances (Ca-Ca + the 24 torch-ordered pairs) and didx."""
    B, Lr = X.shape[0], X.shape[1]
    Xn = _gather_neighbor_atoms(X, E_idx)                          # [B,L,K,5,3]
    A_sel = X[:, :, _PAIR_A, :]                                    # [B,L,24,3]
    B_sel = Xn[:, :, :, _PAIR_B, :]                                # [B,L,K,24,3]
    D24 = jnp.sqrt(jnp.sum((A_sel[:, :, None, :, :] - B_sel) ** 2,
                           axis=-1) + 1e-6)
    D25 = jnp.concatenate([D_neighbors[..., None], D24], axis=-1)  # [B,L,K,25]
    offset = jnp.arange(Lr)[None, :, None] - E_idx
    didx = jnp.clip(offset + MAX_REL, 0, 2 * MAX_REL)              # [B,L,K]
    return D25, didx


def _dihedrals(X, eps=1e-7):
    """Mirror of ProteinFeatures._dihedrals -> [B, L, 6]."""
    B, Lr = X.shape[0], X.shape[1]
    Xb = X[:, :, :3, :].reshape(B, 3 * Lr, 3)
    dX = Xb[:, 1:, :] - Xb[:, :-1, :]
    U = _normalize(dX)
    u_2, u_1, u_0 = U[:, :-2, :], U[:, 1:-1, :], U[:, 2:, :]
    n_2 = _normalize(jnp.cross(u_2, u_1))
    n_1 = _normalize(jnp.cross(u_1, u_0))
    cosD = jnp.clip(jnp.sum(n_2 * n_1, axis=-1), -1 + eps, 1 - eps)
    D = jnp.sign(jnp.sum(u_2 * n_1, axis=-1)) * jnp.arccos(cosD)
    D = jnp.pad(D, ((0, 0), (1, 2)))
    D = D.reshape(B, Lr, 3)
    return jnp.concatenate([jnp.cos(D), jnp.sin(D)], axis=-1)


def _backbone_frame(X):
    """get_bb_frames + 4x4 assembly.  Returns raw [B,L,4,4] frames."""
    coords = X[:, :, 0:3, :]
    v1 = coords[:, :, 2] - coords[:, :, 1]
    v2 = coords[:, :, 0] - coords[:, :, 1]
    e1 = _normalize(v1)
    u2 = v2 - e1 * jnp.sum(e1 * v2, axis=-1, keepdims=True)
    e2 = _normalize(u2)
    e3 = jnp.cross(e1, e2)
    R = jnp.stack([e1, e2, e3], axis=-2)
    t = coords[:, :, 1]
    frame = jnp.zeros((X.shape[0], X.shape[1], 4, 4), jnp.float32)
    frame = frame.at[..., :3, :3].set(R)
    frame = frame.at[..., :3, 3].set(t)
    # TODO(synk): openfold rigid_utils.Rigid.from_tensor_4x4 wrapper is not
    # available here; return the raw 4x4 frame tensor instead of a Rigid.
    return frame


def init_params(key):
    ks = jax.random.split(key, 4)
    return {
        "W_edge": 0.05 * jax.random.normal(ks[0], (25 * NUM_RBF, EDGE_FEATURES),
                                           jnp.float32),
        "W_pos": 0.05 * jax.random.normal(ks[1], (NUM_POS, EDGE_FEATURES),
                                          jnp.float32),
        "b_pos": 0.05 * jax.random.normal(ks[2], (1, EDGE_FEATURES),
                                          jnp.float32),
        "g_edge": jnp.ones((1, EDGE_FEATURES), jnp.float32),
        "b_edge": jnp.zeros((1, EDGE_FEATURES), jnp.float32),
        "W_node": 0.1 * jax.random.normal(ks[3], (6, NODE_FEATURES),
                                          jnp.float32),
        "g_node": jnp.ones((1, NODE_FEATURES), jnp.float32),
        "b_node": jnp.zeros((1, NODE_FEATURES), jnp.float32),
    }


def protein_features_forward(X, mask, params):
    """Forward pass of ProteinFeatures (noise_2D = noise_3D = 0)."""
    B, Lr = X.shape[0], X.shape[1]

    bb_frame = _backbone_frame(X)

    Ca = X[:, :, 1, :]
    D_neighbors, E_idx, _mask_neighbors = _dist(Ca, mask, TOP_K)
    K = E_idx.shape[-1]

    # TODO(synk): the E_idx-dependent neighbor gather / D25 / dpack packing is
    # still plain XLA; fusing it into the kernel needs scalar-prefetched E_idx
    # and an in-kernel coordinate gather (review item #8).
    D25, didx = _pair_distances(X, D_neighbors, E_idx)

    # Pack 4 edges per 128-lane row: [d_0..d_24, didx, 0...] per edge.
    M = B * Lr * K
    dpack = jnp.concatenate([
        D25.reshape(M, 25).astype(jnp.float32),
        didx.reshape(M, 1).astype(jnp.float32),
        jnp.zeros((M, PACK_W - DIDX_COL - 1), jnp.float32),
    ], axis=-1)                                                    # [M, 32]
    Mq = _round_up(M, QUAD)
    if Mq != M:
        dpack = jnp.pad(dpack, ((0, Mq - M), (0, 0)))
    dpack_q = dpack.reshape(Mq // QUAD, QUAD * PACK_W)             # [M/4, 128]

    w_rbf, w_oh = _pack_edge_weights(params["W_edge"], params["W_pos"],
                                     params["b_pos"])
    g_pack = jnp.tile(params["g_edge"], (1, QUAD))                 # [1, 128]
    b_pack = jnp.tile(params["b_edge"], (1, QUAD))                 # [1, 128]

    Eq = edge_embed_pallas(dpack_q, w_rbf, w_oh, g_pack, b_pack)   # [M/4, 128]
    E = Eq.reshape(Mq, EDGE_FEATURES)[:M].reshape(B, Lr, K, EDGE_FEATURES)

    # --- node path: tiny 6->32 matmul + LN kept in plain XLA (review #9) ---
    Dfeat = _dihedrals(X)                                          # [B, L, 6]
    V = jnp.einsum('bld,dc->blc', Dfeat, params["W_node"])
    vm = jnp.mean(V, axis=-1, keepdims=True)
    vv = jnp.mean((V - vm) ** 2, axis=-1, keepdims=True)
    V = (V - vm) * jax.lax.rsqrt(vv + LN_EPS) * params["g_node"] \
        + params["b_node"]

    return V, E, E_idx, bb_frame


# ----------------------------- pure-JAX reference ----------------------------
def edge_reference(X, mask, params):
    """Straightforward f32 reference for the edge embedding path."""
    B, Lr = X.shape[0], X.shape[1]
    Ca = X[:, :, 1, :]
    D_neighbors, E_idx, _ = _dist(Ca, mask, TOP_K)
    K = E_idx.shape[-1]
    D25, didx = _pair_distances(X, D_neighbors, E_idx)
    mu = jnp.linspace(D_MIN, D_MAX, NUM_RBF)
    sig = (D_MAX - D_MIN) / NUM_RBF
    rbf = jnp.exp(-(((D25[..., None] - mu) / sig) ** 2))
    rbf = rbf.reshape(B, Lr, K, 25 * NUM_RBF)
    onehot = jax.nn.one_hot(didx, NUM_POS, dtype=jnp.float32)
    Eh = rbf @ params["W_edge"] + onehot @ params["W_pos"] + params["b_pos"]
    m = jnp.mean(Eh, axis=-1, keepdims=True)
    v = jnp.mean((Eh - m) ** 2, axis=-1, keepdims=True)
    return (Eh - m) * jax.lax.rsqrt(v + LN_EPS) * params["g_edge"] \
        + params["b_edge"]


# ----------------------------- demo ------------------------------------------
if __name__ == "__main__":
    B, Lres, A = 2, 8, 5
    key = jax.random.PRNGKey(0)
    kx, kp = jax.random.split(key)
    X = 3.0 * jax.random.normal(kx, (B, Lres, A, 3), jnp.float32)
    mask = jnp.ones((B, Lres), jnp.float32).at[1, 6:].set(0.0)
    params = init_params(kp)

    fwd = jax.jit(protein_features_forward)
    V, E, E_idx, bb_frame = fwd(X, mask, params)
    jax.block_until_ready((V, E, E_idx, bb_frame))

    Kn = min(TOP_K, Lres)
    assert V.shape == (B, Lres, NODE_FEATURES)
    assert E.shape == (B, Lres, Kn, EDGE_FEATURES)
    assert E_idx.shape == (B, Lres, Kn)
    assert bb_frame.shape == (B, Lres, 4, 4)
    assert bool(jnp.all(jnp.isfinite(V))) and bool(jnp.all(jnp.isfinite(E)))

    # Numerical check of the Pallas edge path against the f32 reference
    # (bf16 MXU weights -> loose tolerance).
    E_ref = edge_reference(X, mask, params)
    err = float(jnp.max(jnp.abs(E - E_ref)))
    assert err < 0.15, f"edge embedding mismatch: max abs err {err}"

    print("KERNEL_OK")
</pallas_src>

<mosaic_0001>
module attributes {stable_mosaic.version = 11 : i64} {
  func.func @_edge_kernel(%arg0: i32, %arg1: memref<32x128xf32, #tpu.memory_space<vmem>>, %arg2: memref<2048x128xbf16, #tpu.memory_space<vmem>>, %arg3: memref<512x128xbf16, #tpu.memory_space<vmem>>, %arg4: memref<1x128xf32, #tpu.memory_space<vmem>>, %arg5: memref<1x128xf32, #tpu.memory_space<vmem>>, %arg6: memref<32x128xf32, #tpu.memory_space<vmem>>) attributes {dimension_semantics = [#tpu.dimension_semantics<parallel>], iteration_bounds = array<i64: 1>, scalar_prefetch = 0 : i64, scratch_operands = 0 : i64, tpu.core_type = #tpu.core_type<tc>, window_params = [{transform_indices = @transform_0, window_bounds = array<i64: 32, 128>}, {pipeline_mode = #tpu.pipeline_mode<synchronous>, transform_indices = @transform_1, window_bounds = array<i64: 2048, 128>}, {pipeline_mode = #tpu.pipeline_mode<synchronous>, transform_indices = @transform_2, window_bounds = array<i64: 512, 128>}, {pipeline_mode = #tpu.pipeline_mode<synchronous>, transform_indices = @transform_3, window_bounds = array<i64: 1, 128>}, {pipeline_mode = #tpu.pipeline_mode<synchronous>, transform_indices = @transform_4, window_bounds = array<i64: 1, 128>}, {transform_indices = @transform_5, window_bounds = array<i64: 32, 128>}]} {
    %c0 = arith.constant 0 : index
    %c0_0 = arith.constant 0 : index
    %0 = vector.load %arg1[%c0, %c0_0] : memref<32x128xf32, #tpu.memory_space<vmem>>, vector<32x128xf32>
    %cst = arith.constant 2.000000e+00 : f32
    %1 = vector.broadcast %cst : f32 to vector<32x128xf32>
    %2 = arith.subf %0, %1 : vector<32x128xf32>
    %cst_1 = arith.constant 8.000000e-01 : f32
    %3 = vector.broadcast %cst_1 : f32 to vector<32x128xf32>
    %4 = arith.mulf %2, %3 : vector<32x128xf32>
    %5 = arith.mulf %4, %4 : vector<32x128xf32>
    %cst_2 = arith.constant 0.000000e+00 : f32
    %6 = vector.broadcast %cst_2 : f32 to vector<32x128xf32>
    %7 = arith.subf %6, %5 : vector<32x128xf32>
    %8 = math.exp %7 : vector<32x128xf32>
    %9 = arith.truncf %8 : vector<32x128xf32> to vector<32x128xbf16>
    %cst_3 = arith.constant 3.33333325 : f32
    %10 = vector.broadcast %cst_3 : f32 to vector<32x128xf32>
    %11 = arith.subf %0, %10 : vector<32x128xf32>
    %cst_4 = arith.constant 8.000000e-01 : f32
    %12 = vector.broadcast %cst_4 : f32 to vector<32x128xf32>
    %13 = arith.mulf %11, %12 : vector<32x128xf32>
    %14 = arith.mulf %13, %13 : vector<32x128xf32>
    %cst_5 = arith.constant 0.000000e+00 : f32
    %15 = vector.broadcast %cst_5 : f32 to vector<32x128xf32>
    %16 = arith.subf %15, %14 : vector<32x128xf32>
    %17 = math.exp %16 : vector<32x128xf32>
    %18 = arith.truncf %17 : vector<32x128xf32> to vector<32x128xbf16>
    %cst_6 = arith.constant 4.66666651 : f32
    %19 = vector.broadcast %cst_6 : f32 to vector<32x128xf32>
    %20 = arith.subf %0, %19 : vector<32x128xf32>
    %cst_7 = arith.constant 8.000000e-01 : f32
    %21 = vector.broadcast %cst_7 : f32 to vector<32x128xf32>
    %22 = arith.mulf %20, %21 : vector<32x128xf32>
    %23 = arith.mulf %22, %22 : vector<32x128xf32>
    %cst_8 = arith.constant 0.000000e+00 : f32
    %24 = vector.broadcast %cst_8 : f32 to vector<32x128xf32>
    %25 = arith.subf %24, %23 : vector<32x128xf32>
    %26 = math.exp %25 : vector<32x128xf32>
    %27 = arith.truncf %26 : vector<32x128xf32> to vector<32x128xbf16>
    %cst_9 = arith.constant 6.000000e+00 : f32
    %28 = vector.broadcast %cst_9 : f32 to vector<32x128xf32>
    %29 = arith.subf %0, %28 : vector<32x128xf32>
    %cst_10 = arith.constant 8.000000e-01 : f32
    %30 = vector.broadcast %cst_10 : f32 to vector<32x128xf32>
    %31 = arith.mulf %29, %30 : vector<32x128xf32>
    %32 = arith.mulf %31, %31 : vector<32x128xf32>
    %cst_11 = arith.constant 0.000000e+00 : f32
    %33 = vector.broadcast %cst_11 : f32 to vector<32x128xf32>
    %34 = arith.subf %33, %32 : vector<32x128xf32>
    %35 = math.exp %34 : vector<32x128xf32>
    %36 = arith.truncf %35 : vector<32x128xf32> to vector<32x128xbf16>
    %cst_12 = arith.constant 7.33333349 : f32
    %37 = vector.broadcast %cst_12 : f32 to vector<32x128xf32>
    %38 = arith.subf %0, %37 : vector<32x128xf32>
    %cst_13 = arith.constant 8.000000e-01 : f32
    %39 = vector.broadcast %cst_13 : f32 to vector<32x128xf32>
    %40 = arith.mulf %38, %39 : vector<32x128xf32>
    %41 = arith.mulf %40, %40 : vector<32x128xf32>
    %cst_14 = arith.constant 0.000000e+00 : f32
    %42 = vector.broadcast %cst_14 : f32 to vector<32x128xf32>
    %43 = arith.subf %42, %41 : vector<32x128xf32>
    %44 = math.exp %43 : vector<32x128xf32>
    %45 = arith.truncf %44 : vector<32x128xf32> to vector<32x128xbf16>
    %cst_15 = arith.constant 8.66666698 : f32
    %46 = vector.broadcast %cst_15 : f32 to vector<32x128xf32>
    %47 = arith.subf %0, %46 : vector<32x128xf32>
    %cst_16 = arith.constant 8.000000e-01 : f32
    %48 = vector.broadcast %cst_16 : f32 to vector<32x128xf32>
    %49 = arith.mulf %47, %48 : vector<32x128xf32>
    %50 = arith.mulf %49, %49 : vector<32x128xf32>
    %cst_17 = arith.constant 0.000000e+00 : f32
    %51 = vector.broadcast %cst_17 : f32 to vector<32x128xf32>
    %52 = arith.subf %51, %50 : vector<32x128xf32>
    %53 = math.exp %52 : vector<32x128xf32>
    %54 = arith.truncf %53 : vector<32x128xf32> to vector<32x128xbf16>
    %cst_18 = arith.constant 1.000000e+01 : f32
    %55 = vector.broadcast %cst_18 : f32 to vector<32x128xf32>
    %56 = arith.subf %0, %55 : vector<32x128xf32>
    %cst_19 = arith.constant 8.000000e-01 : f32
    %57 = vector.broadcast %cst_19 : f32 to vector<32x128xf32>
    %58 = arith.mulf %56, %57 : vector<32x128xf32>
    %59 = arith.mulf %58, %58 : vector<32x128xf32>
    %cst_20 = arith.constant 0.000000e+00 : f32
    %60 = vector.broadcast %cst_20 : f32 to vector<32x128xf32>
    %61 = arith.subf %60, %59 : vector<32x128xf32>
    %62 = math.exp %61 : vector<32x128xf32>
    %63 = arith.truncf %62 : vector<32x128xf32> to vector<32x128xbf16>
    %cst_21 = arith.constant 11.333333 : f32
    %64 = vector.broadcast %cst_21 : f32 to vector<32x128xf32>
    %65 = arith.subf %0, %64 : vector<32x128xf32>
    %cst_22 = arith.constant 8.000000e-01 : f32
    %66 = vector.broadcast %cst_22 : f32 to vector<32x128xf32>
    %67 = arith.mulf %65, %66 : vector<32x128xf32>
    %68 = arith.mulf %67, %67 : vector<32x128xf32>
    %cst_23 = arith.constant 0.000000e+00 : f32
    %69 = vector.broadcast %cst_23 : f32 to vector<32x128xf32>
    %70 = arith.subf %69, %68 : vector<32x128xf32>
    %71 = math.exp %70 : vector<32x128xf32>
    %72 = arith.truncf %71 : vector<32x128xf32> to vector<32x128xbf16>
    %cst_24 = arith.constant 12.666667 : f32
    %73 = vector.broadcast %cst_24 : f32 to vector<32x128xf32>
    %74 = arith.subf %0, %73 : vector<32x128xf32>
    %cst_25 = arith.constant 8.000000e-01 : f32
    %75 = vector.broadcast %cst_25 : f32 to vector<32x128xf32>
    %76 = arith.mulf %74, %75 : vector<32x128xf32>
    %77 = arith.mulf %76, %76 : vector<32x128xf32>
    %cst_26 = arith.constant 0.000000e+00 : f32
    %78 = vector.broadcast %cst_26 : f32 to vector<32x128xf32>
    %79 = arith.subf %78, %77 : vector<32x128xf32>
    %80 = math.exp %79 : vector<32x128xf32>
    %81 = arith.truncf %80 : vector<32x128xf32> to vector<32x128xbf16>
    %cst_27 = arith.constant 1.400000e+01 : f32
    %82 = vector.broadcast %cst_27 : f32 to vector<32x128xf32>
    %83 = arith.subf %0, %82 : vector<32x128xf32>
    %cst_28 = arith.constant 8.000000e-01 : f32
    %84 = vector.broadcast %cst_28 : f32 to vector<32x128xf32>
    %85 = arith.mulf %83, %84 : vector<32x128xf32>
    %86 = arith.mulf %85, %85 : vector<32x128xf32>
    %cst_29 = arith.constant 0.000000e+00 : f32
    %87 = vector.broadcast %cst_29 : f32 to vector<32x128xf32>
    %88 = arith.subf %87, %86 : vector<32x128xf32>
    %89 = math.exp %88 : vector<32x128xf32>
    %90 = arith.truncf %89 : vector<32x128xf32> to vector<32x128xbf16>
    %cst_30 = arith.constant 15.333333 : f32
    %91 = vector.broadcast %cst_30 : f32 to vector<32x128xf32>
    %92 = arith.subf %0, %91 : vector<32x128xf32>
    %cst_31 = arith.constant 8.000000e-01 : f32
    %93 = vector.broadcast %cst_31 : f32 to vector<32x128xf32>
    %94 = arith.mulf %92, %93 : vector<32x128xf32>
    %95 = arith.mulf %94, %94 : vector<32x128xf32>
    %cst_32 = arith.constant 0.000000e+00 : f32
    %96 = vector.broadcast %cst_32 : f32 to vector<32x128xf32>
    %97 = arith.subf %96, %95 : vector<32x128xf32>
    %98 = math.exp %97 : vector<32x128xf32>
    %99 = arith.truncf %98 : vector<32x128xf32> to vector<32x128xbf16>
    %cst_33 = arith.constant 16.666666 : f32
    %100 = vector.broadcast %cst_33 : f32 to vector<32x128xf32>
    %101 = arith.subf %0, %100 : vector<32x128xf32>
    %cst_34 = arith.constant 8.000000e-01 : f32
    %102 = vector.broadcast %cst_34 : f32 to vector<32x128xf32>
    %103 = arith.mulf %101, %102 : vector<32x128xf32>
    %104 = arith.mulf %103, %103 : vector<32x128xf32>
    %cst_35 = arith.constant 0.000000e+00 : f32
    %105 = vector.broadcast %cst_35 : f32 to vector<32x128xf32>
    %106 = arith.subf %105, %104 : vector<32x128xf32>
    %107 = math.exp %106 : vector<32x128xf32>
    %108 = arith.truncf %107 : vector<32x128xf32> to vector<32x128xbf16>
    %cst_36 = arith.constant 1.800000e+01 : f32
    %109 = vector.broadcast %cst_36 : f32 to vector<32x128xf32>
    %110 = arith.subf %0, %109 : vector<32x128xf32>
    %cst_37 = arith.constant 8.000000e-01 : f32
    %111 = vector.broadcast %cst_37 : f32 to vector<32x128xf32>
    %112 = arith.mulf %110, %111 : vector<32x128xf32>
    %113 = arith.mulf %112, %112 : vector<32x128xf32>
    %cst_38 = arith.constant 0.000000e+00 : f32
    %114 = vector.broadcast %cst_38 : f32 to vector<32x128xf32>
    %115 = arith.subf %114, %113 : vector<32x128xf32>
    %116 = math.exp %115 : vector<32x128xf32>
    %117 = arith.truncf %116 : vector<32x128xf32> to vector<32x128xbf16>
    %cst_39 = arith.constant 19.333334 : f32
    %118 = vector.broadcast %cst_39 : f32 to vector<32x128xf32>
    %119 = arith.subf %0, %118 : vector<32x128xf32>
    %cst_40 = arith.constant 8.000000e-01 : f32
    %120 = vector.broadcast %cst_40 : f32 to vector<32x128xf32>
    %121 = arith.mulf %119, %120 : vector<32x128xf32>
    %122 = arith.mulf %121, %121 : vector<32x128xf32>
    %cst_41 = arith.constant 0.000000e+00 : f32
    %123 = vector.broadcast %cst_41 : f32 to vector<32x128xf32>
    %124 = arith.subf %123, %122 : vector<32x128xf32>
    %125 = math.exp %124 : vector<32x128xf32>
    %126 = arith.truncf %125 : vector<32x128xf32> to vector<32x128xbf16>
    %cst_42 = arith.constant 20.666666 : f32
    %127 = vector.broadcast %cst_42 : f32 to vector<32x128xf32>
    %128 = arith.subf %0, %127 : vector<32x128xf32>
    %cst_43 = arith.constant 8.000000e-01 : f32
    %129 = vector.broadcast %cst_43 : f32 to vector<32x128xf32>
    %130 = arith.mulf %128, %129 : vector<32x128xf32>
    %131 = arith.mulf %130, %130 : vector<32x128xf32>
    %cst_44 = arith.constant 0.000000e+00 : f32
    %132 = vector.broadcast %cst_44 : f32 to vector<32x128xf32>
    %133 = arith.subf %132, %131 : vector<32x128xf32>
    %134 = math.exp %133 : vector<32x128xf32>
    %135 = arith.truncf %134 : vector<32x128xf32> to vector<32x128xbf16>
    %cst_45 = arith.constant 2.200000e+01 : f32
    %136 = vector.broadcast %cst_45 : f32 to vector<32x128xf32>
    %137 = arith.subf %0, %136 : vector<32x128xf32>
    %cst_46 = arith.constant 8.000000e-01 : f32
    %138 = vector.broadcast %cst_46 : f32 to vector<32x128xf32>
    %139 = arith.mulf %137, %138 : vector<32x128xf32>
    %140 = arith.mulf %139, %139 : vector<32x128xf32>
    %cst_47 = arith.constant 0.000000e+00 : f32
    %141 = vector.broadcast %cst_47 : f32 to vector<32x128xf32>
    %142 = arith.subf %141, %140 : vector<32x128xf32>
    %143 = math.exp %142 : vector<32x128xf32>
    %144 = arith.truncf %143 : vector<32x128xf32> to vector<32x128xbf16>
    %145 = tpu.concatenate %9, %18, %27, %36, %45, %54, %63, %72, %81, %90, %99, %108, %117, %126, %135, %144 in 1 : vector<32x128xbf16>, vector<32x128xbf16>, vector<32x128xbf16>, vector<32x128xbf16>, vector<32x128xbf16>, vector<32x128xbf16>, vector<32x128xbf16>, vector<32x128xbf16>, vector<32x128xbf16>, vector<32x128xbf16>, vector<32x128xbf16>, vector<32x128xbf16>, vector<32x128xbf16>, vector<32x128xbf16>, vector<32x128xbf16>, vector<32x128xbf16> -> vector<32x2048xbf16>
    %146 = tpu.iota {dimensions = array<i32: 1>} : vector<32x128xi32>
    %147 = vector.extract_strided_slice %0 {offsets = [0, 25], sizes = [32, 1], strides = [1, 1]} : vector<32x128xf32> to vector<32x1xf32>
    %148 = arith.fptosi %147 : vector<32x1xf32> to vector<32x1xi32>
    %149 = vector.broadcast %148 : vector<32x1xi32> to vector<32x128xi32>
    %150 = arith.cmpi eq, %146, %149 : vector<32x128xi32>
    %151 = arith.extui %150 : vector<32x128xi1> to vector<32x128xi32>
    %152 = arith.sitofp %151 : vector<32x128xi32> to vector<32x128xf32>
    %153 = arith.truncf %152 : vector<32x128xf32> to vector<32x128xbf16>
    %154 = vector.extract_strided_slice %0 {offsets = [0, 57], sizes = [32, 1], strides = [1, 1]} : vector<32x128xf32> to vector<32x1xf32>
    %155 = arith.fptosi %154 : vector<32x1xf32> to vector<32x1xi32>
    %156 = vector.broadcast %155 : vector<32x1xi32> to vector<32x128xi32>
    %157 = arith.cmpi eq, %146, %156 : vector<32x128xi32>
    %158 = arith.extui %157 : vector<32x128xi1> to vector<32x128xi32>
    %159 = arith.sitofp %158 : vector<32x128xi32> to vector<32x128xf32>
    %160 = arith.truncf %159 : vector<32x128xf32> to vector<32x128xbf16>
    %161 = vector.extract_strided_slice %0 {offsets = [0, 89], sizes = [32, 1], strides = [1, 1]} : vector<32x128xf32> to vector<32x1xf32>
    %162 = arith.fptosi %161 : vector<32x1xf32> to vector<32x1xi32>
    %163 = vector.broadcast %162 : vector<32x1xi32> to vector<32x128xi32>
    %164 = arith.cmpi eq, %146, %163 : vector<32x128xi32>
    %165 = arith.extui %164 : vector<32x128xi1> to vector<32x128xi32>
    %166 = arith.sitofp %165 : vector<32x128xi32> to vector<32x128xf32>
    %167 = arith.truncf %166 : vector<32x128xf32> to vector<32x128xbf16>
    %168 = vector.extract_strided_slice %0 {offsets = [0, 121], sizes = [32, 1], strides = [1, 1]} : vector<32x128xf32> to vector<32x1xf32>
    %169 = arith.fptosi %168 : vector<32x1xf32> to vector<32x1xi32>
    %170 = vector.broadcast %169 : vector<32x1xi32> to vector<32x128xi32>
    %171 = arith.cmpi eq, %146, %170 : vector<32x128xi32>
    %172 = arith.extui %171 : vector<32x128xi1> to vector<32x128xi32>
    %173 = arith.sitofp %172 : vector<32x128xi32> to vector<32x128xf32>
    %174 = arith.truncf %173 : vector<32x128xf32> to vector<32x128xbf16>
    %175 = tpu.concatenate %153, %160, %167, %174 in 1 : vector<32x128xbf16>, vector<32x128xbf16>, vector<32x128xbf16>, vector<32x128xbf16> -> vector<32x512xbf16>
    %c0_48 = arith.constant 0 : index
    %c0_49 = arith.constant 0 : index
    %176 = vector.load %arg2[%c0_48, %c0_49] : memref<2048x128xbf16, #tpu.memory_space<vmem>>, vector<2048x128xbf16>
    %cst_50 = arith.constant dense<0.000000e+00> : vector<32x128xf32>
    %177 = tpu.matmul %145, %176, %cst_50 {dimension_numbers = #tpu.dot_dimension_numbers<[1], [0], [0], [1], [0, 0, 1, 1], [], []>} : vector<32x2048xbf16>, vector<2048x128xbf16>, vector<32x128xf32> -> vector<32x128xf32>
    %c0_51 = arith.constant 0 : index
    %c0_52 = arith.constant 0 : index
    %178 = vector.load %arg3[%c0_51, %c0_52] : memref<512x128xbf16, #tpu.memory_space<vmem>>, vector<512x128xbf16>
    %cst_53 = arith.constant dense<0.000000e+00> : vector<32x128xf32>
    %179 = tpu.matmul %175, %178, %cst_53 {dimension_numbers = #tpu.dot_dimension_numbers<[1], [0], [0], [1], [0, 0, 1, 1], [], []>} : vector<32x512xbf16>, vector<512x128xbf16>, vector<32x128xf32> -> vector<32x128xf32>
    %180 = arith.addf %177, %179 : vector<32x128xf32>
    %181 = vector.extract_strided_slice %180 {offsets = [0, 0], sizes = [32, 32], strides = [1, 1]} : vector<32x128xf32> to vector<32x32xf32>
    %cst_54 = arith.constant dense<0.000000e+00> : vector<32xf32>
    %182 = vector.multi_reduction <add>, %181, %cst_54 [1] : vector<32x32xf32> to vector<32xf32>
    %183 = vector.shape_cast %182 : vector<32xf32> to vector<32x1xf32>
    %cst_55 = arith.constant 3.200000e+01 : f32
    %184 = vector.broadcast %cst_55 : f32 to vector<32x1xf32>
    %185 = arith.divf %183, %184 : vector<32x1xf32>
    %186 = vector.broadcast %185 : vector<32x1xf32> to vector<32x32xf32>
    %187 = arith.subf %181, %186 : vector<32x32xf32>
    %188 = arith.mulf %187, %187 : vector<32x32xf32>
    %cst_56 = arith.constant dense<0.000000e+00> : vector<32xf32>
    %189 = vector.multi_reduction <add>, %188, %cst_56 [1] : vector<32x32xf32> to vector<32xf32>
    %190 = vector.shape_cast %189 : vector<32xf32> to vector<32x1xf32>
    %cst_57 = arith.constant 3.200000e+01 : f32
    %191 = vector.broadcast %cst_57 : f32 to vector<32x1xf32>
    %192 = arith.divf %190, %191 : vector<32x1xf32>
    %193 = vector.broadcast %185 : vector<32x1xf32> to vector<32x32xf32>
    %194 = arith.subf %181, %193 : vector<32x32xf32>
    %cst_58 = arith.constant 9.99999974E-6 : f32
    %195 = vector.broadcast %cst_58 : f32 to vector<32x1xf32>
    %196 = arith.addf %192, %195 : vector<32x1xf32>
    %197 = math.rsqrt %196 : vector<32x1xf32>
    %198 = vector.broadcast %197 : vector<32x1xf32> to vector<32x32xf32>
    %199 = arith.mulf %194, %198 : vector<32x32xf32>
    %200 = vector.extract_strided_slice %180 {offsets = [0, 32], sizes = [32, 32], strides = [1, 1]} : vector<32x128xf32> to vector<32x32xf32>
    %cst_59 = arith.constant dense<0.000000e+00> : vector<32xf32>
    %201 = vector.multi_reduction <add>, %200, %cst_59 [1] : vector<32x32xf32> to vector<32xf32>
    %202 = vector.shape_cast %201 : vector<32xf32> to vector<32x1xf32>
    %cst_60 = arith.constant 3.200000e+01 : f32
    %203 = vector.broadcast %cst_60 : f32 to vector<32x1xf32>
    %204 = arith.divf %202, %203 : vector<32x1xf32>
    %205 = vector.broadcast %204 : vector<32x1xf32> to vector<32x32xf32>
    %206 = arith.subf %200, %205 : vector<32x32xf32>
    %207 = arith.mulf %206, %206 : vector<32x32xf32>
    %cst_61 = arith.constant dense<0.000000e+00> : vector<32xf32>
    %208 = vector.multi_reduction <add>, %207, %cst_61 [1] : vector<32x32xf32> to vector<32xf32>
    %209 = vector.shape_cast %208 : vector<32xf32> to vector<32x1xf32>
    %cst_62 = arith.constant 3.200000e+01 : f32
    %210 = vector.broadcast %cst_62 : f32 to vector<32x1xf32>
    %211 = arith.divf %209, %210 : vector<32x1xf32>
    %212 = vector.broadcast %204 : vector<32x1xf32> to vector<32x32xf32>
    %213 = arith.subf %200, %212 : vector<32x32xf32>
    %cst_63 = arith.constant 9.99999974E-6 : f32
    %214 = vector.broadcast %cst_63 : f32 to vector<32x1xf32>
    %215 = arith.addf %211, %214 : vector<32x1xf32>
    %216 = math.rsqrt %215 : vector<32x1xf32>
    %217 = vector.broadcast %216 : vector<32x1xf32> to vector<32x32xf32>
    %218 = arith.mulf %213, %217 : vector<32x32xf32>
    %219 = vector.extract_strided_slice %180 {offsets = [0, 64], sizes = [32, 32], strides = [1, 1]} : vector<32x128xf32> to vector<32x32xf32>
    %cst_64 = arith.constant dense<0.000000e+00> : vector<32xf32>
    %220 = vector.multi_reduction <add>, %219, %cst_64 [1] : vector<32x32xf32> to vector<32xf32>
    %221 = vector.shape_cast %220 : vector<32xf32> to vector<32x1xf32>
    %cst_65 = arith.constant 3.200000e+01 : f32
    %222 = vector.broadcast %cst_65 : f32 to vector<32x1xf32>
    %223 = arith.divf %221, %222 : vector<32x1xf32>
    %224 = vector.broadcast %223 : vector<32x1xf32> to vector<32x32xf32>
    %225 = arith.subf %219, %224 : vector<32x32xf32>
    %226 = arith.mulf %225, %225 : vector<32x32xf32>
    %cst_66 = arith.constant dense<0.000000e+00> : vector<32xf32>
    %227 = vector.multi_reduction <add>, %226, %cst_66 [1] : vector<32x32xf32> to vector<32xf32>
    %228 = vector.shape_cast %227 : vector<32xf32> to vector<32x1xf32>
    %cst_67 = arith.constant 3.200000e+01 : f32
    %229 = vector.broadcast %cst_67 : f32 to vector<32x1xf32>
    %230 = arith.divf %228, %229 : vector<32x1xf32>
    %231 = vector.broadcast %223 : vector<32x1xf32> to vector<32x32xf32>
    %232 = arith.subf %219, %231 : vector<32x32xf32>
    %cst_68 = arith.constant 9.99999974E-6 : f32
    %233 = vector.broadcast %cst_68 : f32 to vector<32x1xf32>
    %234 = arith.addf %230, %233 : vector<32x1xf32>
    %235 = math.rsqrt %234 : vector<32x1xf32>
    %236 = vector.broadcast %235 : vector<32x1xf32> to vector<32x32xf32>
    %237 = arith.mulf %232, %236 : vector<32x32xf32>
    %238 = vector.extract_strided_slice %180 {offsets = [0, 96], sizes = [32, 32], strides = [1, 1]} : vector<32x128xf32> to vector<32x32xf32>
    %cst_69 = arith.constant dense<0.000000e+00> : vector<32xf32>
    %239 = vector.multi_reduction <add>, %238, %cst_69 [1] : vector<32x32xf32> to vector<32xf32>
    %240 = vector.shape_cast %239 : vector<32xf32> to vector<32x1xf32>
    %cst_70 = arith.constant 3.200000e+01 : f32
    %241 = vector.broadcast %cst_70 : f32 to vector<32x1xf32>
    %242 = arith.divf %240, %241 : vector<32x1xf32>
    %243 = vector.broadcast %242 : vector<32x1xf32> to vector<32x32xf32>
    %244 = arith.subf %238, %243 : vector<32x32xf32>
    %245 = arith.mulf %244, %244 : vector<32x32xf32>
    %cst_71 = arith.constant dense<0.000000e+00> : vector<32xf32>
    %246 = vector.multi_reduction <add>, %245, %cst_71 [1] : vector<32x32xf32> to vector<32xf32>
    %247 = vector.shape_cast %246 : vector<32xf32> to vector<32x1xf32>
    %cst_72 = arith.constant 3.200000e+01 : f32
    %248 = vector.broadcast %cst_72 : f32 to vector<32x1xf32>
    %249 = arith.divf %247, %248 : vector<32x1xf32>
    %250 = vector.broadcast %242 : vector<32x1xf32> to vector<32x32xf32>
    %251 = arith.subf %238, %250 : vector<32x32xf32>
    %cst_73 = arith.constant 9.99999974E-6 : f32
    %252 = vector.broadcast %cst_73 : f32 to vector<32x1xf32>
    %253 = arith.addf %249, %252 : vector<32x1xf32>
    %254 = math.rsqrt %253 : vector<32x1xf32>
    %255 = vector.broadcast %254 : vector<32x1xf32> to vector<32x32xf32>
    %256 = arith.mulf %251, %255 : vector<32x32xf32>
    %257 = tpu.concatenate %199, %218, %237, %256 in 1 : vector<32x32xf32>, vector<32x32xf32>, vector<32x32xf32>, vector<32x32xf32> -> vector<32x128xf32>
    %c0_74 = arith.constant 0 : index
    %c0_75 = arith.constant 0 : index
    %258 = vector.load %arg4[%c0_74, %c0_75] : memref<1x128xf32, #tpu.memory_space<vmem>>, vector<1x128xf32>
    %259 = vector.broadcast %258 : vector<1x128xf32> to vector<32x128xf32>
    %260 = arith.mulf %257, %259 : vector<32x128xf32>
    %c0_76 = arith.constant 0 : index
    %c0_77 = arith.constant 0 : index
    %261 = vector.load %arg5[%c0_76, %c0_77] : memref<1x128xf32, #tpu.memory_space<vmem>>, vector<1x128xf32>
    %262 = vector.broadcast %261 : vector<1x128xf32> to vector<32x128xf32>
    %263 = arith.addf %260, %262 : vector<32x128xf32>
    %c0_78 = arith.constant 0 : index
    %c0_79 = arith.constant 0 : index
    %264 = vector.load %arg6[%c0_78, %c0_79] : memref<32x128xf32, #tpu.memory_space<vmem>>, vector<32x128xf32>
    tpu.vector_store %arg6[%c0_78, %c0_79], %263 {strides = array<i32>} : memref<32x128xf32, #tpu.memory_space<vmem>>, vector<32x128xf32>,
    return
  }
  func.func @transform_0(%arg0: i32) -> (i32, i32) {
    %c0_i32 = arith.constant 0 : i32
    %c0_i32_0 = arith.constant 0 : i32
    return %arg0, %c0_i32 : i32, i32
  }
  func.func @transform_1(%arg0: i32) -> (i32, i32) {
    %c0_i32 = arith.constant 0 : i32
    %c0_i32_0 = arith.constant 0 : i32
    %c0_i32_1 = arith.constant 0 : i32
    return %c0_i32, %c0_i32_0 : i32, i32
  }
  func.func @transform_2(%arg0: i32) -> (i32, i32) {
    %c0_i32 = arith.constant 0 : i32
    %c0_i32_0 = arith.constant 0 : i32
    %c0_i32_1 = arith.constant 0 : i32
    return %c0_i32, %c0_i32_0 : i32, i32
  }
  func.func @transform_3(%arg0: i32) -> (i32, i32) {
    %c0_i32 = arith.constant 0 : i32
    %c0_i32_0 = arith.constant 0 : i32
    %c0_i32_1 = arith.constant 0 : i32
    return %c0_i32, %c0_i32_0 : i32, i32
  }
  func.func @transform_4(%arg0: i32) -> (i32, i32) {
    %c0_i32 = arith.constant 0 : i32
    %c0_i32_0 = arith.constant 0 : i32
    %c0_i32_1 = arith.constant 0 : i32
    return %c0_i32, %c0_i32_0 : i32, i32
  }
  func.func @transform_5(%arg0: i32) -> (i32, i32) {
    %c0_i32 = arith.constant 0 : i32
    %c0_i32_0 = arith.constant 0 : i32
    return %arg0, %c0_i32 : i32, i32
  }
}

</mosaic_0001>

<bundles_post_ra>
// kernel: neg.3
= control target key start
LH: loop header
LB: loop body
LE: loop exit
PB: predicated region body
PF: predicated region fallthrough
CT: control target
= control target key end

     0   :  { %s40_s0 = inlined_call_operand.vmem [shape: f32[2,8,8], index: 0, kind: input, shape index: {}]   ;;  %s41_s1 = inlined_call_operand.vmem [shape: f32[2,8,8], index: 1, kind: output, shape index: {}]  }
   0x1   :  { %v2_v0 = vld [vmem:[%s40_s0] sm:$0xff]  ;;  %v16_v1 = vld [vmem:[%s40_s0 + $0x8] sm:$0xff] }
   0x2   :  { %v5_v2 = vxor.u32 2147483648, %v2_v0  ;;  %v12_v3 = vxor.u32 2147483648, %v16_v1 }
   0x4   :  { %7 = vst [vmem:[%s41_s1] sm:$0xff] %v5_v2 }
   0x5   :  { %17 = vst [vmem:[%s41_s1 + $0x8] sm:$0xff] %v12_v3 }

// kernel: protein_features_forward.1
= control target key start
LH: loop header
LB: loop body
LE: loop exit
PB: predicated region body
PF: predicated region fallthrough
CT: control target
= control target key end

     0   :  { %v4067_v0 = vmov 89   ;;  %v4068_v1 = vmov 25   ;;  %v4069_v6 = vmov 121   ;;  %v4070_v21 = vmov 57   ;;  %s4073_s14 = smov 64   ;;  %s4074_s15 = smov 96   ;;  %s5386_s0 = inlined_call_operand.vmem [shape: f32[32,128], index: 0, kind: input, shape index: {}]   ;;  %s5387_s2 = inlined_call_operand.vmem [shape: bf16[512,128], index: 2, kind: input, shape index: {}]   ;;  %s5388_s1 = inlined_call_operand.vmem [shape: bf16[2048,128], index: 1, kind: input, shape index: {}]   ;;  %s5389_s3 = inlined_call_operand.vmem [shape: f32[1,128], index: 3, kind: input, shape index: {}]   ;;  %s5390_s4 = inlined_call_operand.vmem [shape: f32[1,128], index: 4, kind: input, shape index: {}]   ;;  %s5391_s5 = inlined_call_operand.vmem [shape: f32[32,128], index: 5, kind: output, shape index: {}]  }
   0x1   :  { %3885 = vset.pattern.permute.xlu0 %v4067_v0  ;;  %3886 = vset.pattern.permute.xlu1 %v4068_v1  ;;  %v4109_v2 = vld [vmem:[%s5386_s0] sm:$0xff]  ;;  %v4114_v3 = vld [vmem:[%s5386_s0 + $0x8] sm:$0xff]  ;;  %v4125_v13 = vld [vmem:[%s5386_s0 + $0x10] sm:$0xff]  ;;  %v664_v45 = vlaneseq  ;;  %v4071_v56 = vmov 0.0  }
   0x2   :  { %vm3856_vm0 = vcmp.lt.s32.totalorder %v4109_v2, 0  ;;  %v3857_v4 = vceil.f32 %v4109_v2  ;;  %v3858_v5 = vfloor.f32 %v4109_v2  ;;  %3887 = vset.pattern.permute.xlu2 %v4069_v6  ;;  %v3862_v8 = vceil.f32 %v4114_v3  ;;  %v4133_v16 = vld [vmem:[%s5386_s0 + $0x18] sm:$0xff]  ;;  %v3854_v23 = vld [vmem:[%s5387_s2 + $0xf0] sm:$0xff]  ;;  %v3853_v26 = vld [vmem:[%s5387_s2 + $0xe8] sm:$0xff] }
   0x3   :  { %v3863_v9 = vfloor.f32 %v4114_v3  ;;  %vm3861_vm1 = vcmp.lt.s32.totalorder %v4114_v3, 0  ;;  %v3867_v14 = vceil.f32 %v4125_v13  ;;  %v3868_v15 = vfloor.f32 %v4125_v13  ;;  %v3855_v18 = vld [vmem:[%s5387_s2 + $0xf8] sm:$0xff]  ;;  %v3852_v27 = vld [vmem:[%s5387_s2 + $0xe0] sm:$0xff]  ;;  %v3830_v31 = vld [vmem:[%s5387_s2 + $0x30] sm:$0xff] }
   0x4   :  { %v3859_v7 = vsel %vm3856_vm0, %v3857_v4, %v3858_v5  ;;  %vm3866_vm2 = vcmp.lt.s32.totalorder %v4125_v13, 0  ;;  %v3872_v19 = vceil.f32 %v4133_v16  ;;  %v3873_v20 = vfloor.f32 %v4133_v16  ;;  %1399 = vmatpush.bf16.msra.mxu3 %v3855_v18  ;;  %v3831_v28 = vld [vmem:[%s5387_s2 + $0x38] sm:$0xff]  ;;  %v3846_v32 = vld [vmem:[%s5387_s2 + $0xb0] sm:$0xff]  ;;  %v3829_v34 = vld [vmem:[%s5387_s2 + $0x28] sm:$0xff] }
   0x5   :  { %v3860_v10 = vcvt.f32.s32 %v3859_v7  ;;  %v3864_v11 = vsel %vm3861_vm1, %v3862_v8, %v3863_v9  ;;  %v3869_v17 = vsel %vm3866_vm2, %v3867_v14, %v3868_v15  ;;  %vm3871_vm3 = vcmp.lt.s32.totalorder %v4133_v16, 0  ;;  %v3847_v29 = vld [vmem:[%s5387_s2 + $0xb8] sm:$0xff]  ;;  %1342 = vmatpush.bf16.msra.mxu0 %v3831_v28  ;;  %v3850_v33 = vld [vmem:[%s5387_s2 + $0xd0] sm:$0xff]  ;;  %v3845_v35 = vld [vmem:[%s5387_s2 + $0xa8] sm:$0xff] }
   0x6   :  { %v3865_v12 = vcvt.f32.s32 %v3864_v11  ;;  %v3870_v22 = vcvt.f32.s32 %v3869_v17  ;;  %v3874_v24 = vsel %vm3871_vm3, %v3872_v19, %v3873_v20  ;;  %v3851_v30 = vld [vmem:[%s5387_s2 + $0xd8] sm:$0xff]  ;;  %1380 = vmatpush.bf16.msra.mxu2 %v3847_v29  ;;  %v3849_v36 = vld [vmem:[%s5387_s2 + $0xc8] sm:$0xff]  ;;  %v3828_v38 = vld [vmem:[%s5387_s2 + $0x20] sm:$0xff]  ;;  %v4210_v49 = vand.u32 127, %v664_v45 }
   0x7   :  { %671 = vperm.xlu1 %3886, %v3860_v10   ;;  %727 = vperm.xlu0 %3885, %v3860_v10   ;;  %v3875_v25 = vcvt.f32.s32 %v3874_v24  ;;  %v3839_v37 = vld [vmem:[%s5387_s2 + $0x78] sm:$0xff]  ;;  %v3844_v39 = vld [vmem:[%s5387_s2 + $0xa0] sm:$0xff]  ;;  %v3838_v41 = vld [vmem:[%s5387_s2 + $0x70] sm:$0xff]  ;;  %v2976_v14 = vadd.f32 -2.0, %v4109_v2  ;;  %v2977_v15 = vadd.f32 -2.0, %v4114_v3 }
   0x8   :  { %755 = vperm.xlu2 %3887, %v3860_v10   ;;  %1400 = vmatpush.bf16.msra.mxu3 %v3854_v23  ;;  %v3848_v40 = vld [vmem:[%s5387_s2 + $0xc0] sm:$0xff]  ;;  %v3827_v42 = vld [vmem:[%s5387_s2 + $0x18] sm:$0xff]  ;;  %v3837_v44 = vld [vmem:[%s5387_s2 + $0x68] sm:$0xff] }
   0x9   :  { %1343 = vmatpush.bf16.msra.mxu0 %v3830_v31  ;;  %1361 = vmatpush.bf16.msra.mxu1 %v3839_v37  ;;  %v3843_v43 = vld [vmem:[%s5387_s2 + $0x98] sm:$0xff]  ;;  %v3826_v46 = vld [vmem:[%s5387_s2 + $0x10] sm:$0xff]  ;;  %v3836_v48 = vld [vmem:[%s5387_s2 + $0x60] sm:$0xff]  ;;  %v28_v18 = vmul.f32 0.8, %v2976_v14 }
   0xa   :  { %1381 = vmatpush.bf16.msra.mxu2 %v3846_v32  ;;  %v3842_v47 = vld [vmem:[%s5387_s2 + $0x90] sm:$0xff]  ;;  %v3825_v50 = vld [vmem:[%s5387_s2 + $0x8] sm:$0xff]  ;;  %v3835_v53 = vld [vmem:[%s5387_s2 + $0x58] sm:$0xff]  ;;  %v29_v19 = vmul.f32 0.8, %v2977_v15  ;;  %v2978_v15 = vadd.f32 -2.0, %v4125_v13 }
   0xb   :  { %v3841_v51 = vld [vmem:[%s5387_s2 + $0x88] sm:$0xff]  ;;  %v3824_v54 = vld [vmem:[%s5387_s2] sm:$0xff]  ;;  %v3834_v58 = vld [vmem:[%s5387_s2 + $0x50] sm:$0xff]  ;;  %v32_v24 = vmul.f32 %v28_v18, %v28_v18  ;;  %v2984_v31 = vadd.f32 -4.6666665, %v4109_v2 }
   0xc   :  { %1401 = vmatpush.bf16.msra.mxu3 %v3853_v26  ;;  %v3840_v55 = vld [vmem:[%s5387_s2 + $0x80] sm:$0xff]  ;;  %v3833_v61 = vld [vmem:[%s5387_s2 + $0x48] sm:$0xff]  ;;  %v3703_v62 = vld [vmem:[%s5388_s1 + $0x38] sm:$0xff]  ;;  %v2985_v32 = vadd.f32 -4.6666665, %v4114_v3 }
   0xd   :  { %1344 = vmatpush.bf16.msra.mxu0 %v3829_v34  ;;  %1362 = vmatpush.bf16.msra.mxu1 %v3838_v41  ;;  %v3832_v4 = vld [vmem:[%s5387_s2 + $0x40] sm:$0xff]  ;;  %v3719_v7 = vld [vmem:[%s5388_s1 + $0xb8] sm:$0xff]  ;;  %v3701_v9 = vld [vmem:[%s5388_s1 + $0x28] sm:$0xff] }
   0xe   :  { %1382 = vmatpush.bf16.msra.mxu2 %v3845_v35  ;;  %v3727_v11 = vld [vmem:[%s5388_s1 + $0xf8] sm:$0xff]  ;;  %v3700_v17 = vld [vmem:[%s5388_s1 + $0x20] sm:$0xff]  ;;  %v3726_v20 = vld [vmem:[%s5388_s1 + $0xf0] sm:$0xff]  ;;  %v85_v41 = vmul.f32 0.8, %v2985_v32 }
   0xf   :  { %674 = vperm.xlu1 %3886, %v3865_v12   ;;  %730 = vperm.xlu0 %3885, %v3865_v12   ;;  %v3699_v26 = vld [vmem:[%s5388_s1 + $0x18] sm:$0xff]  ;;  %v3716_v35 = vld [vmem:[%s5388_s1 + $0xa0] sm:$0xff] }
  0x10   :  { %758 = vperm.xlu2 %3887, %v3865_v12   ;;  %1402 = vmatpush.bf16.msra.mxu3 %v3852_v27  ;;  %v36_v27 = vsub.f32 0.0, %v32_v24  ;;  %v3711_v34 = vld [vmem:[%s5388_s1 + $0x78] sm:$0xff]  ;;  %v3696_v18 = vld [vmem:[%s5388_s1] sm:$0xff]  ;;  %v3722_v24 = vld [vmem:[%s5388_s1 + $0xd0] sm:$0xff] }
  0x11   :  { %1345 = vmatpush.bf16.msra.mxu0 %v3828_v38  ;;  %1363 = vmatpush.bf16.msra.mxu1 %v3837_v44  ;;  %v3724_v44 = vld [vmem:[%s5388_s1 + $0xe0] sm:$0xff] }
  0x12   :  { %1383 = vmatpush.bf16.msra.mxu2 %v3844_v39  ;;  %v84_v39 = vmul.f32 0.8, %v2984_v31 }
  0x14   :  { %1403 = vmatpush.bf16.msra.mxu3 %v3851_v30  ;;  %v3725_v30 = vld [vmem:[%s5388_s1 + $0xe8] sm:$0xff]  ;;  %v88_v45 = vmul.f32 %v84_v39, %v84_v39 }
  0x15   :  { %1346 = vmatpush.bf16.msra.mxu0 %v3827_v42  ;;  %1364 = vmatpush.bf16.msra.mxu1 %v3836_v48  ;;  %v2988_v42 = vadd.f32 -6.0, %v4109_v2 }
  0x16   :  { %1384 = vmatpush.bf16.msra.mxu2 %v3843_v43 }
  0x17   :  { %3889 = vset.pattern.permute.xlu1 %v4070_v21  ;;  %3888 = vset.pattern.permute.xlu0 %v4070_v21 }
  0x18   :  { %702 = vperm.xlu1 %3889, %v3865_v12   ;;  %699 = vperm.xlu0 %3888, %v3860_v10   ;;  %v3718_v12 = vld [vmem:[%s5388_s1 + $0xb0] sm:$0xff] }
  0x19   :  { %3890 = vset.pattern.permute.xlu2 %v4067_v0  ;;  %1404 = vmatpush.bf16.msra.mxu3 %v3850_v33 }
  0x1a   :  { %733 = vperm.xlu2 %3890, %v3870_v22   ;;  %1347 = vmatpush.bf16.msra.mxu0 %v3826_v46 }
  0x1b   :  { %1385 = vmatpush.bf16.msra.mxu2 %v3842_v47  ;;  %1365 = vmatpush.bf16.msra.mxu1 %v3835_v53  ;;  %v89_v53 = vmul.f32 %v85_v41, %v85_v41  ;;  %v3721_v41 = vld [vmem:[%s5388_s1 + $0xc8] sm:$0xff] }
  0x1d   :  { %1405 = vmatpush.bf16.msra.mxu3 %v3849_v36  ;;  %v40_v36 = vmul.f32 1.442695, %v36_v27  ;;  %v3713_v27 = vld [vmem:[%s5388_s1 + $0x88] sm:$0xff] }
  0x1e   :  { %1348 = vmatpush.bf16.msra.mxu0 %v3825_v50  ;;  %v3710_v50 = vld [vmem:[%s5388_s1 + $0x70] sm:$0xff] }
  0x1f   :  { %1386 = vmatpush.bf16.msra.mxu2 %v3841_v51  ;;  %1366 = vmatpush.bf16.msra.mxu1 %v3834_v58  ;;  %3901 = vpow2.f32 %v40_v36  ;;  %v3715_v51 = vld [vmem:[%s5388_s1 + $0x98] sm:$0xff] }
  0x20   :  { %3891 = vset.pattern.permute.xlu1 %v4067_v0  ;;  %3893 = vset.pattern.permute.xlu0 %v4068_v1 }
  0x21   :  { %736 = vperm.xlu1 %3891, %v3875_v25   ;;  %680 = vperm.xlu0 %3893, %v3875_v25  }
  0x22   :  { %3892 = vset.pattern.permute.xlu2 %v4068_v1  ;;  %1406 = vmatpush.bf16.msra.mxu3 %v3848_v40  ;;  %v3698_v40 = vld [vmem:[%s5388_s1 + $0x10] sm:$0xff] }
  0x23   :  { %677 = vperm.xlu2 %3892, %v3870_v22   ;;  %1349 = vmatpush.bf16.msra.mxu0 %v3824_v54  ;;  %v2989_v54 = vadd.f32 -6.0, %v4114_v3 }
  0x24   :  { %1387 = vmatpush.bf16.msra.mxu2 %v3840_v55  ;;  %1367 = vmatpush.bf16.msra.mxu1 %v3833_v61  ;;  %v92_v55 = vsub.f32 0.0, %v88_v45 }
  0x26   :  { %2243 = vmatpush.bf16.msrb.mxu3 %v3727_v11 }
  0x27   :  { %2186 = vmatpush.bf16.msrb.mxu0 %v3703_v62 }
  0x28   :  { %1368 = vmatpush.bf16.msra.mxu1 %v3832_v4  ;;  %2224 = vmatpush.bf16.msrb.mxu2 %v3719_v7  ;;  %v96_v7 = vmul.f32 1.442695, %v92_v55 }
  0x29   :  { %3894 = vset.pattern.permute.xlu1 %v4069_v6  ;;  %3898 = vset.pattern.permute.xlu0 %v4069_v6 }
  0x2a   :  { %761 = vperm.xlu1 %3894, %v3870_v22   ;;  %2244 = vmatpush.bf16.msrb.mxu3 %v3726_v20  ;;  %v2979_v20 = vadd.f32 -2.0, %v4133_v16 }
  0x2b   :  { %3895 = vset.pattern.permute.xlu2 %v4069_v6  ;;  %v3702_v6 = vld [vmem:[%s5388_s1 + $0x30] sm:$0xff] }
  0x2c   :  { %764 = vperm.xlu2 %3895, %v3875_v25   ;;  %2187 = vmatpush.bf16.msrb.mxu0 %v3702_v6  ;;  %v3714_v6 = vld [vmem:[%s5388_s1 + $0x90] sm:$0xff] }
  0x2d   :  { %2225 = vmatpush.bf16.msrb.mxu2 %v3718_v12  ;;  %2205 = vmatpush.bf16.msrb.mxu1 %v3711_v34  ;;  %v30_v34 = vmul.f32 0.8, %v2978_v15 }
  0x2e   :  { %2245 = vmatpush.bf16.msrb.mxu3 %v3725_v30 }
  0x30   :  { %2188 = vmatpush.bf16.msrb.mxu0 %v3701_v9  ;;  %v3902_v9 = vpop.eup %3901 }
  0x31   :  { %2206 = vmatpush.bf16.msrb.mxu1 %v3710_v50 }
  0x32   :  { %3896 = vset.pattern.permute.xlu1 %v4070_v21  ;;  %2246 = vmatpush.bf16.msrb.mxu3 %v3724_v44 }
  0x33   :  { %705 = vperm.xlu1 %3896, %v3870_v22  }
  0x34   :  { %3897 = vset.pattern.permute.xlu2 %v4070_v21  ;;  %v3717_v21 = vld [vmem:[%s5388_s1 + $0xa8] sm:$0xff]  ;;  %2189 = vmatpush.bf16.msrb.mxu0 %v3700_v17 }
  0x35   :  { %708 = vperm.xlu2 %3897, %v3875_v25   ;;  %v33_v25 = vmul.f32 %v29_v19, %v29_v19  ;;  %2226 = vmatpush.bf16.msrb.mxu2 %v3717_v21 }
  0x37   :  { %v37_v28 = vsub.f32 0.0, %v33_v25 }
  0x38   :  { %2190 = vmatpush.bf16.msrb.mxu0 %v3699_v26  ;;  %v3708_v26 = vld [vmem:[%s5388_s1 + $0x60] sm:$0xff] }
  0x39   :  { %v42_v37 = vmul.f32 1.442695, %v37_v28  ;;  %2227 = vmatpush.bf16.msrb.mxu2 %v3716_v35  ;;  %v48_v28 = vpack.c.bf16 %v3902_v9, %v3902_v9  ;;  %v3735_v35 = vld [vmem:[%s5388_s1 + $0x138] sm:$0xff] }
  0x3b   :  { %3903 = vpow2.f32 %v42_v37  ;;  %v31_v37 = vmul.f32 0.8, %v2979_v20  ;;  %v4372_v50 = vunpack.c.l.b16 %v48_v28  ;;  %v3705_v28 = vld [vmem:[%s5388_s1 + $0x48] sm:$0xff] }
  0x3c   :  { %2191 = vmatpush.bf16.msrb.mxu0 %v3698_v40  ;;  %3905 = vpow2.f32 %v96_v7 }
  0x3d   :  { %2228 = vmatpush.bf16.msrb.mxu2 %v3715_v51 }
  0x41   :  { %v3904_v17 = vpop.eup %3903  ;;  %2229 = vmatpush.bf16.msrb.mxu2 %v3714_v6 }
  0x42   :  { %v3906_v55 = vpop.eup %3905 }
  0x45   :  { %2230 = vmatpush.bf16.msrb.mxu2 %v3713_v27 }
  0x62   :  { %v756_v52 = vpop.permute.xlu2 %755 }
  0x63   :  { %vm766_vm4 = vcmp.eq.s32.totalorder %v4210_v49, %v756_v52  ;;  %v3697_v52 = vld [vmem:[%s5388_s1 + $0x8] sm:$0xff] }
  0x64   :  { %v3052_v57 = vsel %vm766_vm4, 1.0, %v4071_v56  ;;  %2192 = vmatpush.bf16.msrb.mxu0 %v3697_v52  ;;  %v3734_v52 = vld [vmem:[%s5388_s1 + $0x130] sm:$0xff]  ;;  %vm2490_vm4 = vcmask 261120  }
  0x65   :  { %v778_v59 = vpack.c.bf16 %v3052_v57, %v3052_v57 }
  0x67   :  { %v822_v0 = vunpack.c.l.b16 %v778_v59  ;;  %v93_v59 = vsub.f32 0.0, %v89_v53  ;;  %v34_v53 = vmul.f32 %v30_v34, %v30_v34 }
  0x68   :  { %2193 = vmatpush.bf16.msrb.mxu0 %v3696_v18  ;;  %v104_v18 = vpack.c.bf16 %v3906_v55, %v3906_v55 }
  0x69   :  { %v98_v14 = vmul.f32 1.442695, %v93_v59 }
  0x6a   :  { %v759_v60 = vpop.permute.xlu2 %758 }
  0x6b   :  { %vm767_vm5 = vcmp.eq.s32.totalorder %v4210_v49, %v759_v60  ;;  %v112_v60 = vmul.f32 0.8, %v2988_v42  ;;  %3907 = vpow2.f32 %v98_v14  ;;  %v2980_v42 = vadd.f32 -3.3333333, %v4109_v2 }
  0x6c   :  { %v3053_v63 = vsel %vm767_vm5, 1.0, %v4071_v56 }
  0x6d   :  { %v779_v1 = vpack.c.bf16 %v3053_v63, %v3053_v63  ;;  %v116_v19 = vmul.f32 %v112_v60, %v112_v60  ;;  %v3720_v60 = vld [vmem:[%s5388_s1 + $0xc0] sm:$0xff]  ;;  %v56_v6 = vmul.f32 0.8, %v2980_v42 }
  0x6f   :  { %v823_v5 = vunpack.c.l.b16 %v779_v1  ;;  %v3723_v1 = vld [vmem:[%s5388_s1 + $0xd8] sm:$0xff]  ;;  %v120_v36 = vsub.f32 0.0, %v116_v19  ;;  %v60_v14 = vmul.f32 %v56_v6, %v56_v6  ;;  %v3733_v19 = vld [vmem:[%s5388_s1 + $0x128] sm:$0xff] }
  0x70   :  { %2247 = vmatpush.bf16.msrb.mxu3 %v3723_v1 }
  0x71   :  { %v826_v8 = vpack.c.b16 %v823_v5, %v822_v0  ;;  %v3709_v5 = vld [vmem:[%s5388_s1 + $0x68] sm:$0xff] }
  0x72   :  { %2207 = vmatpush.bf16.msrb.mxu1 %v3709_v5  ;;  %v35_v5 = vmul.f32 %v31_v37, %v31_v37  ;;  %v3749_v37 = vld [vmem:[%s5388_s1 + $0x1a8] sm:$0xff] }
  0x73   :  { %1407 = vmatmul.bf16.vlgmr.msra.gmra.mxu3 %v826_v8  ;;  %v113_v8 = vmul.f32 0.8, %v2989_v54  ;;  %v2981_v54 = vadd.f32 -3.3333333, %v4114_v3 }
  0x74   :  { %v4252_v10 = vpop.permute.xlu2 %733  ;;  %2248 = vmatpush.bf16.msrb.mxu3 %v3722_v24  ;;  %v39_v24 = vsub.f32 0.0, %v35_v5 }
  0x75   :  { %vm740_vm8 = vcmp.eq.s32.totalorder %v4210_v49, %v4252_v10 }
  0x76   :  { %v4318_v0 = vsel %vm740_vm8, 1.0, %v4071_v56  ;;  %2208 = vmatpush.bf16.msrb.mxu1 %v3708_v26 }
  0x77   :  { %v752_v21 = vpack.c.bf16 %v4318_v0, %v4318_v0 }
  0x78   :  { %2249 = vmatpush.bf16.msrb.mxu3 %v3721_v41 }
  0x79   :  { %v672_v22 = vpop.permute.xlu1 %671  ;;  %v728_v23 = vpop.permute.xlu0 %727  ;;  %v4388_v0 = vunpack.c.l.b16 %v752_v21  ;;  %v2986_v21 = vadd.f32 -4.6666665, %v4125_v13 }
  0x7a   :  { %vm738_vm6 = vcmp.eq.s32.totalorder %v4210_v49, %v728_v23  ;;  %vm682_vm7 = vcmp.eq.s32.totalorder %v4210_v49, %v672_v22 }
  0x7b   :  { %v3048_v29 = vsel %vm738_vm6, 1.0, %v4071_v56  ;;  %v3040_v38 = vsel %vm682_vm7, 1.0, %v4071_v56 }
  0x7c   :  { %v750_v43 = vpack.c.bf16 %v3048_v29, %v3048_v29  ;;  %v694_v46 = vpack.c.bf16 %v3040_v38, %v3040_v38  ;;  %v117_v29 = vmul.f32 %v113_v8, %v113_v8  ;;  %2250 = vmatpush.bf16.msrb.mxu3 %v3720_v60  ;;  %v3731_v60 = vld [vmem:[%s5388_s1 + $0x118] sm:$0xff] }
  0x7d   :  { %v4282_v33 = vpop.permute.xlu2 %677 }
  0x7e   :  { %v810_v61 = vunpack.c.l.b16 %v750_v43  ;;  %v786_v4 = vunpack.c.l.b16 %v694_v46  ;;  %vm684_vm11 = vcmp.eq.s32.totalorder %v4210_v49, %v4282_v33  ;;  %v49_v33 = vpack.c.bf16 %v3904_v17, %v3904_v17  ;;  %v3707_v46 = vld [vmem:[%s5388_s1 + $0x58] sm:$0xff] }
  0x7f   :  { %v3042_v25 = vsel %vm684_vm11, 1.0, %v4071_v56  ;;  %2209 = vmatpush.bf16.msrb.mxu1 %v3707_v46  ;;  %v3704_v46 = vld [vmem:[%s5388_s1 + $0x40] sm:$0xff] }
  0x80   :  { %v696_v40 = vpack.c.bf16 %v3042_v25, %v3042_v25  ;;  %v4374_v51 = vunpack.c.l.b16 %v49_v33  ;;  %v3758_v33 = vld [vmem:[%s5388_s1 + $0x1f0] sm:$0xff] }
  0x81   :  { %v675_v47 = vpop.permute.xlu1 %674  ;;  %v731_v48 = vpop.permute.xlu0 %730 }
  0x82   :  { %vm683_vm9 = vcmp.eq.s32.totalorder %v4210_v49, %v675_v47  ;;  %vm739_vm10 = vcmp.eq.s32.totalorder %v4210_v49, %v731_v48  ;;  %v3712_v47 = vld [vmem:[%s5388_s1 + $0x80] sm:$0xff]  ;;  %v121_v48 = vsub.f32 0.0, %v117_v29  ;;  %v4390_v1 = vunpack.c.l.b16 %v696_v40  ;;  %v3750_v29 = vld [vmem:[%s5388_s1 + $0x1b0] sm:$0xff] }
  0x83   :  { %v3041_v57 = vsel %vm683_vm9, 1.0, %v4071_v56  ;;  %v3049_v58 = vsel %vm739_vm10, 1.0, %v4071_v56  ;;  %2231 = vmatpush.bf16.msrb.mxu2 %v3712_v47  ;;  %v86_v40 = vmul.f32 0.8, %v2986_v21 }
  0x84   :  { %v695_v62 = vpack.c.bf16 %v3041_v57, %v3041_v57  ;;  %v751_v63 = vpack.c.bf16 %v3049_v58, %v3049_v58  ;;  %v126_v9 = vmul.f32 1.442695, %v121_v48 }
  0x86   :  { %v787_v10 = vunpack.c.l.b16 %v695_v62  ;;  %v811_v11 = vunpack.c.l.b16 %v751_v63  ;;  %v765_v12 = vpop.permute.xlu2 %764  ;;  %v124_v62 = vmul.f32 1.442695, %v120_v36  ;;  %v4386_v63 = vpop.eup %3907  ;;  %v4430_v36 = vunpack.c.l.b16 %v104_v18 }
  0x87   :  { %vm769_vm12 = vcmp.eq.s32.totalorder %v4210_v49, %v765_v12  ;;  %v38_v12 = vsub.f32 0.0, %v34_v53  ;;  %v2991_v53 = vadd.f32 -6.0, %v4133_v16 }
  0x88   :  { %v790_v22 = vpack.c.b16 %v787_v10, %v786_v4  ;;  %v814_v23 = vpack.c.b16 %v811_v11, %v810_v61  ;;  %v3055_v32 = vsel %vm769_vm12, 1.0, %v4071_v56  ;;  %v3751_v61 = vld [vmem:[%s5388_s1 + $0x1b8] sm:$0xff]  ;;  %v3706_v4 = vld [vmem:[%s5388_s1 + $0x50] sm:$0xff]  ;;  %v57_v10 = vmul.f32 0.8, %v2981_v54 }
  0x89   :  { %v781_v45 = vpack.c.bf16 %v3055_v32, %v3055_v32  ;;  %v480_v11 = vpack.c.b16 %v4374_v51, %v4372_v50  ;;  %3909 = vpow2.f32 %v124_v62  ;;  %2210 = vmatpush.bf16.msrb.mxu1 %v3706_v4  ;;  %v44_v34 = vmul.f32 1.442695, %v38_v12  ;;  %v3739_v51 = vld [vmem:[%s5388_s1 + $0x158] sm:$0xff] }
  0x8a   :  { %1350 = vmatmul.bf16.vlgmr.msra.gmra.mxu0 %v790_v22  ;;  %v703_v30 = vpop.permute.xlu1 %702  ;;  %1388 = vmatmul.bf16.vlgmr.msra.gmra.mxu2 %v814_v23  ;;  %v700_v31 = vpop.permute.xlu0 %699  ;;  %v61_v20 = vmul.f32 %v57_v10, %v57_v10  ;;  %v105_v22 = vpack.c.bf16 %v4386_v63, %v4386_v63  ;;  %v3759_v23 = vld [vmem:[%s5388_s1 + $0x1f8] sm:$0xff]  ;;  %3911 = vpow2.f32 %v126_v9  ;;  %v115_v6 = vmul.f32 0.8, %v2991_v53  ;;  %v3748_v9 = vld [vmem:[%s5388_s1 + $0x1a0] sm:$0xff] }
  0x8b   :  { %vm711_vm13 = vcmp.eq.s32.totalorder %v4210_v49, %v703_v30  ;;  %vm710_vm14 = vcmp.eq.s32.totalorder %v4210_v49, %v700_v31  ;;  %2262 = vmatpush.bf16.msra.mxu0 %v3735_v35  ;;  %v4395_v8 = vunpack.c.l.b16 %v781_v45  ;;  %2300 = vmatpush.bf16.msra.mxu2 %v3751_v61  ;;  %v3732_v30 = vld [vmem:[%s5388_s1 + $0x120] sm:$0xff]  ;;  %v64_v35 = vsub.f32 0.0, %v60_v14 }
  0x8c   :  { %v3045_v38 = vsel %vm711_vm13, 1.0, %v4071_v56  ;;  %v3044_v39 = vsel %vm710_vm14, 1.0, %v4071_v56  ;;  %2319 = vmatpush.bf16.msra.mxu3 %v3759_v23  ;;  %3913 = vpow2.f32 %v44_v34 }
  0x8d   :  { %v723_v43 = vpack.c.bf16 %v3045_v38, %v3045_v38  ;;  %v722_v44 = vpack.c.bf16 %v3044_v39, %v3044_v39  ;;  %v65_v38 = vsub.f32 0.0, %v61_v20  ;;  %v2987_v39 = vadd.f32 -4.6666665, %v4133_v16  ;;  %2211 = vmatpush.bf16.msrb.mxu1 %v3705_v28 }
  0x8e   :  { %v68_v47 = vmul.f32 1.442695, %v64_v35  ;;  %v2992_v20 = vadd.f32 -7.3333335, %v4109_v2  ;;  %v2993_v28 = vadd.f32 -7.3333335, %v4114_v3 }
  0x8f   :  { %v799_v57 = vunpack.c.l.b16 %v723_v43  ;;  %v798_v58 = vunpack.c.l.b16 %v722_v44  ;;  %v709_v59 = vpop.permute.xlu2 %708  ;;  %2263 = vmatpush.bf16.msra.mxu0 %v3734_v52  ;;  %2301 = vmatpush.bf16.msra.mxu2 %v3750_v29  ;;  %v46_v43 = vmul.f32 1.442695, %v39_v24  ;;  %v2990_v44 = vadd.f32 -6.0, %v4125_v13  ;;  %v3910_v45 = vpop.eup %3909  ;;  %v3742_v24 = vld [vmem:[%s5388_s1 + $0x170] sm:$0xff] }
  0x90   :  { %vm713_vm15 = vcmp.eq.s32.totalorder %v4210_v49, %v709_v59  ;;  %v87_v48 = vmul.f32 0.8, %v2987_v39  ;;  %v90_v52 = vmul.f32 %v86_v40, %v86_v40  ;;  %2320 = vmatpush.bf16.msra.mxu3 %v3758_v33  ;;  %v3912_v59 = vpop.eup %3911  ;;  %v70_v61 = vmul.f32 1.442695, %v65_v38 }
  0x91   :  { %v802_v7 = vpack.c.b16 %v799_v57, %v798_v58  ;;  %v4416_v27 = vsel %vm713_vm15, 1.0, %v4071_v56  ;;  %v4445_v58 = vunpack.c.l.b16 %v105_v22  ;;  %3915 = vpow2.f32 %v46_v43  ;;  %2212 = vmatpush.bf16.msrb.mxu1 %v3704_v46 }
  0x92   :  { %v725_v57 = vpack.c.bf16 %v4416_v27, %v4416_v27  ;;  %v91_v62 = vmul.f32 %v87_v48, %v87_v48  ;;  %v94_v63 = vsub.f32 0.0, %v90_v52  ;;  %v114_v5 = vmul.f32 0.8, %v2990_v44 }
  0x93   :  { %v737_v15 = vpop.permute.xlu1 %736  ;;  %1369 = vmatmul.bf16.vlgmr.msra.gmra.mxu1 %v802_v7  ;;  %v681_v17 = vpop.permute.xlu0 %680  ;;  %2264 = vmatpush.bf16.msra.mxu0 %v3733_v19  ;;  %3917 = vpow2.f32 %v68_v47  ;;  %v3743_v7 = vld [vmem:[%s5388_s1 + $0x178] sm:$0xff]  ;;  %v119_v19 = vmul.f32 %v115_v6, %v115_v6  ;;  %v133_v22 = vpack.c.bf16 %v3912_v59, %v3912_v59  ;;  %v140_v29 = vmul.f32 0.8, %v2992_v20  ;;  %v3746_v59 = vld [vmem:[%s5388_s1 + $0x190] sm:$0xff] }
  0x94   :  { %vm741_vm0 = vcmp.eq.s32.totalorder %v4210_v49, %v737_v15  ;;  %vm685_vm1 = vcmp.eq.s32.totalorder %v4210_v49, %v681_v17  ;;  %2302 = vmatpush.bf16.msra.mxu2 %v3749_v37  ;;  %v95_v10 = vsub.f32 0.0, %v91_v62  ;;  %v100_v12 = vmul.f32 1.442695, %v94_v63  ;;  %v3730_v15 = vld [vmem:[%s5388_s1 + $0x110] sm:$0xff]  ;;  %v3756_v17 = vld [vmem:[%s5388_s1 + $0x1e0] sm:$0xff]  ;;  %v3755_v47 = vld [vmem:[%s5388_s1 + $0x1d8] sm:$0xff] }
  0x95   :  { %v3051_v25 = vsel %vm741_vm0, 1.0, %v4071_v56  ;;  %v3043_v26 = vsel %vm685_vm1, 1.0, %v4071_v56  ;;  %v118_v18 = vmul.f32 %v114_v5, %v114_v5  ;;  %3919 = vpow2.f32 %v70_v61  ;;  %2281 = vmatpush.bf16.msra.mxu1 %v3743_v7  ;;  %v3740_v7 = vld [vmem:[%s5388_s1 + $0x160] sm:$0xff] }
  0x96   :  { %v753_v31 = vpack.c.bf16 %v3051_v25, %v3051_v25  ;;  %v697_v32 = vpack.c.bf16 %v3043_v26, %v3043_v26  ;;  %v102_v23 = vmul.f32 1.442695, %v95_v10  ;;  %v3747_v25 = vld [vmem:[%s5388_s1 + $0x198] sm:$0xff]  ;;  %v123_v27 = vsub.f32 0.0, %v119_v19 }
  0x97   :  { %2265 = vmatpush.bf16.msra.mxu0 %v3732_v30  ;;  %v122_v26 = vsub.f32 0.0, %v118_v18  ;;  %v4475_v30 = vpop.eup %3913  ;;  %3921 = vpow2.f32 %v100_v12  ;;  %v2982_v33 = vadd.f32 -3.3333333, %v4125_v13  ;;  %v4480_v35 = vunpack.c.l.b16 %v725_v57  ;;  %v3741_v57 = vld [vmem:[%s5388_s1 + $0x168] sm:$0xff] }
  0x98   :  { %v813_v41 = vunpack.c.l.b16 %v753_v31  ;;  %v789_v42 = vunpack.c.l.b16 %v697_v32  ;;  %2303 = vmatpush.bf16.msra.mxu2 %v3748_v9  ;;  %v504_v32 = vpack.c.b16 %v4445_v58, %v4430_v36  ;;  %v3916_v34 = vpop.eup %3915  ;;  %3923 = vpow2.f32 %v102_v23 }
  0x99   :  { %v141_v38 = vmul.f32 0.8, %v2993_v28  ;;  %v3918_v39 = vpop.eup %3917  ;;  %2282 = vmatpush.bf16.msra.mxu1 %v3742_v24  ;;  %v144_v43 = vmul.f32 %v140_v29, %v140_v29  ;;  %v2983_v44 = vadd.f32 -3.3333333, %v4133_v16  ;;  %v130_v46 = vmul.f32 1.442695, %v123_v27 }
  0x9a   :  { %v791_v54 = vpack.c.b16 %v789_v42, %v4390_v1  ;;  %v815_v55 = vpack.c.b16 %v813_v41, %v4388_v0  ;;  %v132_v0 = vpack.c.bf16 %v3910_v45, %v3910_v45  ;;  %v3757_v1 = vld [vmem:[%s5388_s1 + $0x1e8] sm:$0xff]  ;;  %v128_v41 = vmul.f32 1.442695, %v122_v26  ;;  %v3767_v28 = vld [vmem:[%s5388_s1 + $0x238] sm:$0xff] }
  0x9b   :  { %2266 = vmatpush.bf16.msra.mxu0 %v3731_v60  ;;  %2321 = vmatpush.bf16.msra.mxu3 %v3757_v1  ;;  %v3729_v42 = vld [vmem:[%s5388_s1 + $0x108] sm:$0xff]  ;;  %v4489_v45 = vunpack.c.l.b16 %v133_v22  ;;  %v145_v48 = vmul.f32 %v141_v38, %v141_v38  ;;  %v58_v52 = vmul.f32 0.8, %v2982_v33  ;;  %v3728_v60 = vld [vmem:[%s5388_s1 + $0x100] sm:$0xff]  ;;  %v148_v61 = vsub.f32 0.0, %v144_v43 }
  0x9c   :  { %v762_v4 = vpop.permute.xlu1 %761  ;;  %1355 = vmatmul.bf16.gmra.mxu0 %v791_v54  ;;  %1393 = vmatmul.bf16.gmra.mxu2 %v815_v55  ;;  %v4482_v37 = vunpack.c.l.b16 %v132_v0  ;;  %v50_v54 = vpack.c.bf16 %v4475_v30, %v4475_v30  ;;  %v51_v55 = vpack.c.bf16 %v3916_v34, %v3916_v34  ;;  %v59_v62 = vmul.f32 0.8, %v2983_v44  ;;  %v3753_v34 = vld [vmem:[%s5388_s1 + $0x1c8] sm:$0xff]  ;;  %v3752_v43 = vld [vmem:[%s5388_s1 + $0x1c0] sm:$0xff] }
  0x9d   :  { %vm768_vm2 = vcmp.eq.s32.totalorder %v4210_v49, %v762_v4  ;;  %2304 = vmatpush.bf16.msra.mxu2 %v3747_v25  ;;  %v76_v63 = vpack.c.bf16 %v3918_v39, %v3918_v39  ;;  %v3754_v4 = vld [vmem:[%s5388_s1 + $0x1d0] sm:$0xff]  ;;  %v149_v0 = vsub.f32 0.0, %v145_v48  ;;  %v3000_v1 = vadd.f32 -10.0, %v4109_v2  ;;  %2283 = vmatpush.bf16.msra.mxu1 %v3741_v57 }
  0x9e   :  { %v3054_v14 = vsel %vm768_vm2, 1.0, %v4071_v56  ;;  %3925 = vpow2.f32 %v128_v41  ;;  %v62_v9 = vmul.f32 %v58_v52, %v58_v52  ;;  %v63_v10 = vmul.f32 %v59_v62, %v59_v62  ;;  %v3738_v41 = vld [vmem:[%s5388_s1 + $0x150] sm:$0xff] }
  0x9f   :  { %v780_v21 = vpack.c.bf16 %v3054_v14, %v3054_v14  ;;  %2267 = vmatpush.bf16.msra.mxu0 %v3730_v15  ;;  %2322 = vmatpush.bf16.msra.mxu3 %v3756_v17  ;;  %v516_v15 = vpack.c.b16 %v4489_v45, %v4482_v37  ;;  %3927 = vpow2.f32 %v130_v46  ;;  %v3001_v20 = vadd.f32 -10.0, %v4114_v3  ;;  %v3783_v46 = vld [vmem:[%s5388_s1 + $0x2b8] sm:$0xff]  ;;  %v4604_v37 = vld [vmem:[%s5386_s0 + $0x10] sm:$0xff] }
  0xa0   :  { %v66_v18 = vsub.f32 0.0, %v62_v9  ;;  %v67_v19 = vsub.f32 0.0, %v63_v10  ;;  %v154_v23 = vmul.f32 1.442695, %v149_v0  ;;  %v196_v24 = vmul.f32 0.8, %v3000_v1 }
  0xa1   :  { %v824_v31 = vunpack.c.l.b16 %v780_v21  ;;  %2305 = vmatpush.bf16.msra.mxu2 %v3746_v59  ;;  %v4520_v25 = vunpack.c.l.b16 %v50_v54  ;;  %v4522_v26 = vunpack.c.l.b16 %v51_v55  ;;  %v4524_v27 = vunpack.c.l.b16 %v76_v63  ;;  %2284 = vmatpush.bf16.msra.mxu1 %v3740_v7  ;;  %v3765_v0 = vld [vmem:[%s5388_s1 + $0x228] sm:$0xff]  ;;  %v3791_v7 = vld [vmem:[%s5388_s1 + $0x2f8] sm:$0xff] }
  0xa2   :  { %v72_v29 = vmul.f32 1.442695, %v66_v18  ;;  %v197_v38 = vmul.f32 0.8, %v3001_v20  ;;  %v74_v50 = vmul.f32 1.442695, %v67_v19  ;;  %v200_v36 = vmul.f32 %v196_v24, %v196_v24 }
  0xa3   :  { %v827_v40 = vpack.c.b16 %v4395_v8, %v824_v31  ;;  %v3920_v8 = vpop.eup %3919  ;;  %2268 = vmatpush.bf16.msra.mxu0 %v3729_v42  ;;  %2323 = vmatpush.bf16.msra.mxu3 %v3755_v47  ;;  %v3004_v58 = vadd.f32 -11.333333, %v4109_v2  ;;  %v3005_v2 = vadd.f32 -11.333333, %v4114_v3  ;;  %v2994_v48 = vadd.f32 -7.3333335, %v4125_v13 }
  0xa4   :  { %v3922_v5 = vpop.eup %3921  ;;  %v77_v17 = vpack.c.bf16 %v3920_v8, %v3920_v8  ;;  %v201_v42 = vmul.f32 %v197_v38, %v197_v38  ;;  %v204_v44 = vsub.f32 0.0, %v200_v36  ;;  %v2995_v57 = vadd.f32 -7.3333335, %v4133_v16  ;;  %v4643_v36 = vld [vmem:[%s5386_s0 + $0x18] sm:$0xff] }
  0xa5   :  { %1412 = vmatmul.bf16.gmra.mxu3 %v827_v40  ;;  %v706_v53 = vpop.permute.xlu1 %705  ;;  %v3924_v12 = vpop.eup %3923  ;;  %v106_v22 = vpack.c.bf16 %v3922_v5, %v3922_v5  ;;  %v3766_v40 = vld [vmem:[%s5388_s1 + $0x230] sm:$0xff]  ;;  %2285 = vmatpush.bf16.msra.mxu1 %v3739_v51  ;;  %v224_v47 = vmul.f32 0.8, %v3004_v58  ;;  %v225_v54 = vmul.f32 0.8, %v3005_v2  ;;  %v481_v63 = vpack.c.b16 %v4522_v26, %v4520_v25  ;;  %v4637_v51 = vld [vmem:[%s5386_s0 + $0x8] sm:$0xff] }
  0xa6   :  { %vm712_vm3 = vcmp.eq.s32.totalorder %v4210_v49, %v706_v53  ;;  %v3745_v49 = vld [vmem:[%s5388_s1 + $0x188] sm:$0xff]  ;;  %v4536_v31 = vunpack.c.l.b16 %v77_v17  ;;  %v107_v33 = vpack.c.bf16 %v3924_v12, %v3924_v12  ;;  %v4541_v39 = vpop.eup %3925  ;;  %v205_v53 = vsub.f32 0.0, %v201_v42  ;;  %v3782_v17 = vld [vmem:[%s5388_s1 + $0x2b0] sm:$0xff]  ;;  %v3780_v25 = vld [vmem:[%s5388_s1 + $0x2a0] sm:$0xff] }
  0xa7   :  { %v3046_v6 = vsel %vm712_vm3, 1.0, %v4071_v56  ;;  %2269 = vmatpush.bf16.msra.mxu0 %v3728_v60  ;;  %v152_v56 = vmul.f32 1.442695, %v148_v61  ;;  %2324 = vmatpush.bf16.msra.mxu3 %v3754_v4  ;;  %v134_v8 = vpack.c.bf16 %v4541_v39, %v4541_v39  ;;  %v208_v3 = vmul.f32 1.442695, %v204_v44 }
  0xa8   :  { %v724_v14 = vpack.c.bf16 %v3046_v6, %v3046_v6  ;;  %2306 = vmatpush.bf16.msra.mxu2 %v3745_v49  ;;  %v4566_v52 = vunpack.c.l.b16 %v107_v33  ;;  %v228_v55 = vmul.f32 %v224_v47, %v224_v47  ;;  %v210_v60 = vmul.f32 1.442695, %v205_v53  ;;  %v3763_v47 = vld [vmem:[%s5388_s1 + $0x218] sm:$0xff]  ;;  %v3789_v53 = vld [vmem:[%s5388_s1 + $0x2e8] sm:$0xff] }
  0xa9   :  { %3929 = vpow2.f32 %v152_v56  ;;  %v229_v61 = vmul.f32 %v225_v54, %v225_v54  ;;  %v142_v62 = vmul.f32 0.8, %v2994_v48  ;;  %2286 = vmatpush.bf16.msra.mxu1 %v3738_v41  ;;  %v143_v1 = vmul.f32 0.8, %v2995_v57  ;;  %v3764_v56 = vld [vmem:[%s5388_s1 + $0x220] sm:$0xff] }
  0xaa   :  { %v800_v21 = vunpack.c.l.b16 %v724_v14  ;;  %3931 = vpow2.f32 %v154_v23  ;;  %v232_v4 = vsub.f32 0.0, %v228_v55  ;;  %v492_v16 = vpack.c.b16 %v4536_v31, %v4524_v27  ;;  %v3737_v14 = vld [vmem:[%s5388_s1 + $0x148] sm:$0xff] }
  0xab   :  { %2325 = vmatpush.bf16.msra.mxu3 %v3753_v34  ;;  %3933 = vpow2.f32 %v72_v29  ;;  %v233_v6 = vsub.f32 0.0, %v229_v61  ;;  %v146_v49 = vmul.f32 %v142_v62, %v142_v62  ;;  %v147_v18 = vmul.f32 %v143_v1, %v143_v1  ;;  %v3736_v29 = vld [vmem:[%s5388_s1 + $0x140] sm:$0xff] }
  0xac   :  { %2194 = vmatmul.bf16.vlgmr.msrb.gmra.mxu0 %v480_v11  ;;  %v803_v30 = vpack.c.b16 %v4480_v35, %v800_v21  ;;  %2232 = vmatmul.bf16.vlgmr.msrb.gmra.mxu2 %v504_v32  ;;  %v3744_v11 = vld [vmem:[%s5388_s1 + $0x180] sm:$0xff]  ;;  %v3928_v32 = vpop.eup %3927  ;;  %v4550_v35 = vunpack.c.l.b16 %v106_v22  ;;  %3935 = vpow2.f32 %v74_v50  ;;  %v236_v12 = vmul.f32 1.442695, %v232_v4  ;;  %v3790_v21 = vld [vmem:[%s5388_s1 + $0x2f0] sm:$0xff] }
  0xad   :  { %2338 = vmatpush.bf16.msrb.mxu0 %v3767_v28  ;;  %2307 = vmatpush.bf16.msra.mxu2 %v3744_v11  ;;  %v135_v59 = vpack.c.bf16 %v3928_v32, %v3928_v32  ;;  %3937 = vpow2.f32 %v208_v3  ;;  %v3002_v45 = vadd.f32 -10.0, %v4604_v37  ;;  %v238_v20 = vmul.f32 1.442695, %v233_v6  ;;  %v4629_v34 = vld [vmem:[%s5386_s0] sm:$0xff]  ;;  %v3774_v6 = vld [vmem:[%s5388_s1 + $0x270] sm:$0xff] }
  0xae   :  { %1374 = vmatmul.bf16.gmra.mxu1 %v803_v30  ;;  %3939 = vpow2.f32 %v210_v60  ;;  %v505_v10 = vpack.c.b16 %v4566_v52, %v4550_v35  ;;  %v150_v22 = vsub.f32 0.0, %v146_v49  ;;  %v3781_v30 = vld [vmem:[%s5388_s1 + $0x2a8] sm:$0xff]  ;;  %v151_v33 = vsub.f32 0.0, %v147_v18 }
  0xaf   :  { %2326 = vmatpush.bf16.msra.mxu3 %v3752_v43  ;;  %v4571_v13 = vpop.eup %3929  ;;  %v4609_v19 = vunpack.c.l.b16 %v135_v59  ;;  %2287 = vmatpush.bf16.msra.mxu1 %v3737_v14  ;;  %v2996_v38 = vadd.f32 -8.666667, %v4629_v34  ;;  %v2997_v11 = vadd.f32 -8.666667, %v4637_v51  ;;  %v3003_v58 = vadd.f32 -10.0, %v4643_v36  ;;  %v3775_v59 = vld [vmem:[%s5388_s1 + $0x278] sm:$0xff] }
  0xb0   :  { %v4578_v5 = vpop.eup %3931  ;;  %v160_v24 = vpack.c.bf16 %v4571_v13, %v4571_v13  ;;  %v156_v50 = vmul.f32 1.442695, %v150_v22  ;;  %3941 = vpow2.f32 %v236_v12  ;;  %v158_v35 = vmul.f32 1.442695, %v151_v33 }
  0xb1   :  { %2339 = vmatpush.bf16.msrb.mxu0 %v3766_v40  ;;  %2376 = vmatpush.bf16.msrb.mxu2 %v3783_v46  ;;  %v4585_v9 = vpop.eup %3933  ;;  %v161_v28 = vpack.c.bf16 %v4578_v5, %v4578_v5  ;;  %v168_v40 = vmul.f32 0.8, %v2996_v38  ;;  %v198_v41 = vmul.f32 0.8, %v3002_v45  ;;  %3943 = vpow2.f32 %v238_v20 }
  0xb2   :  { %v4614_v23 = vpop.eup %3935  ;;  %v78_v39 = vpack.c.bf16 %v4585_v9, %v4585_v9  ;;  %v169_v2 = vmul.f32 0.8, %v2997_v11  ;;  %v199_v44 = vmul.f32 0.8, %v3003_v58  ;;  %3945 = vpow2.f32 %v156_v50  ;;  %v3773_v11 = vld [vmem:[%s5388_s1 + $0x268] sm:$0xff]  ;;  %v3778_v58 = vld [vmem:[%s5388_s1 + $0x290] sm:$0xff] }
  0xb3   :  { %v3938_v32 = vpop.eup %3937  ;;  %v79_v43 = vpack.c.bf16 %v4614_v23, %v4614_v23  ;;  %2288 = vmatpush.bf16.msra.mxu1 %v3736_v29  ;;  %v172_v48 = vmul.f32 %v168_v40, %v168_v40  ;;  %v202_v52 = vmul.f32 %v198_v41, %v198_v41  ;;  %3947 = vpow2.f32 %v158_v35 }
  0xb4   :  { %v3940_v42 = vpop.eup %3939  ;;  %v216_v46 = vpack.c.bf16 %v3938_v32, %v3938_v32  ;;  %v203_v54 = vmul.f32 %v199_v44, %v199_v44  ;;  %v3006_v3 = vadd.f32 -11.333333, %v4604_v37  ;;  %v3007_v60 = vadd.f32 -11.333333, %v4643_v36  ;;  %v3760_v32 = vld [vmem:[%s5388_s1 + $0x200] sm:$0xff]  ;;  %v3786_v44 = vld [vmem:[%s5388_s1 + $0x2d0] sm:$0xff] }
  0xb5   :  { %2251 = vmatmul.bf16.vlgmr.msrb.gmra.mxu3 %v516_v15  ;;  %2340 = vmatpush.bf16.msrb.mxu0 %v3765_v0  ;;  %v4607_v15 = vunpack.c.l.b16 %v134_v8  ;;  %v173_v8 = vmul.f32 %v169_v2, %v169_v2  ;;  %v217_v55 = vpack.c.bf16 %v3940_v42, %v3940_v42  ;;  %v176_v57 = vsub.f32 0.0, %v172_v48  ;;  %v3788_v0 = vld [vmem:[%s5388_s1 + $0x2e0] sm:$0xff] }
  0xb6   :  { %2395 = vmatpush.bf16.msrb.mxu3 %v3791_v7  ;;  %2377 = vmatpush.bf16.msrb.mxu2 %v3782_v17  ;;  %v206_v26 = vsub.f32 0.0, %v202_v52  ;;  %v4670_v62 = vunpack.c.l.b16 %v160_v24  ;;  %v207_v4 = vsub.f32 0.0, %v203_v54  ;;  %v3942_v1 = vpop.eup %3941  ;;  %v4678_v5 = vunpack.c.l.b16 %v161_v28  ;;  %v3779_v7 = vld [vmem:[%s5388_s1 + $0x298] sm:$0xff]  ;;  %v3761_v24 = vld [vmem:[%s5388_s1 + $0x208] sm:$0xff]  ;;  %v3772_v2 = vld [vmem:[%s5388_s1 + $0x260] sm:$0xff] }
  0xb7   :  { %v517_v61 = vpack.c.b16 %v4609_v19, %v4607_v15  ;;  %v177_v13 = vsub.f32 0.0, %v173_v8  ;;  %v4680_v27 = vunpack.c.l.b16 %v78_v39  ;;  %v180_v31 = vmul.f32 1.442695, %v176_v57  ;;  %v3944_v49 = vpop.eup %3943 }
  0xb8   :  { %v4688_v9 = vunpack.c.l.b16 %v79_v43  ;;  %v214_v12 = vmul.f32 1.442695, %v207_v4  ;;  %v226_v14 = vmul.f32 0.8, %v3006_v3  ;;  %v3946_v17 = vpop.eup %3945  ;;  %v4692_v18 = vunpack.c.l.b16 %v217_v55 }
  0xb9   :  { %2341 = vmatpush.bf16.msrb.mxu0 %v3764_v56  ;;  %v4690_v56 = vunpack.c.l.b16 %v216_v46  ;;  %3949 = vpow2.f32 %v180_v31  ;;  %v227_v45 = vmul.f32 0.8, %v3007_v60  ;;  %v3948_v15 = vpop.eup %3947  ;;  %v244_v19 = vpack.c.bf16 %v3942_v1, %v3942_v1  ;;  %v3777_v46 = vld [vmem:[%s5388_s1 + $0x288] sm:$0xff]  ;;  %v3799_v31 = vld [vmem:[%s5388_s1 + $0x338] sm:$0xff] }
  0xba   :  { %2396 = vmatpush.bf16.msrb.mxu3 %v3790_v21  ;;  %2378 = vmatpush.bf16.msrb.mxu2 %v3781_v30  ;;  %v230_v20 = vmul.f32 %v226_v14, %v226_v14  ;;  %v3008_v21 = vadd.f32 -12.666667, %v4629_v34  ;;  %v245_v22 = vpack.c.bf16 %v3944_v49, %v3944_v49  ;;  %v162_v28 = vpack.c.bf16 %v3946_v17, %v3946_v17  ;;  %v3787_v30 = vld [vmem:[%s5388_s1 + $0x2d8] sm:$0xff] }
  0xbb   :  { %v231_v23 = vmul.f32 %v227_v45, %v227_v45  ;;  %v3009_v33 = vadd.f32 -12.666667, %v4637_v51  ;;  %v528_v38 = vpack.c.b16 %v4678_v5, %v4670_v62  ;;  %v163_v39 = vpack.c.bf16 %v3948_v15, %v3948_v15  ;;  %v3771_v17 = vld [vmem:[%s5388_s1 + $0x258] sm:$0xff] }
  0xbc   :  { %2199 = vmatmul.bf16.gmra.mxu0 %v481_v63  ;;  %2237 = vmatmul.bf16.gmra.mxu2 %v505_v10  ;;  %v3762_v63 = vld [vmem:[%s5388_s1 + $0x210] sm:$0xff]  ;;  %v182_v10 = vmul.f32 1.442695, %v177_v13  ;;  %v234_v29 = vsub.f32 0.0, %v230_v20  ;;  %v252_v35 = vmul.f32 0.8, %v3008_v21  ;;  %v493_v40 = vpack.c.b16 %v4688_v9, %v4680_v27 }
  0xbd   :  { %2342 = vmatpush.bf16.msrb.mxu0 %v3763_v47  ;;  %v235_v50 = vsub.f32 0.0, %v231_v23  ;;  %v552_v41 = vpack.c.b16 %v4692_v18, %v4690_v56  ;;  %v4717_v42 = vunpack.c.l.b16 %v244_v19  ;;  %v253_v52 = vmul.f32 0.8, %v3009_v33  ;;  %v3776_v56 = vld [vmem:[%s5388_s1 + $0x280] sm:$0xff]  ;;  %v3798_v20 = vld [vmem:[%s5388_s1 + $0x330] sm:$0xff]  ;;  %v3815_v33 = vld [vmem:[%s5388_s1 + $0x3b8] sm:$0xff] }
  0xbe   :  { %2213 = vmatmul.bf16.vlgmr.msrb.gmra.mxu1 %v492_v16  ;;  %2397 = vmatpush.bf16.msrb.mxu3 %v3789_v53  ;;  %v212_v16 = vmul.f32 1.442695, %v206_v26  ;;  %3951 = vpow2.f32 %v182_v10  ;;  %v240_v43 = vmul.f32 1.442695, %v234_v29  ;;  %v256_v8 = vmul.f32 %v252_v35, %v252_v35 }
  0xbf   :  { %2357 = vmatpush.bf16.msrb.mxu1 %v3775_v59  ;;  %2379 = vmatpush.bf16.msrb.mxu2 %v3780_v25  ;;  %v3950_v47 = vpop.eup %3949  ;;  %v242_v48 = vmul.f32 1.442695, %v235_v50  ;;  %v2998_v53 = vadd.f32 -8.666667, %v4604_v37  ;;  %v4729_v3 = vunpack.c.l.b16 %v245_v22  ;;  %v4731_v55 = vunpack.c.l.b16 %v162_v28  ;;  %v3770_v28 = vld [vmem:[%s5388_s1 + $0x250] sm:$0xff] }
  0xc0   :  { %3953 = vpow2.f32 %v212_v16  ;;  %v2999_v57 = vadd.f32 -8.666667, %v4643_v36  ;;  %v4734_v25 = vunpack.c.l.b16 %v163_v39  ;;  %v257_v26 = vmul.f32 %v253_v52, %v253_v52 }
  0xc1   :  { %2343 = vmatpush.bf16.msrb.mxu0 %v3762_v63  ;;  %3955 = vpow2.f32 %v214_v12  ;;  %v260_v60 = vsub.f32 0.0, %v256_v8  ;;  %v188_v62 = vpack.c.bf16 %v3950_v47, %v3950_v47  ;;  %v170_v13 = vmul.f32 0.8, %v2998_v53  ;;  %v3797_v47 = vld [vmem:[%s5388_s1 + $0x328] sm:$0xff]  ;;  %v3823_v8 = vld [vmem:[%s5388_s1 + $0x3f8] sm:$0xff] }
  0xc2   :  { %2398 = vmatpush.bf16.msrb.mxu3 %v3788_v0  ;;  %3957 = vpow2.f32 %v240_v43  ;;  %v171_v63 = vmul.f32 0.8, %v2999_v57  ;;  %v3016_v4 = vadd.f32 -15.333333, %v4629_v34  ;;  %v261_v5 = vsub.f32 0.0, %v257_v26  ;;  %v3769_v26 = vld [vmem:[%s5388_s1 + $0x248] sm:$0xff] }
  0xc3   :  { %2358 = vmatpush.bf16.msrb.mxu1 %v3774_v6  ;;  %2380 = vmatpush.bf16.msrb.mxu2 %v3779_v7  ;;  %3959 = vpow2.f32 %v242_v48  ;;  %v264_v27 = vmul.f32 1.442695, %v260_v60  ;;  %v174_v16 = vmul.f32 %v170_v13, %v170_v13  ;;  %v3785_v7 = vld [vmem:[%s5388_s1 + $0x2c8] sm:$0xff]  ;;  %v3017_v49 = vadd.f32 -15.333333, %v4637_v51  ;;  %v3814_v60 = vld [vmem:[%s5388_s1 + $0x3b0] sm:$0xff] }
  0xc4   :  { %v3952_v54 = vpop.eup %3951  ;;  %v175_v6 = vmul.f32 %v171_v63, %v171_v63  ;;  %v564_v9 = vpack.c.b16 %v4729_v3, %v4717_v42  ;;  %v529_v10 = vpack.c.b16 %v4734_v25, %v4731_v55  ;;  %v266_v14 = vmul.f32 1.442695, %v261_v5  ;;  %v3807_v55 = vld [vmem:[%s5388_s1 + $0x378] sm:$0xff]  ;;  %v3812_v25 = vld [vmem:[%s5388_s1 + $0x3a0] sm:$0xff] }
  0xc5   :  { %2256 = vmatmul.bf16.gmra.mxu3 %v517_v61  ;;  %2344 = vmatpush.bf16.msrb.mxu0 %v3761_v24  ;;  %v189_v12 = vpack.c.bf16 %v3952_v54, %v3952_v54  ;;  %v4754_v45 = vunpack.c.l.b16 %v188_v62  ;;  %v178_v15 = vsub.f32 0.0, %v174_v16  ;;  %v308_v21 = vmul.f32 0.8, %v3016_v4  ;;  %v3813_v16 = vld [vmem:[%s5388_s1 + $0x3a8] sm:$0xff] }
  0xc6   :  { %2399 = vmatpush.bf16.msrb.mxu3 %v3787_v30  ;;  %v3954_v59 = vpop.eup %3953  ;;  %v179_v19 = vsub.f32 0.0, %v175_v6  ;;  %3961 = vpow2.f32 %v264_v27  ;;  %v309_v29 = vmul.f32 0.8, %v3017_v49  ;;  %v3784_v30 = vld [vmem:[%s5388_s1 + $0x2c0] sm:$0xff]  ;;  %v3021_v35 = vadd.f32 -16.666666, %v4637_v51 }
  0xc7   :  { %2359 = vmatpush.bf16.msrb.mxu1 %v3773_v11  ;;  %2381 = vmatpush.bf16.msrb.mxu2 %v3778_v58  ;;  %v3956_v61 = vpop.eup %3955  ;;  %v218_v0 = vpack.c.bf16 %v3954_v59, %v3954_v59  ;;  %3963 = vpow2.f32 %v266_v14  ;;  %v312_v50 = vmul.f32 %v308_v21, %v308_v21  ;;  %v4772_v11 = vunpack.c.l.b16 %v189_v12 }
  0xc8   :  { %v219_v1 = vpack.c.bf16 %v3956_v61, %v3956_v61  ;;  %v3958_v18 = vpop.eup %3957  ;;  %v186_v39 = vmul.f32 1.442695, %v179_v19  ;;  %v313_v58 = vmul.f32 %v309_v29, %v309_v29  ;;  %v3010_v43 = vadd.f32 -12.666667, %v4604_v37  ;;  %v3796_v61 = vld [vmem:[%s5388_s1 + $0x320] sm:$0xff] }
  0xc9   :  { %2345 = vmatpush.bf16.msrb.mxu0 %v3760_v32  ;;  %v3960_v22 = vpop.eup %3959  ;;  %v4759_v23 = vunpack.c.l.b16 %v218_v0  ;;  %v3020_v32 = vadd.f32 -16.666666, %v4629_v34  ;;  %v316_v42 = vsub.f32 0.0, %v312_v50  ;;  %v3011_v53 = vadd.f32 -12.666667, %v4643_v36  ;;  %v3822_v0 = vld [vmem:[%s5388_s1 + $0x3f0] sm:$0xff] }
  0xca   :  { %2400 = vmatpush.bf16.msrb.mxu3 %v3786_v44  ;;  %v4761_v24 = vunpack.c.l.b16 %v219_v1  ;;  %v3012_v62 = vadd.f32 -14.0, %v4629_v34  ;;  %v254_v1 = vmul.f32 0.8, %v3010_v43  ;;  %v3024_v43 = vadd.f32 -18.0, %v4629_v34 }
  0xcb   :  { %2360 = vmatpush.bf16.msrb.mxu1 %v3772_v2  ;;  %2382 = vmatpush.bf16.msrb.mxu2 %v3777_v46  ;;  %v317_v2 = vsub.f32 0.0, %v313_v58  ;;  %v336_v44 = vmul.f32 0.8, %v3020_v32  ;;  %v337_v46 = vmul.f32 0.8, %v3021_v35  ;;  %vm2942_vm2 = vcmask 523264  }
  0xcc   :  { %2270 = vmatmul.bf16.vlgmr.msra.gmra.mxu0 %v528_v38  ;;  %2308 = vmatmul.bf16.vlgmr.msra.gmra.mxu2 %v552_v41  ;;  %v184_v38 = vmul.f32 1.442695, %v178_v15  ;;  %v247_v41 = vpack.c.bf16 %v3960_v22, %v3960_v22  ;;  %v553_v48 = vpack.c.b16 %v4761_v24, %v4759_v23  ;;  %v320_v52 = vmul.f32 1.442695, %v316_v42  ;;  %v3962_v54 = vpop.eup %3961  ;;  %v3820_v42 = vld [vmem:[%s5388_s1 + $0x3e0] sm:$0xff] }
  0xcd   :  { %2414 = vmatpush.bf16.msra.mxu0 %v3799_v31  ;;  %v322_v3 = vmul.f32 1.442695, %v317_v2  ;;  %v340_v57 = vmul.f32 %v336_v44, %v336_v44  ;;  %v341_v59 = vmul.f32 %v337_v46, %v337_v46  ;;  %v3964_v13 = vpop.eup %3963  ;;  %v3768_v31 = vld [vmem:[%s5388_s1 + $0x240] sm:$0xff]  ;;  %v255_v6 = vmul.f32 0.8, %v3011_v53 }
  0xce   :  { %2218 = vmatmul.bf16.gmra.mxu1 %v493_v40  ;;  %2401 = vmatpush.bf16.msrb.mxu3 %v3785_v7  ;;  %v246_v40 = vpack.c.bf16 %v3958_v18, %v3958_v18  ;;  %3965 = vpow2.f32 %v184_v38  ;;  %v4798_v4 = vunpack.c.l.b16 %v247_v41  ;;  %v272_v7 = vpack.c.bf16 %v3962_v54, %v3962_v54  ;;  %v3794_v41 = vld [vmem:[%s5388_s1 + $0x310] sm:$0xff] }
  0xcf   :  { %2361 = vmatpush.bf16.msrb.mxu1 %v3771_v17  ;;  %2383 = vmatpush.bf16.msrb.mxu2 %v3776_v56  ;;  %3967 = vpow2.f32 %v186_v39  ;;  %v344_v5 = vsub.f32 0.0, %v340_v57  ;;  %v345_v27 = vsub.f32 0.0, %v341_v59  ;;  %v258_v49 = vmul.f32 %v254_v1, %v254_v1  ;;  %v3821_v39 = vld [vmem:[%s5388_s1 + $0x3e8] sm:$0xff] }
  0xd0   :  { %v4796_v63 = vunpack.c.l.b16 %v246_v40  ;;  %3969 = vpow2.f32 %v320_v52  ;;  %v280_v12 = vmul.f32 0.8, %v3012_v62  ;;  %v273_v17 = vpack.c.bf16 %v3964_v13, %v3964_v13  ;;  %v3811_v52 = vld [vmem:[%s5388_s1 + $0x398] sm:$0xff] }
  0xd1   :  { %2415 = vmatpush.bf16.msra.mxu0 %v3798_v20  ;;  %3971 = vpow2.f32 %v322_v3  ;;  %v348_v56 = vmul.f32 1.442695, %v344_v5  ;;  %v350_v18 = vmul.f32 1.442695, %v345_v27  ;;  %v259_v15 = vmul.f32 %v255_v6, %v255_v6 }
  0xd2   :  { %2402 = vmatpush.bf16.msrb.mxu3 %v3784_v30  ;;  %v540_v20 = vpack.c.b16 %v4772_v11, %v4754_v45  ;;  %v262_v21 = vsub.f32 0.0, %v258_v49  ;;  %v565_v23 = vpack.c.b16 %v4798_v4, %v4796_v63  ;;  %v284_v29 = vmul.f32 %v280_v12, %v280_v12 }
  0xd3   :  { %2452 = vmatpush.bf16.msra.mxu2 %v3815_v33  ;;  %2362 = vmatpush.bf16.msrb.mxu1 %v3770_v28  ;;  %3973 = vpow2.f32 %v348_v56  ;;  %v263_v24 = vsub.f32 0.0, %v259_v15  ;;  %v3795_v28 = vld [vmem:[%s5388_s1 + $0x318] sm:$0xff]  ;;  %v4822_v45 = vunpack.c.l.b16 %v272_v7  ;;  %v4827_v11 = vunpack.c.l.b16 %v273_v17  ;;  %v3810_v15 = vld [vmem:[%s5388_s1 + $0x390] sm:$0xff] }
  0xd4   :  { %v3966_v14 = vpop.eup %3965  ;;  %3975 = vpow2.f32 %v350_v18  ;;  %v268_v33 = vmul.f32 1.442695, %v262_v21  ;;  %v288_v35 = vsub.f32 0.0, %v284_v29  ;;  %v3019_v53 = vadd.f32 -15.333333, %v4643_v36  ;;  %v3805_v18 = vld [vmem:[%s5388_s1 + $0x368] sm:$0xff] }
  0xd5   :  { %2327 = vmatmul.bf16.vlgmr.msra.gmra.mxu3 %v564_v9  ;;  %2416 = vmatpush.bf16.msra.mxu0 %v3797_v47  ;;  %v3013_v9 = vadd.f32 -14.0, %v4637_v51  ;;  %v4810_v19 = vpop.eup %3967  ;;  %v190_v58 = vpack.c.bf16 %v3966_v14, %v3966_v14  ;;  %v270_v32 = vmul.f32 1.442695, %v263_v24  ;;  %v3018_v47 = vadd.f32 -15.333333, %v4604_v37  ;;  %v3792_v29 = vld [vmem:[%s5388_s1 + $0x300] sm:$0xff] }
  0xd6   :  { %2471 = vmatpush.bf16.msra.mxu3 %v3823_v8  ;;  %v3970_v30 = vpop.eup %3969  ;;  %3977 = vpow2.f32 %v268_v33  ;;  %v191_v2 = vpack.c.bf16 %v4810_v19, %v4810_v19  ;;  %v292_v46 = vmul.f32 1.442695, %v288_v35  ;;  %v3022_v54 = vadd.f32 -16.666666, %v4604_v37  ;;  %v3818_v33 = vld [vmem:[%s5388_s1 + $0x3d0] sm:$0xff] }
  0xd7   :  { %2363 = vmatpush.bf16.msrb.mxu1 %v3769_v26  ;;  %2453 = vmatpush.bf16.msra.mxu2 %v3814_v60  ;;  %v281_v22 = vmul.f32 0.8, %v3013_v9  ;;  %v3972_v50 = vpop.eup %3971  ;;  %3979 = vpow2.f32 %v270_v32  ;;  %v4853_v57 = vunpack.c.l.b16 %v190_v58  ;;  %v310_v59 = vmul.f32 0.8, %v3018_v47  ;;  %v3819_v9 = vld [vmem:[%s5388_s1 + $0x3d8] sm:$0xff] }
  0xd8   :  { %v329_v44 = vpack.c.bf16 %v3972_v50, %v3972_v50  ;;  %v3023_v26 = vadd.f32 -16.666666, %v4643_v36  ;;  %v3025_v60 = vadd.f32 -18.0, %v4637_v51  ;;  %3981 = vpow2.f32 %v292_v46 }
  0xd9   :  { %2417 = vmatpush.bf16.msra.mxu0 %v3796_v61  ;;  %v285_v38 = vmul.f32 %v281_v22, %v281_v22  ;;  %v3974_v3 = vpop.eup %3973  ;;  %v314_v5 = vmul.f32 %v310_v59, %v310_v59  ;;  %v338_v27 = vmul.f32 0.8, %v3022_v54  ;;  %v364_v12 = vmul.f32 0.8, %v3024_v43  ;;  %v3803_v59 = vld [vmem:[%s5388_s1 + $0x358] sm:$0xff] }
  0xda   :  { %2472 = vmatpush.bf16.msra.mxu3 %v3822_v0  ;;  %v3976_v61 = vpop.eup %3975  ;;  %v356_v13 = vpack.c.bf16 %v3974_v3, %v3974_v3  ;;  %v311_v0 = vmul.f32 0.8, %v3019_v53  ;;  %v597_v7 = vunpack.c.l.b16 %v329_v44  ;;  %v539_v14 = vunpack.c.l.b16 %v191_v2 }
  0xdb   :  { %2364 = vmatpush.bf16.msrb.mxu1 %v3768_v31  ;;  %2454 = vmatpush.bf16.msra.mxu2 %v3813_v16  ;;  %v289_v40 = vsub.f32 0.0, %v285_v38  ;;  %v357_v1 = vpack.c.bf16 %v3976_v61, %v3976_v61  ;;  %v339_v31 = vmul.f32 0.8, %v3023_v26  ;;  %v3793_v16 = vld [vmem:[%s5388_s1 + $0x308] sm:$0xff]  ;;  %v318_v17 = vsub.f32 0.0, %v314_v5  ;;  %v3808_v26 = vld [vmem:[%s5388_s1 + $0x380] sm:$0xff] }
  0xdc   :  { %2275 = vmatmul.bf16.gmra.mxu0 %v529_v10  ;;  %2313 = vmatmul.bf16.gmra.mxu2 %v553_v48  ;;  %v328_v10 = vpack.c.bf16 %v3970_v30, %v3970_v30  ;;  %v3806_v48 = vld [vmem:[%s5388_s1 + $0x370] sm:$0xff]  ;;  %v3978_v6 = vpop.eup %3977  ;;  %v315_v49 = vmul.f32 %v311_v0, %v311_v0  ;;  %v342_v56 = vmul.f32 %v338_v27, %v338_v27  ;;  %v365_v19 = vmul.f32 0.8, %v3025_v60  ;;  %v3804_v30 = vld [vmem:[%s5388_s1 + $0x360] sm:$0xff] }
  0xdd   :  { %2418 = vmatpush.bf16.msra.mxu0 %v3795_v28  ;;  %v294_v8 = vmul.f32 1.442695, %v289_v40  ;;  %v4874_v21 = vunpack.c.l.b16 %v356_v13  ;;  %v4876_v22 = vunpack.c.l.b16 %v357_v1  ;;  %v343_v4 = vmul.f32 %v339_v31, %v339_v31 }
  0xde   :  { %2289 = vmatmul.bf16.vlgmr.msra.gmra.mxu1 %v540_v20  ;;  %2473 = vmatpush.bf16.msra.mxu3 %v3821_v39  ;;  %v4857_v62 = vunpack.c.l.b16 %v328_v10  ;;  %v3980_v20 = vpop.eup %3979  ;;  %v319_v63 = vsub.f32 0.0, %v315_v49  ;;  %v324_v24 = vmul.f32 1.442695, %v318_v17  ;;  %v346_v28 = vsub.f32 0.0, %v342_v56 }
  0xdf   :  { %2433 = vmatpush.bf16.msra.mxu1 %v3807_v55  ;;  %2455 = vmatpush.bf16.msra.mxu2 %v3812_v25  ;;  %3983 = vpow2.f32 %v294_v8  ;;  %v368_v38 = vmul.f32 %v364_v12, %v364_v12  ;;  %v3982_v39 = vpop.eup %3981  ;;  %v576_v50 = vpack.c.b16 %v4827_v11, %v4822_v45  ;;  %v347_v35 = vsub.f32 0.0, %v343_v4  ;;  %v3809_v55 = vld [vmem:[%s5388_s1 + $0x388] sm:$0xff]  ;;  %v3802_v12 = vld [vmem:[%s5388_s1 + $0x350] sm:$0xff] }
  0xe0   :  { %v600_v58 = vpack.c.b16 %v597_v7, %v4857_v62  ;;  %v326_v32 = vmul.f32 1.442695, %v319_v63  ;;  %v275_v25 = vpack.c.bf16 %v3980_v20, %v3980_v20  ;;  %3985 = vpow2.f32 %v324_v24  ;;  %v3816_v7 = vld [vmem:[%s5388_s1 + $0x3c0] sm:$0xff] }
  0xe1   :  { %2419 = vmatpush.bf16.msra.mxu0 %v3794_v41  ;;  %v352_v10 = vmul.f32 1.442695, %v346_v28  ;;  %v369_v40 = vmul.f32 %v365_v19, %v365_v19  ;;  %v612_v43 = vpack.c.b16 %v4876_v22, %v4874_v21  ;;  %v354_v45 = vmul.f32 1.442695, %v347_v35 }
  0xe2   :  { %2474 = vmatpush.bf16.msra.mxu3 %v3820_v42  ;;  %v541_v42 = vpack.c.b16 %v539_v14, %v4853_v57  ;;  %3987 = vpow2.f32 %v326_v32  ;;  %v300_v2 = vpack.c.bf16 %v3982_v39, %v3982_v39  ;;  %v372_v44 = vsub.f32 0.0, %v368_v38 }
  0xe3   :  { %2434 = vmatpush.bf16.msra.mxu1 %v3806_v48  ;;  %2456 = vmatpush.bf16.msra.mxu2 %v3811_v52  ;;  %v373_v46 = vsub.f32 0.0, %v369_v40  ;;  %3989 = vpow2.f32 %v352_v10  ;;  %v3014_v47 = vadd.f32 -14.0, %v4604_v37  ;;  %v3015_v48 = vadd.f32 -14.0, %v4643_v36  ;;  %v3817_v52 = vld [vmem:[%s5388_s1 + $0x3c8] sm:$0xff] }
  0xe4   :  { %v3032_v8 = vadd.f32 -20.666666, %v4629_v34  ;;  %v4904_v53 = vunpack.c.l.b16 %v275_v25  ;;  %v376_v3 = vmul.f32 1.442695, %v372_v44  ;;  %3991 = vpow2.f32 %v354_v45 }
  0xe5   :  { %2332 = vmatmul.bf16.gmra.mxu3 %v565_v23  ;;  %2420 = vmatpush.bf16.msra.mxu0 %v3793_v16  ;;  %v274_v23 = vpack.c.bf16 %v3978_v6, %v3978_v6  ;;  %v3984_v41 = vpop.eup %3983  ;;  %v378_v57 = vmul.f32 1.442695, %v373_v46  ;;  %v282_v60 = vmul.f32 0.8, %v3014_v47  ;;  %v283_v61 = vmul.f32 0.8, %v3015_v48 }
  0xe6   :  { %2475 = vmatpush.bf16.msra.mxu3 %v3819_v9  ;;  %v301_v54 = vpack.c.bf16 %v3984_v41, %v3984_v41  ;;  %v3033_v62 = vadd.f32 -20.666666, %v4637_v51  ;;  %v3986_v13 = vpop.eup %3985  ;;  %v4913_v0 = vunpack.c.l.b16 %v300_v2  ;;  %3993 = vpow2.f32 %v376_v3  ;;  %v3800_v2 = vld [vmem:[%s5388_s1 + $0x340] sm:$0xff] }
  0xe7   :  { %2435 = vmatpush.bf16.msra.mxu1 %v3805_v18  ;;  %2457 = vmatpush.bf16.msra.mxu2 %v3810_v15  ;;  %v4896_v11 = vunpack.c.l.b16 %v274_v23  ;;  %v420_v1 = vmul.f32 0.8, %v3032_v8  ;;  %v3036_v5 = vadd.f32 -22.0, %v4629_v34  ;;  %v330_v31 = vpack.c.bf16 %v3986_v13, %v3986_v13 }
  0xe8   :  { %v3988_v27 = vpop.eup %3987  ;;  %v286_v16 = vmul.f32 %v282_v60, %v282_v60  ;;  %v287_v6 = vmul.f32 %v283_v61, %v283_v61  ;;  %v3037_v49 = vadd.f32 -22.0, %v4637_v51  ;;  %3995 = vpow2.f32 %v378_v57 }
  0xe9   :  { %2421 = vmatpush.bf16.msra.mxu0 %v3792_v29  ;;  %v331_v9 = vpack.c.bf16 %v3988_v27, %v3988_v27  ;;  %v421_v14 = vmul.f32 0.8, %v3033_v62  ;;  %v424_v17 = vmul.f32 %v420_v1, %v420_v1  ;;  %v3990_v56 = vpop.eup %3989  ;;  %v585_v18 = vunpack.c.l.b16 %v301_v54 }
  0xea   :  { %2476 = vmatpush.bf16.msra.mxu3 %v3818_v33  ;;  %v290_v15 = vsub.f32 0.0, %v286_v16  ;;  %v291_v19 = vsub.f32 0.0, %v287_v6  ;;  %v448_v20 = vmul.f32 0.8, %v3036_v5  ;;  %v598_v21 = vunpack.c.l.b16 %v330_v31  ;;  %v3992_v23 = vpop.eup %3991 }
  0xeb   :  { %2436 = vmatpush.bf16.msra.mxu1 %v3804_v30  ;;  %2458 = vmatpush.bf16.msra.mxu2 %v3809_v55  ;;  %v599_v22 = vunpack.c.l.b16 %v331_v9  ;;  %v425_v63 = vmul.f32 %v421_v14, %v421_v14  ;;  %v428_v4 = vsub.f32 0.0, %v424_v17  ;;  %v449_v29 = vmul.f32 0.8, %v3037_v49 }
  0xec   :  { %2346 = vmatmul.bf16.vlgmr.msrb.gmra.mxu0 %v576_v50  ;;  %2384 = vmatmul.bf16.vlgmr.msrb.gmra.mxu2 %v600_v58  ;;  %v296_v24 = vmul.f32 1.442695, %v290_v15  ;;  %v298_v28 = vmul.f32 1.442695, %v291_v19  ;;  %v3994_v30 = vpop.eup %3993  ;;  %v577_v33 = vpack.c.b16 %v4904_v53, %v4896_v11  ;;  %v358_v38 = vpack.c.bf16 %v3990_v56, %v3990_v56  ;;  %v3801_v58 = vld [vmem:[%s5388_s1 + $0x348] sm:$0xff]  ;;  %s4072_s1 = smov 32  }
  0xed   :  { %v429_v39 = vsub.f32 0.0, %v425_v63  ;;  %v432_v50 = vmul.f32 1.442695, %v428_v4  ;;  %v588_v32 = vpack.c.b16 %v585_v18, %v4913_v0  ;;  %v452_v35 = vmul.f32 %v448_v20, %v448_v20 }
  0xee   :  { %2294 = vmatmul.bf16.gmra.mxu1 %v541_v42  ;;  %2477 = vmatpush.bf16.msra.mxu3 %v3817_v52  ;;  %3997 = vpow2.f32 %v296_v24  ;;  %v453_v55 = vmul.f32 %v449_v29, %v449_v29  ;;  %v3996_v25 = vpop.eup %3995  ;;  %v601_v10 = vpack.c.b16 %v599_v22, %v598_v21  ;;  %v359_v40 = vpack.c.bf16 %v3992_v23, %v3992_v23 }
  0xef   :  { %2437 = vmatpush.bf16.msra.mxu1 %v3803_v59  ;;  %2459 = vmatpush.bf16.msra.mxu2 %v3808_v26  ;;  %3999 = vpow2.f32 %v298_v28  ;;  %v434_v41 = vmul.f32 1.442695, %v429_v39  ;;  %v384_v42 = vpack.c.bf16 %v3994_v30, %v3994_v30  ;;  %v610_v11 = vunpack.c.l.b16 %v358_v38 }
  0xf0   :  { %4001 = vpow2.f32 %v432_v50  ;;  %v457_v45 = vsub.f32 0.0, %v453_v55  ;;  %v3026_v44 = vadd.f32 -18.0, %v4604_v37  ;;  %v3027_v46 = vadd.f32 -18.0, %v4643_v36 }
  0xf1   :  { %4003 = vpow2.f32 %v434_v41  ;;  %v385_v47 = vpack.c.bf16 %v3996_v25, %v3996_v25  ;;  %v3028_v8 = vadd.f32 -19.333334, %v4629_v34  ;;  %v611_v53 = vunpack.c.l.b16 %v359_v40 }
  0xf2   :  { %2478 = vmatpush.bf16.msra.mxu3 %v3816_v7  ;;  %v462_v52 = vmul.f32 1.442695, %v457_v45  ;;  %v366_v54 = vmul.f32 0.8, %v3026_v44  ;;  %v367_v3 = vmul.f32 0.8, %v3027_v46  ;;  %v4936_v26 = vunpack.c.l.b16 %v384_v42 }
  0xf3   :  { %2438 = vmatpush.bf16.msra.mxu1 %v3802_v12  ;;  %v3029_v57 = vadd.f32 -19.333334, %v4637_v51  ;;  %v392_v60 = vmul.f32 0.8, %v3028_v8  ;;  %v3034_v61 = vadd.f32 -20.666666, %v4604_v37  ;;  %v621_v5 = vunpack.c.l.b16 %v385_v47 }
  0xf4   :  { %v3998_v59 = vpop.eup %3997  ;;  %v370_v13 = vmul.f32 %v366_v54, %v366_v54  ;;  %v371_v0 = vmul.f32 %v367_v3, %v367_v3  ;;  %v3035_v34 = vadd.f32 -20.666666, %v4643_v36  ;;  %v613_v18 = vpack.c.b16 %v611_v53, %v610_v11 }
  0xf5   :  { %2403 = vmatmul.bf16.vlgmr.msrb.gmra.mxu3 %v612_v43  ;;  %v456_v43 = vsub.f32 0.0, %v452_v35  ;;  %v4000_v62 = vpop.eup %3999  ;;  %v302_v27 = vpack.c.bf16 %v3998_v59, %v3998_v59  ;;  %v393_v51 = vmul.f32 0.8, %v3029_v57  ;;  %v396_v31 = vmul.f32 %v392_v60, %v392_v60 }
  0xf6   :  { %v4002_v1 = vpop.eup %4001  ;;  %v374_v7 = vsub.f32 0.0, %v370_v13  ;;  %v375_v49 = vsub.f32 0.0, %v371_v0  ;;  %v422_v9 = vmul.f32 0.8, %v3034_v61  ;;  %v303_v12 = vpack.c.bf16 %v4000_v62, %v4000_v62 }
  0xf7   :  { %2439 = vmatpush.bf16.msra.mxu1 %v3801_v58  ;;  %v460_v48 = vmul.f32 1.442695, %v456_v43  ;;  %v4004_v16 = vpop.eup %4003  ;;  %v440_v6 = vpack.c.bf16 %v4002_v1, %v4002_v1  ;;  %v397_v17 = vmul.f32 %v393_v51, %v393_v51  ;;  %v400_v56 = vsub.f32 0.0, %v396_v31 }
  0xf8   :  { %v441_v14 = vpack.c.bf16 %v4004_v16, %v4004_v16  ;;  %v380_v19 = vmul.f32 1.442695, %v374_v7  ;;  %v423_v20 = vmul.f32 0.8, %v3035_v34  ;;  %v382_v63 = vmul.f32 1.442695, %v375_v49 }
  0xf9   :  { %4005 = vpow2.f32 %v460_v48  ;;  %v644_v15 = vunpack.c.l.b16 %v440_v6  ;;  %v401_v4 = vsub.f32 0.0, %v397_v17  ;;  %v624_v24 = vpack.c.b16 %v621_v5, %v4936_v26 }
  0xfa   :  { %4007 = vpow2.f32 %v462_v52  ;;  %v645_v22 = vunpack.c.l.b16 %v441_v14  ;;  %v404_v28 = vmul.f32 1.442695, %v400_v56  ;;  %v426_v29 = vmul.f32 %v422_v9, %v422_v9 }
  0xfb   :  { %2440 = vmatpush.bf16.msra.mxu1 %v3800_v2  ;;  %v427_v30 = vmul.f32 %v423_v20, %v423_v20  ;;  %v587_v38 = vunpack.c.l.b16 %v303_v12  ;;  %v406_v50 = vmul.f32 1.442695, %v401_v4  ;;  %4009 = vpow2.f32 %v380_v19  ;;  %v1408_v12 = vpop.f32.mrf.mxu3 }
  0xfc   :  { %2351 = vmatmul.bf16.gmra.mxu0 %v577_v33  ;;  %2389 = vmatmul.bf16.gmra.mxu2 %v601_v10  ;;  %v586_v33 = vunpack.c.l.b16 %v302_v27  ;;  %v648_v58 = vpack.c.b16 %v645_v22, %v644_v15  ;;  %4011 = vpow2.f32 %v382_v63  ;;  %v3038_v25 = vadd.f32 -22.0, %v4604_v37 }
  0xfd   :  { %v431_v35 = vsub.f32 0.0, %v427_v30  ;;  %v3039_v10 = vadd.f32 -22.0, %v4643_v36  ;;  %4013 = vpow2.f32 %v404_v28  ;;  %v3030_v43 = vadd.f32 -19.333334, %v4604_v37 }
  0xfe   :  { %2365 = vmatmul.bf16.vlgmr.msrb.gmra.mxu1 %v588_v32  ;;  %v430_v32 = vsub.f32 0.0, %v426_v29  ;;  %4015 = vpow2.f32 %v406_v50  ;;  %v450_v45 = vmul.f32 0.8, %v3038_v25  ;;  %v3031_v2 = vadd.f32 -19.333334, %v4643_v36 }
  0xff   :  { %v4006_v21 = vpop.eup %4005  ;;  %v438_v42 = vmul.f32 1.442695, %v431_v35  ;;  %v451_v11 = vmul.f32 0.8, %v3039_v10  ;;  %v394_v44 = vmul.f32 0.8, %v3030_v43  ;;  %v589_v46 = vpack.c.b16 %v587_v38, %v586_v33 }
 0x100   :  { %v4008_v23 = vpop.eup %4007  ;;  %v468_v39 = vpack.c.bf16 %v4006_v21, %v4006_v21  ;;  %v436_v41 = vmul.f32 1.442695, %v430_v32  ;;  %v454_v47 = vmul.f32 %v450_v45, %v450_v45  ;;  %v395_v54 = vmul.f32 0.8, %v3031_v2 }
 0x101   :  { %v469_v55 = vpack.c.bf16 %v4008_v23, %v4008_v23  ;;  %v455_v48 = vmul.f32 %v451_v11, %v451_v11  ;;  %v4010_v52 = vpop.eup %4009  ;;  %v398_v59 = vmul.f32 %v394_v44, %v394_v44  ;;  %vm2947_vm3 = vcmask 785408  }
 0x102   :  { %4017 = vpow2.f32 %v436_v41  ;;  %v656_v8 = vunpack.c.l.b16 %v468_v39  ;;  %v4012_v3 = vpop.eup %4011  ;;  %v458_v57 = vsub.f32 0.0, %v454_v47  ;;  %v399_v61 = vmul.f32 %v395_v54, %v395_v54 }
 0x103   :  { %4019 = vpow2.f32 %v438_v42  ;;  %v657_v53 = vunpack.c.l.b16 %v469_v55  ;;  %v459_v37 = vsub.f32 0.0, %v455_v48  ;;  %v4014_v26 = vpop.eup %4013  ;;  %v386_v1 = vpack.c.bf16 %v4010_v52, %v4010_v52  ;;  %v1410_v25 = vpop.f32.mrf.mxu3 }
 0x104   :  { %v4016_v36 = vpop.eup %4015  ;;  %v464_v62 = vmul.f32 1.442695, %v458_v57  ;;  %v387_v51 = vpack.c.bf16 %v4012_v3, %v4012_v3  ;;  %v402_v16 = vsub.f32 0.0, %v398_v59  ;;  %v403_v9 = vsub.f32 0.0, %v399_v61 }
 0x105   :  { %2408 = vmatmul.bf16.gmra.mxu3 %v613_v18  ;;  %v466_v13 = vmul.f32 1.442695, %v459_v37  ;;  %v660_v34 = vpack.c.b16 %v657_v53, %v656_v8  ;;  %v412_v14 = vpack.c.bf16 %v4014_v26, %v4014_v26  ;;  %v413_v17 = vpack.c.bf16 %v4016_v36, %v4016_v36 }
 0x106   :  { %4021 = vpow2.f32 %v464_v62  ;;  %v622_v18 = vunpack.c.l.b16 %v386_v1  ;;  %v623_v15 = vunpack.c.l.b16 %v387_v51  ;;  %v408_v21 = vmul.f32 1.442695, %v402_v16 }
 0x107   :  { %v1351_v40 = vpop.f32.mrf.mxu0  ;;  %4023 = vpow2.f32 %v466_v13  ;;  %v410_v63 = vmul.f32 1.442695, %v403_v9  ;;  %v632_v23 = vunpack.c.l.b16 %v412_v14 }
 0x108   :  { %v4018_v0 = vpop.eup %4017  ;;  %v625_v33 = vpack.c.b16 %v623_v15, %v622_v18  ;;  %4025 = vpow2.f32 %v408_v21 }
 0x109   :  { %v4020_v5 = vpop.eup %4019  ;;  %v442_v31 = vpack.c.bf16 %v4018_v0, %v4018_v0  ;;  %4027 = vpow2.f32 %v410_v63 }
 0x10a   :  { %v443_v49 = vpack.c.bf16 %v4020_v5, %v4020_v5 }
 0x10b   :  { %v646_v19 = vunpack.c.l.b16 %v442_v31 }
 0x10c   :  { %2422 = vmatmul.bf16.vlgmr.msra.gmra.mxu0 %v624_v24  ;;  %2460 = vmatmul.bf16.vlgmr.msra.gmra.mxu2 %v648_v58  ;;  %v647_v20 = vunpack.c.l.b16 %v443_v49  ;;  %v4022_v4 = vpop.eup %4021  ;;  %v633_v24 = vunpack.c.l.b16 %v413_v17 }
 0x10d   :  { %v1389_v60 = vpop.f32.mrf.mxu2  ;;  %v4024_v28 = vpop.eup %4023  ;;  %v470_v58 = vpack.c.bf16 %v4022_v4, %v4022_v4 }
 0x10e   :  { %2370 = vmatmul.bf16.gmra.mxu1 %v589_v46  ;;  %v649_v38 = vpack.c.b16 %v647_v20, %v646_v19  ;;  %v471_v32 = vpack.c.bf16 %v4024_v28, %v4024_v28  ;;  %v636_v35 = vpack.c.b16 %v633_v24, %v632_v23  ;;  %v4026_v42 = vpop.eup %4025 }
 0x10f   :  { %v1353_v6 = vpop.f32.mrf.mxu0  ;;  %v658_v10 = vunpack.c.l.b16 %v470_v58  ;;  %v4028_v43 = vpop.eup %4027  ;;  %v414_v44 = vpack.c.bf16 %v4026_v42, %v4026_v42 }
 0x110   :  { %v1370_v27 = vpop.f32.mrf.mxu1  ;;  %v415_v46 = vpack.c.bf16 %v4028_v43, %v4028_v43 }
 0x111   :  { %v1371_v7 = vadd.f32 %v1370_v27, %v1351_v40  ;;  %v659_v40 = vunpack.c.l.b16 %v471_v32  ;;  %v634_v47 = vunpack.c.l.b16 %v414_v44 }
 0x112   :  { %v635_v48 = vunpack.c.l.b16 %v415_v46 }
 0x113   :  { %v1390_v56 = vadd.f32 %v1389_v60, %v1371_v7  ;;  %v661_v2 = vpack.c.b16 %v659_v40, %v658_v10 }
 0x114   :  { %v637_v3 = vpack.c.b16 %v635_v48, %v634_v47 }
 0x115   :  { %2479 = vmatmul.bf16.vlgmr.msra.gmra.mxu3 %v660_v34  ;;  %v1409_v22 = vadd.f32 %v1408_v12, %v1390_v56  ;;  %v1391_v29 = vpop.f32.mrf.mxu2 }
 0x118   :  { %v1372_v30 = vpop.f32.mrf.mxu1 }
 0x119   :  { %v1373_v39 = vadd.f32 %v1372_v30, %v1353_v6  ;;  %v1356_v50 = vpop.f32.mrf.mxu0 }
 0x11b   :  { %v1392_v55 = vadd.f32 %v1391_v29, %v1373_v39 }
 0x11c   :  { %2427 = vmatmul.bf16.gmra.mxu0 %v625_v33  ;;  %2465 = vmatmul.bf16.gmra.mxu2 %v649_v38 }
 0x11d   :  { %v1411_v41 = vadd.f32 %v1410_v25, %v1392_v55 }
 0x11e   :  { %2441 = vmatmul.bf16.vlgmr.msra.gmra.mxu1 %v636_v35 }
 0x11f   :  { %v1394_v45 = vpop.f32.mrf.mxu2 }
 0x121   :  { %v1358_v11 = vpop.f32.mrf.mxu0 }
 0x125   :  { %2484 = vmatmul.bf16.gmra.mxu3 %v661_v2 }
 0x127   :  { %v1396_v52 = vpop.f32.mrf.mxu2 }
 0x128   :  { %v1413_v8 = vpop.f32.mrf.mxu3 }
 0x129   :  { %v2195_v53 = vpop.f32.mrf.mxu0 }
 0x12a   :  { %v2196_v54 = vadd.f32 %v2195_v53, %v1409_v22 }
 0x12b   :  { %v1375_v57 = vpop.f32.mrf.mxu1 }
 0x12c   :  { %v1376_v37 = vadd.f32 %v1375_v57, %v1356_v50 }
 0x12e   :  { %v1395_v59 = vadd.f32 %v1394_v45, %v1376_v37  ;;  %2446 = vmatmul.bf16.gmra.mxu1 %v637_v3 }
 0x12f   :  { %v2233_v26 = vpop.f32.mrf.mxu2 }
 0x130   :  { %v1415_v60 = vpop.f32.mrf.mxu3  ;;  %v1414_v61 = vadd.f32 %v1413_v8, %v1395_v59 }
 0x131   :  { %v2197_v36 = vpop.f32.mrf.mxu0 }
 0x132   :  { %v2198_v62 = vadd.f32 %v2197_v36, %v1411_v41 }
 0x133   :  { %v1377_v13 = vpop.f32.mrf.mxu1 }
 0x134   :  { %v1378_v0 = vadd.f32 %v1377_v13, %v1358_v11 }
 0x136   :  { %v1397_v34 = vadd.f32 %v1396_v52, %v1378_v0 }
 0x137   :  { %v2235_v1 = vpop.f32.mrf.mxu2 }
 0x138   :  { %v2252_v5 = vpop.f32.mrf.mxu3  ;;  %v1416_v27 = vadd.f32 %v1415_v60, %v1397_v34 }
 0x139   :  { %v2200_v51 = vpop.f32.mrf.mxu0 }
 0x13a   :  { %v2201_v31 = vadd.f32 %v2200_v51, %v1414_v61 }
 0x13b   :  { %v2214_v16 = vpop.f32.mrf.mxu1 }
 0x13c   :  { %v2215_v6 = vadd.f32 %v2214_v16, %v2196_v54 }
 0x13e   :  { %v2234_v7 = vadd.f32 %v2233_v26, %v2215_v6 }
 0x13f   :  { %v2238_v49 = vpop.f32.mrf.mxu2 }
 0x140   :  { %v2254_v9 = vpop.f32.mrf.mxu3  ;;  %v2253_v12 = vadd.f32 %v2252_v5, %v2234_v7 }
 0x141   :  { %v2202_v14 = vpop.f32.mrf.mxu0 }
 0x142   :  { %v2203_v17 = vadd.f32 %v2202_v14, %v1416_v27 }
 0x143   :  { %v2216_v56 = vpop.f32.mrf.mxu1 }
 0x144   :  { %v2217_v18 = vadd.f32 %v2216_v56, %v2198_v62 }
 0x146   :  { %v2236_v15 = vadd.f32 %v2235_v1, %v2217_v18 }
 0x147   :  { %v2240_v19 = vpop.f32.mrf.mxu2 }
 0x148   :  { %v2257_v20 = vpop.f32.mrf.mxu3  ;;  %v2255_v21 = vadd.f32 %v2254_v9, %v2236_v15 }
 0x149   :  { %v2271_v22 = vpop.f32.mrf.mxu0 }
 0x14a   :  { %v2272_v60 = vadd.f32 %v2271_v22, %v2253_v12 }
 0x14b   :  { %v2219_v63 = vpop.f32.mrf.mxu1 }
 0x14c   :  { %v2220_v4 = vadd.f32 %v2219_v63, %v2201_v31 }
 0x14e   :  { %v2239_v23 = vadd.f32 %v2238_v49, %v2220_v4 }
 0x14f   :  { %v2309_v24 = vpop.f32.mrf.mxu2 }
 0x150   :  { %v2259_v28 = vpop.f32.mrf.mxu3  ;;  %v2258_v29 = vadd.f32 %v2257_v20, %v2239_v23 }
 0x151   :  { %v2273_v30 = vpop.f32.mrf.mxu0 }
 0x152   :  { %v2274_v1 = vadd.f32 %v2273_v30, %v2255_v21 }
 0x153   :  { %v2221_v33 = vpop.f32.mrf.mxu1 }
 0x154   :  { %v2222_v38 = vadd.f32 %v2221_v33, %v2203_v17 }
 0x156   :  { %v2241_v39 = vadd.f32 %v2240_v19, %v2222_v38 }
 0x157   :  { %v2311_v50 = vpop.f32.mrf.mxu2 }
 0x158   :  { %v2328_v58 = vpop.f32.mrf.mxu3  ;;  %v2260_v32 = vadd.f32 %v2259_v28, %v2241_v39 }
 0x159   :  { %v2276_v35 = vpop.f32.mrf.mxu0 }
 0x15a   :  { %v2277_v9 = vadd.f32 %v2276_v35, %v2258_v29 }
 0x15b   :  { %v2290_v55 = vpop.f32.mrf.mxu1 }
 0x15c   :  { %v2291_v62 = vadd.f32 %v2290_v55, %v2272_v60 }
 0x15e   :  { %v2310_v0 = vadd.f32 %v2309_v24, %v2291_v62 }
 0x15f   :  { %v2314_v25 = vpop.f32.mrf.mxu2 }
 0x160   :  { %v2330_v10 = vpop.f32.mrf.mxu3  ;;  %v2329_v51 = vadd.f32 %v2328_v58, %v2310_v0 }
 0x161   :  { %v2278_v40 = vpop.f32.mrf.mxu0 }
 0x162   :  { %v2279_v41 = vadd.f32 %v2278_v40, %v2260_v32 }
 0x163   :  { %v2292_v42 = vpop.f32.mrf.mxu1 }
 0x164   :  { %v2293_v27 = vadd.f32 %v2292_v42, %v2274_v1 }
 0x166   :  { %v2312_v6 = vadd.f32 %v2311_v50, %v2293_v27 }
 0x167   :  { %v2316_v43 = vpop.f32.mrf.mxu2 }
 0x168   :  { %v2333_v45 = vpop.f32.mrf.mxu3  ;;  %v2331_v12 = vadd.f32 %v2330_v10, %v2312_v6 }
 0x169   :  { %v2347_v11 = vpop.f32.mrf.mxu0 }
 0x16a   :  { %v2348_v31 = vadd.f32 %v2347_v11, %v2329_v51 }
 0x16b   :  { %v2295_v2 = vpop.f32.mrf.mxu1 }
 0x16c   :  { %v2296_v56 = vadd.f32 %v2295_v2, %v2277_v9 }
 0x16e   :  { %v2315_v22 = vadd.f32 %v2314_v25, %v2296_v56 }
 0x16f   :  { %v2385_v47 = vpop.f32.mrf.mxu2 }
 0x170   :  { %v2335_v44 = vpop.f32.mrf.mxu3  ;;  %v2334_v33 = vadd.f32 %v2333_v45, %v2315_v22 }
 0x171   :  { %v2349_v46 = vpop.f32.mrf.mxu0 }
 0x172   :  { %v2350_v19 = vadd.f32 %v2349_v46, %v2331_v12 }
 0x173   :  { %v2297_v48 = vpop.f32.mrf.mxu1 }
 0x174   :  { %v2298_v52 = vadd.f32 %v2297_v48, %v2279_v41 }
 0x176   :  { %v2317_v8 = vadd.f32 %v2316_v43, %v2298_v52 }
 0x177   :  { %v2387_v37 = vpop.f32.mrf.mxu2 }
 0x178   :  { %v2404_v53 = vpop.f32.mrf.mxu3  ;;  %v2336_v54 = vadd.f32 %v2335_v44, %v2317_v8 }
 0x179   :  { %v2352_v3 = vpop.f32.mrf.mxu0 }
 0x17a   :  { %v2353_v50 = vadd.f32 %v2352_v3, %v2334_v33 }
 0x17b   :  { %v2366_v57 = vpop.f32.mrf.mxu1 }
 0x17c   :  { %v2367_v7 = vadd.f32 %v2366_v57, %v2348_v31 }
 0x17e   :  { %v2386_v18 = vadd.f32 %v2385_v47, %v2367_v7  ;;  %v4075_v7 = vmov 32.0  }
 0x17f   :  { %v2390_v13 = vpop.f32.mrf.mxu2  ;;  %4029 = vrcp.f32 %v4075_v7 }
 0x180   :  { %v2406_v59 = vpop.f32.mrf.mxu3  ;;  %v2405_v21 = vadd.f32 %v2404_v53, %v2386_v18 }
 0x181   :  { %v2354_v26 = vpop.f32.mrf.mxu0 }
 0x182   :  { %v2355_v61 = vadd.f32 %v2354_v26, %v2336_v54 }
 0x183   :  { %v2368_v36 = vpop.f32.mrf.mxu1 }
 0x184   :  { %v2369_v63 = vadd.f32 %v2368_v36, %v2350_v19 }
 0x186   :  { %v2388_v38 = vadd.f32 %v2387_v37, %v2369_v63 }
 0x187   :  { %v2392_v16 = vpop.f32.mrf.mxu2 }
 0x188   :  { %v2409_v34 = vpop.f32.mrf.mxu3  ;;  %v2407_v35 = vadd.f32 %v2406_v59, %v2388_v38 }
 0x189   :  { %v2423_v14 = vpop.f32.mrf.mxu0 }
 0x18a   :  { %v2424_v24 = vadd.f32 %v2423_v14, %v2405_v21 }
 0x18b   :  { %v2371_v5 = vpop.f32.mrf.mxu1 }
 0x18c   :  { %v2372_v32 = vadd.f32 %v2371_v5, %v2353_v50 }
 0x18e   :  { %v2391_v41 = vadd.f32 %v2390_v13, %v2372_v32 }
 0x18f   :  { %v2461_v23 = vpop.f32.mrf.mxu2 }
 0x190   :  { %v2411_v49 = vpop.f32.mrf.mxu3  ;;  %v2410_v2 = vadd.f32 %v2409_v34, %v2391_v41 }
 0x191   :  { %v2425_v29 = vpop.f32.mrf.mxu0 }
 0x192   :  { %v2426_v10 = vadd.f32 %v2425_v29, %v2407_v35 }
 0x193   :  { %v2373_v17 = vpop.f32.mrf.mxu1 }
 0x194   :  { %v2374_v15 = vadd.f32 %v2373_v17, %v2355_v61  ;;  %v4030_v17 = vpop.eup %4029 }
 0x195   :  { %v2504_v12 = vmul.f32 32.0, %v4030_v17  ;;  %vm2508_vm5 = vweird.f32 %v4030_v17 }
 0x196   :  { %v2393_v20 = vadd.f32 %v2392_v16, %v2374_v15 }
 0x197   :  { %v2463_v25 = vpop.f32.mrf.mxu2  ;;  %v2505_v15 = vsub.f32 1.0, %v2504_v12 }
 0x198   :  { %v2412_v4 = vadd.f32 %v2411_v49, %v2393_v20  ;;  %v2480_v28 = vpop.f32.mrf.mxu3 }
 0x199   :  { %v2428_v11 = vpop.f32.mrf.mxu0  ;;  %v2506_v20 = vmul.f32 %v4030_v17, %v2505_v15 }
 0x19a   :  { %v2429_v46 = vadd.f32 %v2428_v11, %v2410_v2 }
 0x19b   :  { %v2442_v30 = vpop.f32.mrf.mxu1  ;;  %v2507_v22 = vadd.f32 %v4030_v17, %v2506_v20 }
 0x19c   :  { %v2443_v39 = vadd.f32 %v2442_v30, %v2424_v24 }
 0x19d   :  { %v4991_v63 = vsel %vm2508_vm5, %v4030_v17, %v2507_v22 }
 0x19e   :  { %v2462_v58 = vadd.f32 %v2461_v23, %v2443_v39 }
 0x19f   :  { %v2466_v48 = vpop.f32.mrf.mxu2 }
 0x1a0   :  { %v4945_v55 = vadd.f32 %v2480_v28, %v2462_v58  ;;  %v2482_v43 = vpop.f32.mrf.mxu3 }
 0x1a1   :  { %v2430_v59 = vpop.f32.mrf.mxu0 }
 0x1a2   :  { %2822 = vrot.lane.b32.xlu0 %v4945_v55, %s4072_s1  ;;  %2706 = vrot.lane.b32.xlu2 %v4945_v55, %s4073_s14  ;;  %v2491_v3 = vsel %vm2490_vm4, %v4945_v55, 0.0  ;;  %v2431_v60 = vadd.f32 %v2430_v59, %v2412_v4 }
 0x1a3   :  { %2590 = vrot.lane.b32.xlu1 %v4945_v55, %s4074_s15  ;;  %v2444_v40 = vpop.f32.mrf.mxu1 }
 0x1a4   :  { %v2445_v42 = vadd.f32 %v2444_v40, %v2426_v10 }
 0x1a6   :  { %v2464_v45 = vadd.f32 %v2463_v25, %v2445_v42 }
 0x1a7   :  { %v2468_v36 = vpop.f32.mrf.mxu2 }
 0x1a8   :  { %v4953_v44 = vadd.f32 %v2482_v43, %v2464_v45  ;;  %v2485_v8 = vpop.f32.mrf.mxu3 }
 0x1aa   :  { %2592 = vrot.lane.b32.xlu2 %v4953_v44, %s4074_s15  ;;  %v2494_v37 = vsel %vm2490_vm4, %v4953_v44, 0.0 }
 0x1ab   :  { %2708 = vrot.lane.b32.xlu1 %v4953_v44, %s4073_s14  ;;  %v2447_v47 = vpop.f32.mrf.mxu1 }
 0x1ac   :  { %v2448_v52 = vadd.f32 %v2447_v47, %v2429_v46 }
 0x1ae   :  { %v2467_v53 = vadd.f32 %v2466_v48, %v2448_v52 }
 0x1b0   :  { %v4959_v54 = vadd.f32 %v2485_v8, %v2467_v53  ;;  %v2487_v13 = vpop.f32.mrf.mxu3 }
 0x1b2   :  { %2826 = vrot.lane.b32.xlu2 %v4959_v54, %s4072_s1  ;;  %v2497_v57 = vsel %vm2490_vm4, %v4959_v54, 0.0 }
 0x1b3   :  { %2824 = vrot.lane.b32.xlu1 %v4953_v44, %s4072_s1  ;;  %v2449_v26 = vpop.f32.mrf.mxu1 }
 0x1b4   :  { %v2450_v61 = vadd.f32 %v2449_v26, %v2431_v60 }
 0x1b6   :  { %v2469_v62 = vadd.f32 %v2468_v36, %v2450_v61 }
 0x1b8   :  { %v4975_v0 = vadd.f32 %v2487_v13, %v2469_v62 }
 0x1ba   :  { %v2500_v5 = vsel %vm2490_vm4, %v4975_v0, 0.0 }
 0x1cc   :  { %2492 = vadd.xlane.f32.xlu0 %v2491_v3 }
 0x1db   :  { %2498 = vadd.xlane.f32.xlu2 %v2497_v57 }
 0x1dd   :  { %2495 = vadd.xlane.f32.xlu1 %v2494_v37 }
 0x1e0   :  { %2594 = vrot.lane.b32.xlu0 %v4959_v54, %s4074_s15 }
 0x1e8   :  { %2710 = vrot.lane.b32.xlu0 %v4959_v54, %s4073_s14 }
 0x1f0   :  { %2828 = vrot.lane.b32.xlu0 %v4975_v0, %s4072_s1 }
 0x1f3   :  { %2712 = vrot.lane.b32.xlu2 %v4975_v0, %s4073_s14 }
 0x1f6   :  { %2596 = vrot.lane.b32.xlu1 %v4975_v0, %s4074_s15 }
 0x1fc   :  { %v2707_v27 = vpop.permute.xlu2 %2706 }
 0x1fd   :  { %v2718_v6 = vsel %vm2490_vm4, %v2707_v27, 0.0 }
 0x204   :  { %v2593_v9 = vpop.permute.xlu2 %2592 }
 0x205   :  { %v2605_v56 = vsel %vm2490_vm4, %v2593_v9, 0.0 }
 0x20c   :  { %v2827_v18 = vpop.permute.xlu2 %2826 }
 0x20d   :  { %v2840_v19 = vsel %vm2490_vm4, %v2827_v18, 0.0 }
 0x214   :  { %v2823_v31 = vpop.permute.xlu0 %2822 }
 0x215   :  { %v2591_v34 = vpop.permute.xlu1 %2590  ;;  %v2834_v16 = vsel %vm2490_vm4, %v2823_v31, 0.0 }
 0x216   :  { %v2602_v1 = vsel %vm2490_vm4, %v2591_v34, 0.0 }
 0x21a   :  { %2603 = vadd.xlane.f32.xlu0 %v2602_v1 }
 0x21c   :  { %2501 = vadd.xlane.f32.xlu2 %v2500_v5 }
 0x21d   :  { %v2709_v51 = vpop.permute.xlu1 %2708 }
 0x21e   :  { %v2721_v33 = vsel %vm2490_vm4, %v2709_v51, 0.0 }
 0x222   :  { %2835 = vadd.xlane.f32.xlu0 %v2834_v16 }
 0x224   :  { %2719 = vadd.xlane.f32.xlu2 %v2718_v6 }
 0x225   :  { %v2825_v49 = vpop.permute.xlu1 %2824 }
 0x226   :  { %v2837_v14 = vsel %vm2490_vm4, %v2825_v49, 0.0 }
 0x227   :  { %2838 = vadd.xlane.f32.xlu1 %v2837_v14 }
 0x22c   :  { %2606 = vadd.xlane.f32.xlu2 %v2605_v56 }
 0x234   :  { %2841 = vadd.xlane.f32.xlu2 %v2840_v19 }
 0x23f   :  { %v2493_v21 = vpop.xlane.xlu0 %2492 }
 0x240   :  { %v2510_v4 = vmul.f32 %v4991_v63, %v2493_v21 }
 0x242   :  { %v4995_v23 = vsub.f32 %v4945_v55, %v2510_v4 }
 0x244   :  { %v2518_v24 = vmul.f32 %v4995_v23, %v4995_v23 }
 0x246   :  { %v2522_v28 = vsel %vm2490_vm4, %v2518_v24, 0.0 }
 0x247   :  { %2523 = vadd.xlane.f32.xlu0 %v2522_v28 }
 0x24e   :  { %v2499_v30 = vpop.xlane.xlu2 %2498 }
 0x24f   :  { %v2512_v38 = vmul.f32 %v4991_v63, %v2499_v30  ;;  %2722 = vadd.xlane.f32.xlu0 %v2721_v33 }
 0x250   :  { %v2496_v39 = vpop.xlane.xlu1 %2495 }
 0x251   :  { %v5003_v29 = vsub.f32 %v4959_v54, %v2512_v38  ;;  %v2511_v50 = vmul.f32 %v4991_v63, %v2496_v39 }
 0x252   :  { %v2595_v40 = vpop.permute.xlu0 %2594 }
 0x253   :  { %v5007_v58 = vsub.f32 %v4953_v44, %v2511_v50  ;;  %v2520_v32 = vmul.f32 %v5003_v29, %v5003_v29  ;;  %v2608_v43 = vsel %vm2490_vm4, %v2595_v40, 0.0 }
 0x255   :  { %v2528_v35 = vsel %vm2490_vm4, %v2520_v32, 0.0  ;;  %v2519_v10 = vmul.f32 %v5007_v58, %v5007_v58 }
 0x256   :  { %2529 = vadd.xlane.f32.xlu2 %v2528_v35  ;;  %v2713_v41 = vpop.permute.xlu2 %2712 }
 0x257   :  { %v2525_v25 = vsel %vm2490_vm4, %v2519_v10, 0.0  ;;  %v2727_v42 = vsel %vm2490_vm4, %v2713_v41, 0.0 }
 0x258   :  { %2526 = vadd.xlane.f32.xlu1 %v2525_v25 }
 0x25a   :  { %v2711_v45 = vpop.permute.xlu0 %2710 }
 0x25b   :  { %v2724_v11 = vsel %vm2490_vm4, %v2711_v45, 0.0 }
 0x25e   :  { %2728 = vadd.xlane.f32.xlu2 %v2727_v42 }
 0x260   :  { %2609 = vadd.xlane.f32.xlu1 %v2608_v43 }
 0x262   :  { %v2829_v47 = vpop.permute.xlu0 %2828 }
 0x263   :  { %v2843_v48 = vsel %vm2490_vm4, %v2829_v47, 0.0 }
 0x268   :  { %v2597_v2 = vpop.permute.xlu1 %2596  ;;  %2725 = vadd.xlane.f32.xlu1 %v2724_v11 }
 0x269   :  { %v2611_v46 = vsel %vm2490_vm4, %v2597_v2, 0.0 }
 0x26a   :  { %2612 = vadd.xlane.f32.xlu0 %v2611_v46 }
 0x272   :  { %2844 = vadd.xlane.f32.xlu0 %v2843_v48 }
 0x28d   :  { %v2604_v52 = vpop.xlane.xlu0 %2603 }
 0x28e   :  { %v2614_v8 = vmul.f32 %v2604_v52, %v4991_v63 }
 0x28f   :  { %v2502_v53 = vpop.xlane.xlu2 %2501 }
 0x290   :  { %v5022_v3 = vsub.f32 %v4945_v55, %v2614_v8  ;;  %v2513_v57 = vmul.f32 %v4991_v63, %v2502_v53 }
 0x292   :  { %v5026_v37 = vsub.f32 %v4975_v0, %v2513_v57  ;;  %v2622_v59 = vmul.f32 %v5022_v3, %v5022_v3 }
 0x294   :  { %2630 = vrot.lane.b32.xlu1 %v2622_v59, %s4074_s15  ;;  %v2521_v26 = vmul.f32 %v5026_v37, %v5026_v37 }
 0x295   :  { %v2836_v62 = vpop.xlane.xlu0 %2835 }
 0x296   :  { %v2531_v60 = vsel %vm2490_vm4, %v2521_v26, 0.0  ;;  %v2846_v5 = vmul.f32 %v2836_v62, %v4991_v63 }
 0x297   :  { %v2720_v61 = vpop.xlane.xlu2 %2719  ;;  %2532 = vadd.xlane.f32.xlu0 %v2531_v60 }
 0x298   :  { %v2730_v36 = vmul.f32 %v2720_v61, %v4991_v63  ;;  %v5049_v16 = vsub.f32 %v4945_v55, %v2846_v5 }
 0x29a   :  { %v5036_v13 = vsub.f32 %v4945_v55, %v2730_v36  ;;  %v2839_v34 = vpop.xlane.xlu1 %2838  ;;  %v2854_v49 = vmul.f32 %v5049_v16, %v5049_v16 }
 0x29b   :  { %v2847_v1 = vmul.f32 %v2839_v34, %v4991_v63 }
 0x29c   :  { %v2738_v27 = vmul.f32 %v5036_v13, %v5036_v13 }
 0x29d   :  { %v5043_v51 = vsub.f32 %v4953_v44, %v2847_v1 }
 0x29e   :  { %2746 = vrot.lane.b32.xlu2 %v2738_v27, %s4073_s14 }
 0x29f   :  { %v2855_v31 = vmul.f32 %v5043_v51, %v5043_v51  ;;  %v2607_v6 = vpop.xlane.xlu2 %2606 }
 0x2a0   :  { %v2615_v7 = vmul.f32 %v2607_v6, %v4991_v63 }
 0x2a1   :  { %2864 = vrot.lane.b32.xlu1 %v2855_v31, %s4072_s1 }
 0x2a2   :  { %v5057_v9 = vsub.f32 %v4953_v44, %v2615_v7 }
 0x2a4   :  { %v2623_v14 = vmul.f32 %v5057_v9, %v5057_v9 }
 0x2a6   :  { %2862 = vrot.lane.b32.xlu2 %v2854_v49, %s4072_s1 }
 0x2a7   :  { %v2842_v15 = vpop.xlane.xlu2 %2841 }
 0x2a8   :  { %v2848_v24 = vmul.f32 %v2842_v15, %v4991_v63 }
 0x2aa   :  { %v5084_v30 = vsub.f32 %v4959_v54, %v2848_v24 }
 0x2ac   :  { %v2856_v25 = vmul.f32 %v5084_v30, %v5084_v30 }
 0x2ae   :  { %2632 = vrot.lane.b32.xlu2 %v2623_v14, %s4074_s15 }
 0x2ba   :  { %v5062_v55 = vpop.xlane.xlu0 %2523 }
 0x2c2   :  { %v2723_v17 = vpop.xlane.xlu0 %2722 }
 0x2c3   :  { %v2731_v56 = vmul.f32 %v2723_v17, %v4991_v63 }
 0x2c5   :  { %v5066_v12 = vsub.f32 %v4953_v44, %v2731_v56 }
 0x2c7   :  { %v2739_v18 = vmul.f32 %v5066_v12, %v5066_v12 }
 0x2c9   :  { %2748 = vrot.lane.b32.xlu0 %v2739_v18, %s4073_s14  ;;  %v5073_v20 = vpop.xlane.xlu2 %2529  ;;  %v2534_v18 = vmul.f32 %v5062_v55, %v4991_v63 }
 0x2cb   :  { %v5071_v19 = vpop.xlane.xlu1 %2526  ;;  %v2538_v15 = vadd.f32 1e-05, %v2534_v18  ;;  %v5149_v18 = vld [vmem:[%s5390_s4] ss:$0 sm:$0xff] }
 0x2cd   :  { %4031 = vrsqrt.f32 %v2538_v15  ;;  %vm2548_vm10 = vweird.f32 %v2538_v15 }
 0x2d1   :  { %v2729_v38 = vpop.xlane.xlu2 %2728 }
 0x2d2   :  { %v2733_v32 = vmul.f32 %v2729_v38, %v4991_v63 }
 0x2d3   :  { %v2610_v22 = vpop.xlane.xlu1 %2609  ;;  %v4032_v38 = vpop.eup %4031 }
 0x2d4   :  { %v2616_v21 = vmul.f32 %v2610_v22, %v4991_v63  ;;  %v5099_v40 = vsub.f32 %v4975_v0, %v2733_v32  ;;  %vm2549_vm7 = vweird.f32 %v4032_v38 }
 0x2d5   :  { %vm2550_vm12 = vmor %vm2548_vm10, %vm2549_vm7 }
 0x2d6   :  { %v5077_v4 = vsub.f32 %v4959_v54, %v2616_v21  ;;  %v2741_v45 = vmul.f32 %v5099_v40, %v5099_v40 }
 0x2d8   :  { %v2624_v44 = vmul.f32 %v5077_v4, %v5077_v4 }
 0x2da   :  { %2634 = vrot.lane.b32.xlu0 %v2624_v44, %s4074_s15 }
 0x2db   :  { %v2726_v28 = vpop.xlane.xlu1 %2725 }
 0x2dc   :  { %v2732_v33 = vmul.f32 %v2726_v28, %v4991_v63 }
 0x2dd   :  { %v2613_v39 = vpop.xlane.xlu0 %2612 }
 0x2de   :  { %v5088_v50 = vsub.f32 %v4959_v54, %v2732_v33  ;;  %v2617_v35 = vmul.f32 %v2613_v39, %v4991_v63  ;;  %v2543_v39 = vmul.f32 %v4032_v38, %v2538_v15 }
 0x2e0   :  { %v2740_v10 = vmul.f32 %v5088_v50, %v5088_v50  ;;  %v5102_v54 = vsub.f32 %v4975_v0, %v2617_v35 }
 0x2e2   :  { %2750 = vrot.lane.b32.xlu1 %v2740_v10, %s4073_s14  ;;  %2866 = vrot.lane.b32.xlu0 %v2856_v25, %s4072_s1  ;;  %v2625_v11 = vmul.f32 %v5102_v54, %v5102_v54  ;;  %v2544_v25 = vmul.f32 %v4032_v38, %v2543_v39 }
 0x2e5   :  { %v2845_v41 = vpop.xlane.xlu0 %2844 }
 0x2e6   :  { %v2849_v42 = vmul.f32 %v2845_v41, %v4991_v63 }
 0x2e8   :  { %v5106_v43 = vsub.f32 %v4975_v0, %v2849_v42 }
 0x2ea   :  { %2752 = vrot.lane.b32.xlu0 %v2741_v45, %s4073_s14  ;;  %2636 = vrot.lane.b32.xlu1 %v2625_v11, %s4074_s15  ;;  %v2857_v2 = vmul.f32 %v5106_v43, %v5106_v43 }
 0x2ec   :  { %2868 = vrot.lane.b32.xlu2 %v2857_v2, %s4072_s1  ;;  %v2545_v2 = vmul.f32 0.5, %v2544_v25 }
 0x2f8   :  { %v2747_v46 = vpop.permute.xlu2 %2746 }
 0x2f9   :  { %v2758_v57 = vsel %vm2490_vm4, %v2747_v46, 0.0 }
 0x300   :  { %v2863_v47 = vpop.permute.xlu2 %2862 }
 0x301   :  { %v2874_v52 = vsel %vm2490_vm4, %v2863_v47, 0.0 }
 0x306   :  { %v2631_v48 = vpop.permute.xlu1 %2630 }
 0x307   :  { %v2642_v8 = vsel %vm2490_vm4, %v2631_v48, 0.0 }
 0x308   :  { %v2633_v0 = vpop.permute.xlu2 %2632 }
 0x309   :  { %v2645_v53 = vsel %vm2490_vm4, %v2633_v0, 0.0 }
 0x30a   :  { %v5121_v59 = vpop.xlane.xlu0 %2532 }
 0x313   :  { %v2865_v61 = vpop.permute.xlu1 %2864 }
 0x314   :  { %2875 = vadd.xlane.f32.xlu0 %v2874_v52  ;;  %2643 = vadd.xlane.f32.xlu1 %v2642_v8  ;;  %v2877_v49 = vsel %vm2490_vm4, %v2865_v61, 0.0  ;;  %v2546_v8 = vsub.f32 1.5, %v2545_v2 }
 0x315   :  { %2646 = vadd.xlane.f32.xlu2 %v2645_v53 }
 0x316   :  { %v2547_v61 = vmul.f32 %v4032_v38, %v2546_v8 }
 0x31c   :  { %2759 = vadd.xlane.f32.xlu1 %v2758_v57 }
 0x33b   :  { %v2749_v26 = vpop.permute.xlu0 %2748 }
 0x33c   :  { %v2761_v60 = vsel %vm2490_vm4, %v2749_v26, 0.0 }
 0x33d   :  { %2762 = vadd.xlane.f32.xlu0 %v2761_v60 }
 0x346   :  { %v2869_v34 = vpop.permute.xlu2 %2868 }
 0x347   :  { %v2883_v27 = vsel %vm2490_vm4, %v2869_v34, 0.0 }
 0x34c   :  { %v2635_v36 = vpop.permute.xlu0 %2634 }
 0x34d   :  { %v2648_v62 = vsel %vm2490_vm4, %v2635_v36, 0.0 }
 0x34e   :  { %2649 = vadd.xlane.f32.xlu0 %v2648_v62 }
 0x354   :  { %v2751_v1 = vpop.permute.xlu1 %2750  ;;  %v2867_v31 = vpop.permute.xlu0 %2866 }
 0x355   :  { %v2764_v5 = vsel %vm2490_vm4, %v2751_v1, 0.0  ;;  %v2880_v56 = vsel %vm2490_vm4, %v2867_v31, 0.0 }
 0x356   :  { %2765 = vadd.xlane.f32.xlu2 %v2764_v5  ;;  %2884 = vadd.xlane.f32.xlu0 %v2883_v27  ;;  %v2551_v5 = vsel %vm2550_vm12, %v4032_v38, %v2547_v61 }
 0x35c   :  { %v2637_v6 = vpop.permute.xlu1 %2636  ;;  %v2753_v14 = vpop.permute.xlu0 %2752 }
 0x35d   :  { %v2651_v7 = vsel %vm2490_vm4, %v2637_v6, 0.0  ;;  %v2767_v17 = vsel %vm2490_vm4, %v2753_v14, 0.0  ;;  %v5141_v14 = vld [vmem:[%s5389_s3] ss:$0 sm:$0xff] }
 0x35e   :  { %2652 = vadd.xlane.f32.xlu1 %v2651_v7  ;;  %2878 = vadd.xlane.f32.xlu2 %v2877_v49  ;;  %v2582_v7 = vmul.f32 %v2551_v5, %v4995_v23 }
 0x366   :  { %2768 = vadd.xlane.f32.xlu1 %v2767_v17 }
 0x36e   :  { %2881 = vadd.xlane.f32.xlu1 %v2880_v56 }
 0x387   :  { %v2644_v22 = vpop.xlane.xlu1 %2643  ;;  %v2876_v21 = vpop.xlane.xlu0 %2875 }
 0x388   :  { %v2654_v24 = vmul.f32 %v2644_v22, %v4991_v63  ;;  %v2886_v44 = vmul.f32 %v2876_v21, %v4991_v63 }
 0x38a   :  { %v2658_v28 = vadd.f32 1e-05, %v2654_v24  ;;  %v2890_v33 = vadd.f32 1e-05, %v2886_v44 }
 0x38c   :  { %4033 = vrsqrt.f32 %v2658_v28  ;;  %vm2668_vm8 = vweird.f32 %v2658_v28  ;;  %vm2900_vm14 = vweird.f32 %v2890_v33 }
 0x38d   :  { %4035 = vrsqrt.f32 %v2890_v33 }
 0x38f   :  { %v2760_v32 = vpop.xlane.xlu1 %2759 }
 0x390   :  { %v2770_v35 = vmul.f32 %v2760_v32, %v4991_v63 }
 0x392   :  { %v4034_v10 = vpop.eup %4033  ;;  %v2774_v55 = vadd.f32 1e-05, %v2770_v35  ;;  %v2537_v35 = vmul.f32 %v5121_v59, %v4991_v63 }
 0x393   :  { %v4036_v41 = vpop.eup %4035  ;;  %v2663_v42 = vmul.f32 %v4034_v10, %v2658_v28  ;;  %vm2669_vm6 = vweird.f32 %v4034_v10 }
 0x394   :  { %v2895_v45 = vmul.f32 %v4036_v41, %v2890_v33  ;;  %4037 = vrsqrt.f32 %v2774_v55  ;;  %vm2670_vm9 = vmor %vm2668_vm8, %vm2669_vm6  ;;  %vm2901_vm11 = vweird.f32 %v4036_v41  ;;  %vm2784_vm0 = vweird.f32 %v2774_v55 }
 0x395   :  { %v2664_v11 = vmul.f32 %v4034_v10, %v2663_v42  ;;  %vm2902_vm15 = vmor %vm2900_vm14, %vm2901_vm11 }
 0x396   :  { %v2896_v46 = vmul.f32 %v4036_v41, %v2895_v45 }
 0x397   :  { %v2665_v47 = vmul.f32 0.5, %v2664_v11  ;;  %v5183_v11 = vadd.f32 1e-05, %v2537_v35 }
 0x398   :  { %v2897_v48 = vmul.f32 0.5, %v2896_v46 }
 0x399   :  { %v2666_v0 = vsub.f32 1.5, %v2665_v47 }
 0x39a   :  { %v4038_v52 = vpop.eup %4037  ;;  %v2898_v26 = vsub.f32 1.5, %v2897_v48 }
 0x39b   :  { %v2779_v53 = vmul.f32 %v4038_v52, %v2774_v55  ;;  %v2667_v57 = vmul.f32 %v4034_v10, %v2666_v0  ;;  %vm2785_vm13 = vweird.f32 %v4038_v52 }
 0x39c   :  { %v2899_v34 = vmul.f32 %v4036_v41, %v2898_v26  ;;  %vm2786_vm1 = vmor %vm2784_vm0, %vm2785_vm13 }
 0x39d   :  { %v2780_v60 = vmul.f32 %v4038_v52, %v2779_v53  ;;  %v2671_v62 = vsel %vm2670_vm9, %v4034_v10, %v2667_v57 }
 0x39e   :  { %v2702_v27 = vmul.f32 %v2671_v62, %v5022_v3  ;;  %v2903_v6 = vsel %vm2902_vm15, %v4036_v41, %v2899_v34 }
 0x39f   :  { %v2781_v36 = vmul.f32 0.5, %v2780_v60  ;;  %v2934_v3 = vmul.f32 %v2903_v6, %v5049_v16  ;;  %v2535_v16 = vmul.f32 %v5071_v19, %v4991_v63  ;;  %v2536_v19 = vmul.f32 %v5073_v20, %v4991_v63 }
 0x3a0   :  { %v2938_v56 = vsel %vm2490_vm4, %v2582_v7, %v2702_v27 }
 0x3a1   :  { %v2782_v1 = vsub.f32 1.5, %v2781_v36  ;;  %v5162_v33 = vadd.f32 1e-05, %v2535_v16  ;;  %v5181_v41 = vadd.f32 1e-05, %v2536_v19 }
 0x3a3   :  { %v2783_v31 = vmul.f32 %v4038_v52, %v2782_v1  ;;  %4039 = vrsqrt.f32 %v5162_v33  ;;  %vm2558_vm5 = vweird.f32 %v5162_v33 }
 0x3a5   :  { %v2787_v49 = vsel %vm2786_vm1, %v4038_v52, %v2783_v31 }
 0x3a6   :  { %v2818_v17 = vmul.f32 %v2787_v49, %v5036_v13  ;;  %v2647_v13 = vpop.xlane.xlu2 %2646 }
 0x3a7   :  { %v2655_v44 = vmul.f32 %v2647_v13, %v4991_v63 }
 0x3a8   :  { %v2943_v23 = vsel %vm2942_vm2, %v2938_v56, %v2818_v17 }
 0x3a9   :  { %v2948_v15 = vsel %vm2947_vm3, %v2943_v23, %v2934_v3  ;;  %v5164_v38 = vadd.f32 1e-05, %v2655_v44  ;;  %v5175_v10 = vpop.eup %4039 }
 0x3aa   :  { %v2956_v22 = vmul.f32 %v5141_v14, %v2948_v15  ;;  %v2553_v20 = vmul.f32 %v5175_v10, %v5162_v33  ;;  %vm2559_vm6 = vweird.f32 %v5175_v10 }
 0x3ab   :  { %4041 = vrsqrt.f32 %v5164_v38  ;;  %vm5248_vm9 = vmor %vm2558_vm5, %vm2559_vm6  ;;  %vm2678_vm10 = vweird.f32 %v5164_v38 }
 0x3ac   :  { %v2964_v21 = vadd.f32 %v5149_v18, %v2956_v22  ;;  %v2554_v52 = vmul.f32 %v5175_v10, %v2553_v20 }
 0x3ae   :  { %2968 = vst [vmem:[%s5391_s5] sm:$0xff] %v2964_v21  ;;  %v2555_v1 = vmul.f32 0.5, %v2554_v52 }
 0x3b0   :  { %v2763_v24 = vpop.xlane.xlu0 %2762  ;;  %v2556_v56 = vsub.f32 1.5, %v2555_v1 }
 0x3b1   :  { %v2771_v28 = vmul.f32 %v2763_v24, %v4991_v63  ;;  %v5177_v25 = vpop.eup %4041 }
 0x3b2   :  { %v2673_v59 = vmul.f32 %v5177_v25, %v5164_v38  ;;  %vm2679_vm7 = vweird.f32 %v5177_v25 }
 0x3b3   :  { %v5166_v39 = vadd.f32 1e-05, %v2771_v28  ;;  %v2557_v28 = vmul.f32 %v5175_v10, %v2556_v56  ;;  %vm5258_vm11 = vmor %vm2678_vm10, %vm2679_vm7 }
 0x3b4   :  { %v2674_v8 = vmul.f32 %v5177_v25, %v2673_v59 }
 0x3b5   :  { %4043 = vrsqrt.f32 %v5166_v39  ;;  %vm2794_vm12 = vweird.f32 %v5166_v39  ;;  %v2561_v38 = vsel %vm5248_vm9, %v5175_v10, %v2557_v28 }
 0x3b6   :  { %4045 = vrsqrt.f32 %v5181_v41  ;;  %v2675_v5 = vmul.f32 0.5, %v2674_v8 }
 0x3b7   :  { %4047 = vrsqrt.f32 %v5183_v11 }
 0x3b8   :  { %v2676_v23 = vsub.f32 1.5, %v2675_v5 }
 0x3ba   :  { %v2677_v19 = vmul.f32 %v5177_v25, %v2676_v23 }
 0x3bb   :  { %v5179_v55 = vpop.eup %4043 }
 0x3bc   :  { %v2789_v47 = vmul.f32 %v5179_v55, %v5166_v39  ;;  %v5208_v34 = vpop.eup %4045  ;;  %vm2795_vm8 = vweird.f32 %v5179_v55  ;;  %v2681_v39 = vsel %vm5258_vm11, %v5177_v25, %v2677_v19 }
 0x3bd   :  { %v5211_v27 = vpop.eup %4047  ;;  %v2563_v17 = vmul.f32 %v5208_v34, %v5181_v41  ;;  %vm5270_vm13 = vmor %vm2794_vm12, %vm2795_vm8  ;;  %v2703_v25 = vmul.f32 %v2681_v39, %v5057_v9  ;;  %vm2569_vm1 = vweird.f32 %v5208_v34  ;;  %vm2578_vm8 = vweird.f32 %v5183_v11 }
 0x3be   :  { %v2790_v57 = vmul.f32 %v5179_v55, %v2789_v47  ;;  %v2573_v3 = vmul.f32 %v5211_v27, %v5183_v11  ;;  %vm2579_vm5 = vweird.f32 %v5211_v27 }
 0x3bf   :  { %v2564_v16 = vmul.f32 %v5208_v34, %v2563_v17  ;;  %vm5311_vm10 = vmor %vm2578_vm8, %vm2579_vm5  ;;  %vm2568_vm8 = vweird.f32 %v5181_v41 }
 0x3c0   :  { %v2791_v31 = vmul.f32 0.5, %v2790_v57 }
 0x3c1   :  { %v2650_v32 = vpop.xlane.xlu0 %2649 }
 0x3c2   :  { %v2656_v46 = vmul.f32 %v2650_v32, %v4991_v63  ;;  %v2792_v15 = vsub.f32 1.5, %v2791_v31  ;;  %v2574_v32 = vmul.f32 %v5211_v27, %v2573_v3  ;;  %v2583_v3 = vmul.f32 %v2561_v38, %v5007_v58 }
 0x3c4   :  { %v5200_v53 = vadd.f32 1e-05, %v2656_v46  ;;  %v2575_v57 = vmul.f32 0.5, %v2574_v32  ;;  %v2939_v20 = vsel %vm2490_vm4, %v2583_v3, %v2703_v25 }
 0x3c9   :  { %v2766_v42 = vpop.xlane.xlu2 %2765  ;;  %v2885_v45 = vpop.xlane.xlu0 %2884 }
 0x3ca   :  { %v2889_v2 = vmul.f32 %v2885_v45, %v4991_v63  ;;  %v2772_v48 = vmul.f32 %v2766_v42, %v4991_v63  ;;  %v2793_v42 = vmul.f32 %v5179_v55, %v2792_v15 }
 0x3cc   :  { %v5194_v0 = vadd.f32 1e-05, %v2889_v2  ;;  %v5203_v26 = vadd.f32 1e-05, %v2772_v48  ;;  %v2565_v48 = vmul.f32 0.5, %v2564_v16 }
 0x3ce   :  { %4049 = vrsqrt.f32 %v5194_v0  ;;  %v2566_v56 = vsub.f32 1.5, %v2565_v48 }
 0x3cf   :  { %4051 = vrsqrt.f32 %v5200_v53 }
 0x3d0   :  { %4053 = vrsqrt.f32 %v5203_v26 }
 0x3d1   :  { %v2653_v60 = vpop.xlane.xlu1 %2652  ;;  %v2879_v61 = vpop.xlane.xlu2 %2878 }
 0x3d2   :  { %v2657_v36 = vmul.f32 %v2653_v60, %v4991_v63  ;;  %v2887_v62 = vmul.f32 %v2879_v61, %v4991_v63 }
 0x3d4   :  { %v5214_v6 = vadd.f32 1e-05, %v2657_v36  ;;  %v5216_v7 = vadd.f32 1e-05, %v2887_v62  ;;  %v5218_v49 = vpop.eup %4049  ;;  %v2797_v36 = vsel %vm5270_vm13, %v5179_v55, %v2793_v42 }
 0x3d5   :  { %v5226_v22 = vpop.eup %4051  ;;  %v2925_v21 = vmul.f32 %v5218_v49, %v5194_v0  ;;  %vm2931_vm11 = vweird.f32 %v5218_v49 }
 0x3d6   :  { %4055 = vrsqrt.f32 %v5214_v6  ;;  %v5230_v24 = vpop.eup %4053  ;;  %v2683_v33 = vmul.f32 %v5226_v22, %v5200_v53  ;;  %vm2910_vm15 = vweird.f32 %v5216_v7  ;;  %vm2698_vm7 = vweird.f32 %v5214_v6 }
 0x3d7   :  { %4057 = vrsqrt.f32 %v5216_v7  ;;  %v2799_v59 = vmul.f32 %v5230_v24, %v5203_v26  ;;  %v2926_v46 = vmul.f32 %v5218_v49, %v2925_v21  ;;  %v2576_v21 = vsub.f32 1.5, %v2575_v57 }
 0x3d8   :  { %v2684_v62 = vmul.f32 %v5226_v22, %v2683_v33  ;;  %vm2689_vm13 = vweird.f32 %v5226_v22  ;;  %vm2805_vm5 = vweird.f32 %v5230_v24 }
 0x3d9   :  { %v2769_v13 = vpop.xlane.xlu1 %2768  ;;  %v2800_v1 = vmul.f32 %v5230_v24, %v2799_v59  ;;  %v2927_v5 = vmul.f32 0.5, %v2926_v46  ;;  %v2577_v33 = vmul.f32 %v5211_v27, %v2576_v21 }
 0x3da   :  { %v2773_v44 = vmul.f32 %v2769_v13, %v4991_v63  ;;  %v2819_v13 = vmul.f32 %v2797_v36, %v5066_v12  ;;  %v5295_v12 = vmul.f32 %v5208_v34, %v2566_v56 }
 0x3db   :  { %v2801_v19 = vmul.f32 0.5, %v2800_v1  ;;  %v2928_v42 = vsub.f32 1.5, %v2927_v5 }
 0x3dc   :  { %v5240_v35 = vpop.eup %4055  ;;  %v5246_v45 = vadd.f32 1e-05, %v2773_v44  ;;  %v2685_v44 = vmul.f32 0.5, %v2684_v62 }
 0x3dd   :  { %v4058_v2 = vpop.eup %4057  ;;  %v2693_v47 = vmul.f32 %v5240_v35, %v5214_v6  ;;  %vm2699_vm0 = vweird.f32 %v5240_v35  ;;  %v2802_v57 = vsub.f32 1.5, %v2801_v19  ;;  %v2929_v6 = vmul.f32 %v5218_v49, %v2928_v42 }
 0x3de   :  { %v2905_v8 = vmul.f32 %v4058_v2, %v5216_v7  ;;  %4059 = vrsqrt.f32 %v5246_v45  ;;  %vm2911_vm14 = vweird.f32 %v4058_v2  ;;  %v2686_v59 = vsub.f32 1.5, %v2685_v44  ;;  %vm5306_vm9 = vmor %vm2698_vm7, %vm2699_vm0 }
 0x3df   :  { %v2694_v61 = vmul.f32 %v5240_v35, %v2693_v47  ;;  %vm2912_vm6 = vmor %vm2910_vm15, %vm2911_vm14  ;;  %v2944_v47 = vsel %vm2942_vm2, %v2939_v20, %v2819_v13  ;;  %vm2930_vm14 = vweird.f32 %v5194_v0  ;;  %vm2814_vm0 = vweird.f32 %v5246_v45 }
 0x3e0   :  { %v2906_v10 = vmul.f32 %v4058_v2, %v2905_v8  ;;  %v2687_v39 = vmul.f32 %v5226_v22, %v2686_v59  ;;  %vm5328_vm15 = vmor %vm2930_vm14, %vm2931_vm11  ;;  %v2803_v1 = vmul.f32 %v5230_v24, %v2802_v57  ;;  %vm2688_vm7 = vweird.f32 %v5200_v53 }
 0x3e1   :  { %v2695_v31 = vmul.f32 0.5, %v2694_v61  ;;  %v2882_v17 = vpop.xlane.xlu1 %2881  ;;  %v2933_v0 = vsel %vm5328_vm15, %v5218_v49, %v2929_v6 }
 0x3e2   :  { %v2907_v23 = vmul.f32 0.5, %v2906_v10  ;;  %v2888_v15 = vmul.f32 %v2882_v17, %v4991_v63  ;;  %v2937_v41 = vmul.f32 %v2933_v0, %v5106_v43 }
 0x3e3   :  { %v2696_v55 = vsub.f32 1.5, %v2695_v31 }
 0x3e4   :  { %v4060_v16 = vpop.eup %4059  ;;  %v2908_v28 = vsub.f32 1.5, %v2907_v23  ;;  %v5287_v32 = vadd.f32 1e-05, %v2888_v15 }
 0x3e5   :  { %v2809_v58 = vmul.f32 %v4060_v16, %v5246_v45  ;;  %v2697_v63 = vmul.f32 %v5240_v35, %v2696_v55  ;;  %vm2815_vm12 = vweird.f32 %v4060_v16 }
 0x3e6   :  { %v2909_v9 = vmul.f32 %v4058_v2, %v2908_v28  ;;  %4061 = vrsqrt.f32 %v5287_v32 }
 0x3e7   :  { %v2810_v7 = vmul.f32 %v4060_v16, %v2809_v58  ;;  %v2701_v11 = vsel %vm5306_vm9, %v5240_v35, %v2697_v63  ;;  %vm5347_vm9 = vmor %vm2688_vm7, %vm2689_vm13 }
 0x3e8   :  { %v2913_v46 = vsel %vm2912_vm6, %v4058_v2, %v2909_v9  ;;  %v2581_v2 = vsel %vm5311_vm10, %v5211_v27, %v2577_v33  ;;  %v2705_v35 = vmul.f32 %v2701_v11, %v5102_v54  ;;  %vm2816_vm6 = vmor %vm2814_vm0, %vm2815_vm12  ;;  %vm2804_vm10 = vweird.f32 %v5203_v26 }
 0x3e9   :  { %v2935_v52 = vmul.f32 %v2913_v46, %v5043_v51  ;;  %v2811_v8 = vmul.f32 0.5, %v2810_v7  ;;  %v2585_v31 = vmul.f32 %v2581_v2, %v5026_v37  ;;  %v2691_v53 = vsel %vm5347_vm9, %v5226_v22, %v2687_v39  ;;  %vm2806_vm11 = vmor %vm2804_vm10, %vm2805_vm5 }
 0x3ea   :  { %vm2570_vm12 = vmor %vm2568_vm8, %vm2569_vm1  ;;  %v2807_v26 = vsel %vm2806_vm11, %v5230_v24, %v2803_v1  ;;  %v2704_v22 = vmul.f32 %v2691_v53, %v5077_v4  ;;  %vm2920_vm1 = vweird.f32 %v5287_v32 }
 0x3eb   :  { %v2949_v51 = vsel %vm2947_vm3, %v2944_v47, %v2935_v52  ;;  %v2812_v60 = vsub.f32 1.5, %v2811_v8  ;;  %v2941_v49 = vsel %vm2490_vm4, %v2585_v31, %v2705_v35  ;;  %v2820_v21 = vmul.f32 %v2807_v26, %v5088_v50 }
 0x3ec   :  { %v4062_v61 = vpop.eup %4061  ;;  %v2957_v36 = vmul.f32 %v5141_v14, %v2949_v51 }
 0x3ed   :  { %v2813_v27 = vmul.f32 %v4060_v16, %v2812_v60  ;;  %v2915_v10 = vmul.f32 %v4062_v61, %v5287_v32  ;;  %vm2921_vm13 = vweird.f32 %v4062_v61 }
 0x3ee   :  { %v2965_v5 = vadd.f32 %v5149_v18, %v2957_v36  ;;  %vm2922_vm14 = vmor %vm2920_vm1, %vm2921_vm13 }
 0x3ef   :  { %v2817_v54 = vsel %vm2816_vm6, %v4060_v16, %v2813_v27  ;;  %v2916_v45 = vmul.f32 %v4062_v61, %v2915_v10 }
 0x3f0   :  { %2969 = vst [vmem:[%s5391_s5 + $0x8] sm:$0xff] %v2965_v5  ;;  %v2821_v37 = vmul.f32 %v2817_v54, %v5099_v40  ;;  %v2571_v40 = vsel %vm2570_vm12, %v5208_v34, %v5295_v12 }
 0x3f1   :  { %v2917_v56 = vmul.f32 0.5, %v2916_v45  ;;  %v2584_v24 = vmul.f32 %v2571_v40, %v5003_v29 }
 0x3f2   :  { %v2946_v3 = vsel %vm2942_vm2, %v2941_v49, %v2821_v37 }
 0x3f3   :  { %v2951_v23 = vsel %vm2947_vm3, %v2946_v3, %v2937_v41  ;;  %v2918_v15 = vsub.f32 1.5, %v2917_v56  ;;  %v2940_v34 = vsel %vm2490_vm4, %v2584_v24, %v2704_v22 }
 0x3f4   :  { %v2959_v43 = vmul.f32 %v5141_v14, %v2951_v23  ;;  %v2945_v16 = vsel %vm2942_vm2, %v2940_v34, %v2820_v21 }
 0x3f5   :  { %v2919_v25 = vmul.f32 %v4062_v61, %v2918_v15 }
 0x3f6   :  { %v2967_v13 = vadd.f32 %v5149_v18, %v2959_v43 }
 0x3f7   :  { %v2923_v55 = vsel %vm2922_vm14, %v4062_v61, %v2919_v25 }
 0x3f8   :  { %2971 = vst [vmem:[%s5391_s5 + $0x18] sm:$0xff] %v2967_v13  ;;  %v2936_v4 = vmul.f32 %v2923_v55, %v5084_v30 }
 0x3fa   :  { %v2950_v50 = vsel %vm2947_vm3, %v2945_v16, %v2936_v4 }
 0x3fb   :  { %v2958_v44 = vmul.f32 %v5141_v14, %v2950_v50 }
 0x3fd   :  { %v2966_v29 = vadd.f32 %v5149_v18, %v2958_v44 }
 0x3ff   :  { %2970 = vst [vmem:[%s5391_s5 + $0x10] sm:$0xff] %v2966_v29 }

</bundles_post_ra>
